<compile_context>
chip_gen: v5e
topology: v5e:2x2
jax: 0.10.0
libtpu: 0.0.40
codegen_flags: <defaults>
</compile_context>

<pallas_src>
import functools

import numpy as np
import jax
import jax.numpy as jnp
from jax.experimental import pallas as pl
from jax.experimental.pallas import tpu as pltpu


# ----------------------------------------------------------------------------
# Pallas kernel 1: fused (multi-)matmul + bias + optional ReLU.
#   out(Cout, N) = act( sum_j W_j(Cout, K_j) @ X_j(K_j, N) + b(Cout, 1) )
# Channels live on sublanes, spatial (B*Ho*Wo) on lanes -> lane-dense stores.
# ----------------------------------------------------------------------------
def _fused_mm_kernel(nin, act, *refs):
    o_ref = refs[-1]
    b_ref = refs[-2]
    acc = jnp.dot(refs[0][...], refs[1][...], preferred_element_type=jnp.float32)
    for j in range(1, nin):
        acc = acc + jnp.dot(refs[2 * j][...], refs[2 * j + 1][...],
                            preferred_element_type=jnp.float32)
    acc = acc + b_ref[...]
    if act == "relu":
        acc = jnp.maximum(acc, 0.0)
    o_ref[...] = acc.astype(o_ref.dtype)


def _pick_tile_n(n):
    # Lane-axis tile: >=2 blocks on the larger calls (v7x megacore), full N on
    # small ones; always a multiple of 128 or the full dim ((8,128) rule).
    if n >= 512 and n % 256 == 0:
        return n // 2
    return n


def fused_matmul(pairs, bias, act="none", out_dtype=jnp.float32):
    """pairs: list of (W (Cout,K_j), X (K_j,N)).  Returns act(sum_j W@X + b)."""
    cout = pairs[0][0].shape[0]
    n = pairs[0][1].shape[1]
    tn = _pick_tile_n(n)
    nin = len(pairs)
    args, in_specs = [], []
    for wmat, xmat in pairs:
        k = wmat.shape[1]
        args.append(wmat.astype(jnp.bfloat16))
        in_specs.append(pl.BlockSpec((cout, k), lambda i: (0, 0)))
        args.append(xmat.astype(jnp.bfloat16))
        in_specs.append(pl.BlockSpec((k, tn), lambda i: (0, i)))
    args.append(bias.reshape(cout, 1).astype(jnp.float32))
    in_specs.append(pl.BlockSpec((cout, 1), lambda i: (0, 0)))
    return pl.pallas_call(
        functools.partial(_fused_mm_kernel, nin, act),
        out_shape=jax.ShapeDtypeStruct((cout, n), out_dtype),
        grid=(n // tn,),
        in_specs=in_specs,
        out_specs=pl.BlockSpec((cout, tn), lambda i: (0, i)),
        compiler_params=pltpu.CompilerParams(dimension_semantics=("parallel",)),
    )(*args)


# ----------------------------------------------------------------------------
# im2col in the internal (C, B, H, W) layout -> patches (C*kh*kw, B*Ho*Wo).
# Pure pad/slice/stack glue, kept in bf16 so the HBM round trip is halved.
# TODO(synk): the kh*kw patch expansion could be removed with halo-read
# BlockSpecs + shifted slices in VMEM; at these tiny feature-map sizes the
# launch count dominates, so im2col is retained.
# ----------------------------------------------------------------------------
def _im2col_cbhw(x, kh, kw, stride, pad):
    c, b, h, w = x.shape
    ho = (h + 2 * pad - kh) // stride + 1
    wo = (w + 2 * pad - kw) // stride + 1
    xp = jnp.pad(x, ((0, 0), (0, 0), (pad, pad), (pad, pad)))
    cols = []
    for di in range(kh):
        for dj in range(kw):
            cols.append(xp[:, :, di:di + stride * ho:stride,
                            dj:dj + stride * wo:stride])
    patches = jnp.stack(cols, axis=1)                 # (C, kh*kw, B, Ho, Wo)
    return patches.reshape(c * kh * kw, b * ho * wo), ho, wo


def conv3x3(x, weight, bias, stride=1, pad=1, act="relu", out_dtype=jnp.bfloat16):
    c, b, _, _ = x.shape
    cout, cin, kh, kw = weight.shape
    assert cin == c
    patches, ho, wo = _im2col_cbhw(x, kh, kw, stride, pad)
    wmat = weight.reshape(cout, cin * kh * kw)
    out = fused_matmul([(wmat, patches)], bias, act=act, out_dtype=out_dtype)
    return out.reshape(cout, b, ho, wo)


# ----------------------------------------------------------------------------
# Bilinear resize (align_corners=False, PyTorch semantics) as ONE wide matmul:
#   X(C, B*H*W) @ [I_B (x) Rh (x) Rw]^T  ->  (C, B*Ho*Wo),  lane-dense output.
# ----------------------------------------------------------------------------
def _make_interp_matrix(out_size, in_size):
    scale = in_size / out_size
    dst = np.arange(out_size)
    src = np.maximum((dst + 0.5) * scale - 0.5, 0.0)
    i0 = np.minimum(np.floor(src).astype(np.int64), in_size - 1)
    i1 = np.minimum(i0 + 1, in_size - 1)
    lam = np.clip(src - i0, 0.0, 1.0)
    r = np.zeros((out_size, in_size), np.float32)
    r[dst, i0] += (1.0 - lam).astype(np.float32)
    r[dst, i1] += lam.astype(np.float32)
    return r


def _resize_matrix_T(b, h, w, oh, ow):
    rh = _make_interp_matrix(oh, h)
    rw = _make_interp_matrix(ow, w)
    r = np.kron(np.eye(b, dtype=np.float32), np.kron(rh, rw))   # (b*oh*ow, b*h*w)
    return jnp.asarray(r.T)                                     # (b*h*w, b*oh*ow)


# ----------------------------------------------------------------------------
# Pallas kernel 2: fused ASPP-lite + decoder-input stage (single launch).
#   a1      = relu(Wa @ high + ba)                       (1x1 branch)
#   pooled  = high @ pool_mat                            (per-batch global avg pool)
#   a2      = relu(Wp @ pooled + bp)                     (image-pooling branch)
#   aspp    = relu(Wq1 @ a1 + (Wq2 @ a2) @ bcast + bq)   (projection of concat, no concat)
#   aspp_up = aspp @ RupT                                (bilinear up to low-res)
#   lowp    = relu(Wl @ low + bl)                        (low-level 1x1 projection)
# Everything here is tiny, so it is one grid-less block and f32 math.
# ----------------------------------------------------------------------------
def _aspp_dec_kernel(high_ref, low_ref, poolm_ref, bcast_ref, rupT_ref,
                     wa_ref, ba_ref, wp_ref, bp_ref,
                     wq1_ref, wq2_ref, bq_ref, wl_ref, bl_ref,
                     asppup_ref, lowp_ref):
    f32 = jnp.float32
    high = high_ref[...].astype(f32)
    low = low_ref[...].astype(f32)
    a1 = jnp.maximum(
        jnp.dot(wa_ref[...], high, preferred_element_type=f32) + ba_ref[...], 0.0)
    pooled = jnp.dot(high, poolm_ref[...], preferred_element_type=f32)         # (32, B)
    a2 = jnp.maximum(
        jnp.dot(wp_ref[...], pooled, preferred_element_type=f32) + bp_ref[...], 0.0)
    p2 = jnp.dot(wq2_ref[...], a2, preferred_element_type=f32)                 # (16, B)
    aspp = jnp.maximum(
        jnp.dot(wq1_ref[...], a1, preferred_element_type=f32)
        + jnp.dot(p2, bcast_ref[...], preferred_element_type=f32)
        + bq_ref[...], 0.0)                                                    # (16, B*h8*w8)
    asppup_ref[...] = jnp.dot(aspp, rupT_ref[...],
                              preferred_element_type=f32).astype(asppup_ref.dtype)
    lowp = jnp.maximum(
        jnp.dot(wl_ref[...], low, preferred_element_type=f32) + bl_ref[...], 0.0)
    lowp_ref[...] = lowp.astype(lowp_ref.dtype)


# ----------------------------------------------------------------------------
# Pallas kernel 3: classifier 1x1 conv fused with the final bilinear resize.
#   out(2, B*H*W) = Wcls @ dec @ RfullT + bcls
# (rows of the resize operator sum to 1, so the bias passes through exactly.)
# ----------------------------------------------------------------------------
def _cls_resize_kernel(wc_ref, dec_ref, rT_ref, b_ref, o_ref):
    logits = jnp.dot(wc_ref[...], dec_ref[...], preferred_element_type=jnp.float32)
    logits = logits.astype(rT_ref.dtype)
    out = jnp.dot(logits, rT_ref[...], preferred_element_type=jnp.float32) + b_ref[...]
    o_ref[...] = out.astype(o_ref.dtype)


def cls_and_resize(dec, wcls, bcls, rfullT):
    cout, kc = wcls.shape
    cdec, m2 = dec.shape
    mout = rfullT.shape[1]
    tn = _pick_tile_n(mout)
    return pl.pallas_call(
        _cls_resize_kernel,
        out_shape=jax.ShapeDtypeStruct((cout, mout), jnp.bfloat16),
        grid=(mout // tn,),
        in_specs=[
            pl.BlockSpec((cout, kc), lambda i: (0, 0)),
            pl.BlockSpec((cdec, m2), lambda i: (0, 0)),
            pl.BlockSpec((m2, tn), lambda i: (0, i)),
            pl.BlockSpec((cout, 1), lambda i: (0, 0)),
        ],
        out_specs=pl.BlockSpec((cout, tn), lambda i: (0, i)),
        compiler_params=pltpu.CompilerParams(dimension_semantics=("parallel",)),
    )(wcls.astype(jnp.bfloat16), dec.astype(jnp.bfloat16),
      rfullT.astype(jnp.bfloat16), bcls.reshape(cout, 1).astype(jnp.float32))


# ----------------------------------------------------------------------------
# Pallas kernel 4: fused ConvLSTM cell.  Gates live on the sublane axis
# (z is (4*hd, tile_n)), spatial on the lane axis, so gate slicing is a
# whole-sublane select and h/c stores are full-lane writes.  The reference
# cell's concat([x, h]) conv is replaced by Wx@Px + Wh@Ph (split weights).
# Gate order matches the reference ConvLSTM: i, f, o, g.
# ----------------------------------------------------------------------------
def _convlstm_kernel(hd, px_ref, wx_ref, ph_ref, wh_ref, b_ref, c_ref,
                     h_out_ref, c_out_ref):
    z = jnp.dot(wx_ref[...], px_ref[...], preferred_element_type=jnp.float32)
    z = z + jnp.dot(wh_ref[...], ph_ref[...], preferred_element_type=jnp.float32)
    z = z + b_ref[...]
    i = jax.nn.sigmoid(z[0 * hd:1 * hd, :])
    f = jax.nn.sigmoid(z[1 * hd:2 * hd, :])
    o = jax.nn.sigmoid(z[2 * hd:3 * hd, :])
    g = jnp.tanh(z[3 * hd:4 * hd, :])
    c_next = f * c_ref[...] + i * g
    h_out_ref[...] = o * jnp.tanh(c_next)
    c_out_ref[...] = c_next


def convlstm_cell(x_int, h_int, c_int, weight, bias, hidden_dim=2):
    # x_int, h_int: (C, B, H, W) bf16;  c_int: (hd, B*H*W) f32
    cin = x_int.shape[0]
    b, hh, ww = x_int.shape[1], x_int.shape[2], x_int.shape[3]
    n = b * hh * ww
    px, _, _ = _im2col_cbhw(x_int, 3, 3, 1, 1)                    # (cin*9, N)
    ph, _, _ = _im2col_cbhw(h_int, 3, 3, 1, 1)                    # (hd*9,  N)
    ng = 4 * hidden_dim
    wx = weight[:, :cin].reshape(ng, cin * 9).astype(jnp.bfloat16)
    wh = weight[:, cin:].reshape(ng, hidden_dim * 9).astype(jnp.bfloat16)
    kx, khd = px.shape[0], ph.shape[0]
    tn = _pick_tile_n(n)
    h_flat, c_flat = pl.pallas_call(
        functools.partial(_convlstm_kernel, hidden_dim),
        out_shape=(jax.ShapeDtypeStruct((hidden_dim, n), jnp.float32),
                   jax.ShapeDtypeStruct((hidden_dim, n), jnp.float32)),
        grid=(n // tn,),
        in_specs=[
            pl.BlockSpec((kx, tn), lambda i: (0, i)),
            pl.BlockSpec((ng, kx), lambda i: (0, 0)),
            pl.BlockSpec((khd, tn), lambda i: (0, i)),
            pl.BlockSpec((ng, khd), lambda i: (0, 0)),
            pl.BlockSpec((ng, 1), lambda i: (0, 0)),
            pl.BlockSpec((hidden_dim, tn), lambda i: (0, i)),
        ],
        out_specs=(pl.BlockSpec((hidden_dim, tn), lambda i: (0, i)),
                   pl.BlockSpec((hidden_dim, tn), lambda i: (0, i))),
        compiler_params=pltpu.CompilerParams(dimension_semantics=("parallel",)),
    )(px.astype(jnp.bfloat16), wx, ph.astype(jnp.bfloat16), wh,
      bias.reshape(ng, 1).astype(jnp.float32), c_int)
    return h_flat, c_flat


# ----------------------------------------------------------------------------
# Deterministic parameter init (shapes dictated by the module structure).
# ----------------------------------------------------------------------------
def _conv_init(key, cout, cin, kh, kw):
    k1, k2 = jax.random.split(key)
    fan_in = cin * kh * kw
    w = jax.random.normal(k1, (cout, cin, kh, kw), jnp.float32) * (2.0 / fan_in) ** 0.5
    b = jax.random.normal(k2, (cout,), jnp.float32) * 0.01
    return w, b


def init_params(key):
    keys = jax.random.split(key, 10)
    p = {}
    # scaled-down deeplabv3plus backbone / head
    p["stem"] = _conv_init(keys[0], 8, 3, 3, 3)         # 3->8, stride 2
    p["conv2"] = _conv_init(keys[1], 16, 8, 3, 3)       # 8->16, stride 2 (low-level)
    p["conv3"] = _conv_init(keys[2], 32, 16, 3, 3)      # 16->32, stride 2 (high-level)
    p["aspp1"] = _conv_init(keys[3], 16, 32, 1, 1)      # ASPP 1x1 branch
    p["aspp_pool"] = _conv_init(keys[4], 16, 32, 1, 1)  # ASPP image-pooling branch
    p["aspp_proj"] = _conv_init(keys[5], 16, 32, 1, 1)  # ASPP projection
    p["low_proj"] = _conv_init(keys[6], 8, 16, 1, 1)    # decoder low-level projection
    p["dec"] = _conv_init(keys[7], 16, 24, 3, 3)        # decoder 3x3
    p["cls"] = _conv_init(keys[8], 2, 16, 1, 1)         # classifier -> num_classes=2
    # ConvLSTM cell: input_dim=2, hidden_dim=2, kernel 3x3, bias=True
    p["lstm"] = _conv_init(keys[9], 8, 4, 3, 3)
    return p


# ----------------------------------------------------------------------------
# Forward pass of Deeplabv3Plus_lstmV1 (functional: hidden state is returned).
# ----------------------------------------------------------------------------
def deeplabv3plus_lstm_forward(params, x, hidden=None):
    b, _, h_in, w_in = x.shape

    # internal layout: (C, B, H, W) with spatial flattened onto the lane axis
    x_int = x.astype(jnp.bfloat16).transpose(1, 0, 2, 3)                  # (3,B,H,W)

    # ---- self.base(x): scaled-down deeplabv3plus ----
    f1 = conv3x3(x_int, *params["stem"], stride=2, pad=1)                 # (8,B,H/2,W/2)
    low = conv3x3(f1, *params["conv2"], stride=2, pad=1)                  # (16,B,H/4,W/4)
    high = conv3x3(low, *params["conv3"], stride=2, pad=1)                # (32,B,H/8,W/8)

    h8, w8 = high.shape[2], high.shape[3]
    h4, w4 = low.shape[2], low.shape[3]
    m_high, m_low = b * h8 * w8, b * h4 * w4

    # trace-time constants: per-batch average-pool / broadcast operators and
    # the bilinear-resize operator (I_B (x) Rh (x) Rw)^T
    pool_mat = jnp.asarray(np.kron(np.eye(b, dtype=np.float32),
                                   np.ones((h8 * w8, 1), np.float32) / (h8 * w8)))
    bcast = jnp.asarray(np.kron(np.eye(b, dtype=np.float32),
                                np.ones((1, h8 * w8), np.float32)))
    rupT = _resize_matrix_T(b, h8, w8, h4, w4)                            # (m_high, m_low)

    wa, ba = params["aspp1"]
    wp, bp = params["aspp_pool"]
    wq, bq = params["aspp_proj"]
    w_low, b_low = params["low_proj"]
    wq2d = wq.reshape(16, 32)
    # fused ASPP-lite + decoder-input stage (one launch, two lane-dense outputs)
    aspp_up, lowp = pl.pallas_call(
        _aspp_dec_kernel,
        out_shape=(jax.ShapeDtypeStruct((16, m_low), jnp.bfloat16),
                   jax.ShapeDtypeStruct((8, m_low), jnp.bfloat16)),
    )(high.reshape(32, m_high), low.reshape(16, m_low), pool_mat, bcast, rupT,
      wa.reshape(16, 32), ba.reshape(16, 1),
      wp.reshape(16, 32), bp.reshape(16, 1),
      wq2d[:, :16], wq2d[:, 16:], bq.reshape(16, 1),
      w_low.reshape(8, 16), b_low.reshape(8, 1))

    # decoder 3x3 over the (virtual) concat [aspp_up, lowp]: split-weight sum
    wdec, bdec = params["dec"]
    pa, _, _ = _im2col_cbhw(aspp_up.reshape(16, b, h4, w4), 3, 3, 1, 1)   # (144, m_low)
    pb, _, _ = _im2col_cbhw(lowp.reshape(8, b, h4, w4), 3, 3, 1, 1)       # (72,  m_low)
    dec = fused_matmul([(wdec[:, :16].reshape(16, 16 * 9), pa),
                        (wdec[:, 16:].reshape(16, 8 * 9), pb)],
                       bdec, act="relu", out_dtype=jnp.bfloat16)          # (16, m_low)

    # classifier 1x1 conv fused with F.interpolate(..., size=input_shape,
    # mode='bilinear', align_corners=False)
    wcls, bcls = params["cls"]
    rfullT = _resize_matrix_T(b, h4, w4, h_in, w_in)                      # (m_low, B*H*W)
    out = cls_and_resize(dec, wcls.reshape(2, 16), bcls, rfullT)          # (2, B*H*W)

    # ---- out.unsqueeze(1); ConvLSTM over seq_len=1, hidden None -> zeros ----
    hd = 2
    if hidden is None:
        h0_int = jnp.zeros((hd, b, h_in, w_in), jnp.bfloat16)
        c0_int = jnp.zeros((hd, b * h_in * w_in), jnp.float32)
    else:
        h0, c0 = hidden
        h0_int = h0.astype(jnp.bfloat16).transpose(1, 0, 2, 3)
        c0_int = c0.astype(jnp.float32).transpose(1, 0, 2, 3).reshape(hd, b * h_in * w_in)

    w_lstm, b_lstm = params["lstm"]
    h_flat, c_flat = convlstm_cell(out.reshape(2, b, h_in, w_in), h0_int, c0_int,
                                   w_lstm, b_lstm, hidden_dim=hd)

    h_next = h_flat.reshape(hd, b, h_in, w_in).transpose(1, 0, 2, 3)      # (B,2,H,W) f32
    c_next = c_flat.reshape(hd, b, h_in, w_in).transpose(1, 0, 2, 3)

    # self.hidden detach  ->  stop_gradient on the returned state
    new_hidden = (jax.lax.stop_gradient(h_next), jax.lax.stop_gradient(c_next))
    # out[-1].squeeze(1): last layer's output at the single timestep -> (B,2,H,W)
    return h_next, new_hidden


if __name__ == "__main__":
    key = jax.random.PRNGKey(0)
    k_param, k_in = jax.random.split(key)
    params = init_params(k_param)

    # input: small RGB batch, NCHW (what deeplabv3plus_mobilenet consumes)
    x = jax.random.normal(k_in, (2, 3, 32, 32), jnp.float32)

    fwd = jax.jit(deeplabv3plus_lstm_forward)
    out, hidden = fwd(params, x)
    out = jax.block_until_ready(out)

    assert out.shape == (2, 2, 32, 32), out.shape
    assert out.dtype == jnp.float32
    assert bool(jnp.all(jnp.isfinite(out)))
    print("KERNEL_OK")
</pallas_src>

<mosaic_0001>
module attributes {stable_mosaic.version = 11 : i64} {
  func.func @_fused_mm_kernel(%arg0: i32, %arg1: memref<8x27xbf16, #tpu.memory_space<vmem>>, %arg2: memref<27x256xbf16, #tpu.memory_space<vmem>>, %arg3: memref<8x1xf32, #tpu.memory_space<vmem>>, %arg4: memref<8x256xbf16, #tpu.memory_space<vmem>>) attributes {dimension_semantics = [#tpu.dimension_semantics<parallel>], iteration_bounds = array<i64: 2>, scalar_prefetch = 0 : i64, scratch_operands = 0 : i64, tpu.core_type = #tpu.core_type<tc>, window_params = [{pipeline_mode = #tpu.pipeline_mode<synchronous>, transform_indices = @transform_0, window_bounds = array<i64: 8, 27>}, {transform_indices = @transform_1, window_bounds = array<i64: 27, 256>}, {pipeline_mode = #tpu.pipeline_mode<synchronous>, transform_indices = @transform_2, window_bounds = array<i64: 8, 1>}, {transform_indices = @transform_3, window_bounds = array<i64: 8, 256>}]} {
    %c0 = arith.constant 0 : index
    %c0_0 = arith.constant 0 : index
    %0 = vector.load %arg1[%c0, %c0_0] : memref<8x27xbf16, #tpu.memory_space<vmem>>, vector<8x27xbf16>
    %c0_1 = arith.constant 0 : index
    %c0_2 = arith.constant 0 : index
    %1 = vector.load %arg2[%c0_1, %c0_2] : memref<27x256xbf16, #tpu.memory_space<vmem>>, vector<27x256xbf16>
    %cst = arith.constant dense<0.000000e+00> : vector<8x256xf32>
    %2 = tpu.matmul %0, %1, %cst {dimension_numbers = #tpu.dot_dimension_numbers<[1], [0], [0], [1], [0, 0, 1, 1], [], []>} : vector<8x27xbf16>, vector<27x256xbf16>, vector<8x256xf32> -> vector<8x256xf32>
    %c0_3 = arith.constant 0 : index
    %c0_4 = arith.constant 0 : index
    %3 = vector.load %arg3[%c0_3, %c0_4] : memref<8x1xf32, #tpu.memory_space<vmem>>, vector<8x1xf32>
    %4 = vector.broadcast %3 : vector<8x1xf32> to vector<8x256xf32>
    %5 = arith.addf %2, %4 : vector<8x256xf32>
    %cst_5 = arith.constant 0.000000e+00 : f32
    %6 = vector.broadcast %cst_5 : f32 to vector<8x256xf32>
    %7 = arith.maximumf %5, %6 : vector<8x256xf32>
    %8 = arith.truncf %7 : vector<8x256xf32> to vector<8x256xbf16>
    %c0_6 = arith.constant 0 : index
    %c0_7 = arith.constant 0 : index
    %9 = vector.load %arg4[%c0_6, %c0_7] : memref<8x256xbf16, #tpu.memory_space<vmem>>, vector<8x256xbf16>
    tpu.vector_store %arg4[%c0_6, %c0_7], %8 {strides = array<i32>} : memref<8x256xbf16, #tpu.memory_space<vmem>>, vector<8x256xbf16>,
    return
  }
  func.func @transform_0(%arg0: i32) -> (i32, i32) {
    %c0_i32 = arith.constant 0 : i32
    %c0_i32_0 = arith.constant 0 : i32
    %c0_i32_1 = arith.constant 0 : i32
    return %c0_i32, %c0_i32_0 : i32, i32
  }
  func.func @transform_1(%arg0: i32) -> (i32, i32) {
    %c0_i32 = arith.constant 0 : i32
    %c0_i32_0 = arith.constant 0 : i32
    return %c0_i32, %arg0 : i32, i32
  }
  func.func @transform_2(%arg0: i32) -> (i32, i32) {
    %c0_i32 = arith.constant 0 : i32
    %c0_i32_0 = arith.constant 0 : i32
    %c0_i32_1 = arith.constant 0 : i32
    return %c0_i32, %c0_i32_0 : i32, i32
  }
  func.func @transform_3(%arg0: i32) -> (i32, i32) {
    %c0_i32 = arith.constant 0 : i32
    %c0_i32_0 = arith.constant 0 : i32
    return %c0_i32, %arg0 : i32, i32
  }
}

module attributes {stable_mosaic.version = 11 : i64} {
  func.func @_fused_mm_kernel(%arg0: i32, %arg1: memref<16x72xbf16, #tpu.memory_space<vmem>>, %arg2: memref<72x128xbf16, #tpu.memory_space<vmem>>, %arg3: memref<16x1xf32, #tpu.memory_space<vmem>>, %arg4: memref<16x128xbf16, #tpu.memory_space<vmem>>) attributes {dimension_semantics = [#tpu.dimension_semantics<parallel>], iteration_bounds = array<i64: 1>, scalar_prefetch = 0 : i64, scratch_operands = 0 : i64, tpu.core_type = #tpu.core_type<tc>, window_params = [{pipeline_mode = #tpu.pipeline_mode<synchronous>, transform_indices = @transform_0, window_bounds = array<i64: 16, 72>}, {transform_indices = @transform_1, window_bounds = array<i64: 72, 128>}, {pipeline_mode = #tpu.pipeline_mode<synchronous>, transform_indices = @transform_2, window_bounds = array<i64: 16, 1>}, {transform_indices = @transform_3, window_bounds = array<i64: 16, 128>}]} {
    %c0 = arith.constant 0 : index
    %c0_0 = arith.constant 0 : index
    %0 = vector.load %arg1[%c0, %c0_0] : memref<16x72xbf16, #tpu.memory_space<vmem>>, vector<16x72xbf16>
    %c0_1 = arith.constant 0 : index
    %c0_2 = arith.constant 0 : index
    %1 = vector.load %arg2[%c0_1, %c0_2] : memref<72x128xbf16, #tpu.memory_space<vmem>>, vector<72x128xbf16>
    %cst = arith.constant dense<0.000000e+00> : vector<16x128xf32>
    %2 = tpu.matmul %0, %1, %cst {dimension_numbers = #tpu.dot_dimension_numbers<[1], [0], [0], [1], [0, 0, 1, 1], [], []>} : vector<16x72xbf16>, vector<72x128xbf16>, vector<16x128xf32> -> vector<16x128xf32>
    %c0_3 = arith.constant 0 : index
    %c0_4 = arith.constant 0 : index
    %3 = vector.load %arg3[%c0_3, %c0_4] : memref<16x1xf32, #tpu.memory_space<vmem>>, vector<16x1xf32>
    %4 = vector.broadcast %3 : vector<16x1xf32> to vector<16x128xf32>
    %5 = arith.addf %2, %4 : vector<16x128xf32>
    %cst_5 = arith.constant 0.000000e+00 : f32
    %6 = vector.broadcast %cst_5 : f32 to vector<16x128xf32>
    %7 = arith.maximumf %5, %6 : vector<16x128xf32>
    %8 = arith.truncf %7 : vector<16x128xf32> to vector<16x128xbf16>
    %c0_6 = arith.constant 0 : index
    %c0_7 = arith.constant 0 : index
    %9 = vector.load %arg4[%c0_6, %c0_7] : memref<16x128xbf16, #tpu.memory_space<vmem>>, vector<16x128xbf16>
    tpu.vector_store %arg4[%c0_6, %c0_7], %8 {strides = array<i32>} : memref<16x128xbf16, #tpu.memory_space<vmem>>, vector<16x128xbf16>,
    return
  }
  func.func @transform_0(%arg0: i32) -> (i32, i32) {
    %c0_i32 = arith.constant 0 : i32
    %c0_i32_0 = arith.constant 0 : i32
    %c0_i32_1 = arith.constant 0 : i32
    return %c0_i32, %c0_i32_0 : i32, i32
  }
  func.func @transform_1(%arg0: i32) -> (i32, i32) {
    %c0_i32 = arith.constant 0 : i32
    %c0_i32_0 = arith.constant 0 : i32
    return %c0_i32, %arg0 : i32, i32
  }
  func.func @transform_2(%arg0: i32) -> (i32, i32) {
    %c0_i32 = arith.constant 0 : i32
    %c0_i32_0 = arith.constant 0 : i32
    %c0_i32_1 = arith.constant 0 : i32
    return %c0_i32, %c0_i32_0 : i32, i32
  }
  func.func @transform_3(%arg0: i32) -> (i32, i32) {
    %c0_i32 = arith.constant 0 : i32
    %c0_i32_0 = arith.constant 0 : i32
    return %c0_i32, %arg0 : i32, i32
  }
}

module attributes {stable_mosaic.version = 11 : i64} {
  func.func @_fused_mm_kernel(%arg0: i32, %arg1: memref<32x144xbf16, #tpu.memory_space<vmem>>, %arg2: memref<144x32xbf16, #tpu.memory_space<vmem>>, %arg3: memref<32x1xf32, #tpu.memory_space<vmem>>, %arg4: memref<32x32xbf16, #tpu.memory_space<vmem>>) attributes {dimension_semantics = [#tpu.dimension_semantics<parallel>], iteration_bounds = array<i64: 1>, scalar_prefetch = 0 : i64, scratch_operands = 0 : i64, tpu.core_type = #tpu.core_type<tc>, window_params = [{pipeline_mode = #tpu.pipeline_mode<synchronous>, transform_indices = @transform_0, window_bounds = array<i64: 32, 144>}, {transform_indices = @transform_1, window_bounds = array<i64: 144, 32>}, {pipeline_mode = #tpu.pipeline_mode<synchronous>, transform_indices = @transform_2, window_bounds = array<i64: 32, 1>}, {transform_indices = @transform_3, window_bounds = array<i64: 32, 32>}]} {
    %c0 = arith.constant 0 : index
    %c0_0 = arith.constant 0 : index
    %0 = vector.load %arg1[%c0, %c0_0] : memref<32x144xbf16, #tpu.memory_space<vmem>>, vector<32x144xbf16>
    %c0_1 = arith.constant 0 : index
    %c0_2 = arith.constant 0 : index
    %1 = vector.load %arg2[%c0_1, %c0_2] : memref<144x32xbf16, #tpu.memory_space<vmem>>, vector<144x32xbf16>
    %cst = arith.constant dense<0.000000e+00> : vector<32x32xf32>
    %2 = tpu.matmul %0, %1, %cst {dimension_numbers = #tpu.dot_dimension_numbers<[1], [0], [0], [1], [0, 0, 1, 1], [], []>} : vector<32x144xbf16>, vector<144x32xbf16>, vector<32x32xf32> -> vector<32x32xf32>
    %c0_3 = arith.constant 0 : index
    %c0_4 = arith.constant 0 : index
    %3 = vector.load %arg3[%c0_3, %c0_4] : memref<32x1xf32, #tpu.memory_space<vmem>>, vector<32x1xf32>
    %4 = vector.broadcast %3 : vector<32x1xf32> to vector<32x32xf32>
    %5 = arith.addf %2, %4 : vector<32x32xf32>
    %cst_5 = arith.constant 0.000000e+00 : f32
    %6 = vector.broadcast %cst_5 : f32 to vector<32x32xf32>
    %7 = arith.maximumf %5, %6 : vector<32x32xf32>
    %8 = arith.truncf %7 : vector<32x32xf32> to vector<32x32xbf16>
    %c0_6 = arith.constant 0 : index
    %c0_7 = arith.constant 0 : index
    %9 = vector.load %arg4[%c0_6, %c0_7] : memref<32x32xbf16, #tpu.memory_space<vmem>>, vector<32x32xbf16>
    tpu.vector_store %arg4[%c0_6, %c0_7], %8 {strides = array<i32>} : memref<32x32xbf16, #tpu.memory_space<vmem>>, vector<32x32xbf16>,
    return
  }
  func.func @transform_0(%arg0: i32) -> (i32, i32) {
    %c0_i32 = arith.constant 0 : i32
    %c0_i32_0 = arith.constant 0 : i32
    %c0_i32_1 = arith.constant 0 : i32
    return %c0_i32, %c0_i32_0 : i32, i32
  }
  func.func @transform_1(%arg0: i32) -> (i32, i32) {
    %c0_i32 = arith.constant 0 : i32
    %c0_i32_0 = arith.constant 0 : i32
    return %c0_i32, %arg0 : i32, i32
  }
  func.func @transform_2(%arg0: i32) -> (i32, i32) {
    %c0_i32 = arith.constant 0 : i32
    %c0_i32_0 = arith.constant 0 : i32
    %c0_i32_1 = arith.constant 0 : i32
    return %c0_i32, %c0_i32_0 : i32, i32
  }
  func.func @transform_3(%arg0: i32) -> (i32, i32) {
    %c0_i32 = arith.constant 0 : i32
    %c0_i32_0 = arith.constant 0 : i32
    return %c0_i32, %arg0 : i32, i32
  }
}

module attributes {stable_mosaic.version = 11 : i64} {
  func.func @_aspp_dec_kernel(%arg0: memref<32x32xbf16, #tpu.memory_space<vmem>>, %arg1: memref<16x128xbf16, #tpu.memory_space<vmem>>, %arg2: memref<32x2xf32, #tpu.memory_space<vmem>>, %arg3: memref<2x32xf32, #tpu.memory_space<vmem>>, %arg4: memref<32x128xf32, #tpu.memory_space<vmem>>, %arg5: memref<16x32xf32, #tpu.memory_space<vmem>>, %arg6: memref<16x1xf32, #tpu.memory_space<vmem>>, %arg7: memref<16x32xf32, #tpu.memory_space<vmem>>, %arg8: memref<16x1xf32, #tpu.memory_space<vmem>>, %arg9: memref<16x16xf32, #tpu.memory_space<vmem>>, %arg10: memref<16x16xf32, #tpu.memory_space<vmem>>, %arg11: memref<16x1xf32, #tpu.memory_space<vmem>>, %arg12: memref<8x16xf32, #tpu.memory_space<vmem>>, %arg13: memref<8x1xf32, #tpu.memory_space<vmem>>, %arg14: memref<16x128xbf16, #tpu.memory_space<vmem>>, %arg15: memref<8x128xbf16, #tpu.memory_space<vmem>>) attributes {dimension_semantics = [], scalar_prefetch = 0 : i64, scratch_operands = 0 : i64, tpu.core_type = #tpu.core_type<tc>} {
    %c0 = arith.constant 0 : index
    %c0_0 = arith.constant 0 : index
    %0 = vector.load %arg0[%c0, %c0_0] : memref<32x32xbf16, #tpu.memory_space<vmem>>, vector<32x32xbf16>
    %1 = arith.extf %0 : vector<32x32xbf16> to vector<32x32xf32>
    %c0_1 = arith.constant 0 : index
    %c0_2 = arith.constant 0 : index
    %2 = vector.load %arg1[%c0_1, %c0_2] : memref<16x128xbf16, #tpu.memory_space<vmem>>, vector<16x128xbf16>
    %3 = arith.extf %2 : vector<16x128xbf16> to vector<16x128xf32>
    %c0_3 = arith.constant 0 : index
    %c0_4 = arith.constant 0 : index
    %4 = vector.load %arg5[%c0_3, %c0_4] : memref<16x32xf32, #tpu.memory_space<vmem>>, vector<16x32xf32>
    %cst = arith.constant dense<0.000000e+00> : vector<16x32xf32>
    %5 = tpu.matmul %4, %1, %cst {dimension_numbers = #tpu.dot_dimension_numbers<[1], [0], [0], [1], [0, 0, 1, 1], [], []>} : vector<16x32xf32>, vector<32x32xf32>, vector<16x32xf32> -> vector<16x32xf32>
    %c0_5 = arith.constant 0 : index
    %c0_6 = arith.constant 0 : index
    %6 = vector.load %arg6[%c0_5, %c0_6] : memref<16x1xf32, #tpu.memory_space<vmem>>, vector<16x1xf32>
    %7 = vector.broadcast %6 : vector<16x1xf32> to vector<16x32xf32>
    %8 = arith.addf %5, %7 : vector<16x32xf32>
    %cst_7 = arith.constant 0.000000e+00 : f32
    %9 = vector.broadcast %cst_7 : f32 to vector<16x32xf32>
    %10 = arith.maximumf %8, %9 : vector<16x32xf32>
    %c0_8 = arith.constant 0 : index
    %c0_9 = arith.constant 0 : index
    %11 = vector.load %arg2[%c0_8, %c0_9] : memref<32x2xf32, #tpu.memory_space<vmem>>, vector<32x2xf32>
    %cst_10 = arith.constant dense<0.000000e+00> : vector<32x2xf32>
    %12 = tpu.matmul %1, %11, %cst_10 {dimension_numbers = #tpu.dot_dimension_numbers<[1], [0], [0], [1], [0, 0, 1, 1], [], []>} : vector<32x32xf32>, vector<32x2xf32>, vector<32x2xf32> -> vector<32x2xf32>
    %c0_11 = arith.constant 0 : index
    %c0_12 = arith.constant 0 : index
    %13 = vector.load %arg7[%c0_11, %c0_12] : memref<16x32xf32, #tpu.memory_space<vmem>>, vector<16x32xf32>
    %cst_13 = arith.constant dense<0.000000e+00> : vector<16x2xf32>
    %14 = tpu.matmul %13, %12, %cst_13 {dimension_numbers = #tpu.dot_dimension_numbers<[1], [0], [0], [1], [0, 0, 1, 1], [], []>} : vector<16x32xf32>, vector<32x2xf32>, vector<16x2xf32> -> vector<16x2xf32>
    %c0_14 = arith.constant 0 : index
    %c0_15 = arith.constant 0 : index
    %15 = vector.load %arg8[%c0_14, %c0_15] : memref<16x1xf32, #tpu.memory_space<vmem>>, vector<16x1xf32>
    %16 = vector.broadcast %15 : vector<16x1xf32> to vector<16x2xf32>
    %17 = arith.addf %14, %16 : vector<16x2xf32>
    %cst_16 = arith.constant 0.000000e+00 : f32
    %18 = vector.broadcast %cst_16 : f32 to vector<16x2xf32>
    %19 = arith.maximumf %17, %18 : vector<16x2xf32>
    %c0_17 = arith.constant 0 : index
    %c0_18 = arith.constant 0 : index
    %20 = vector.load %arg10[%c0_17, %c0_18] : memref<16x16xf32, #tpu.memory_space<vmem>>, vector<16x16xf32>
    %cst_19 = arith.constant dense<0.000000e+00> : vector<16x2xf32>
    %21 = tpu.matmul %20, %19, %cst_19 {dimension_numbers = #tpu.dot_dimension_numbers<[1], [0], [0], [1], [0, 0, 1, 1], [], []>} : vector<16x16xf32>, vector<16x2xf32>, vector<16x2xf32> -> vector<16x2xf32>
    %c0_20 = arith.constant 0 : index
    %c0_21 = arith.constant 0 : index
    %22 = vector.load %arg9[%c0_20, %c0_21] : memref<16x16xf32, #tpu.memory_space<vmem>>, vector<16x16xf32>
    %cst_22 = arith.constant dense<0.000000e+00> : vector<16x32xf32>
    %23 = tpu.matmul %22, %10, %cst_22 {dimension_numbers = #tpu.dot_dimension_numbers<[1], [0], [0], [1], [0, 0, 1, 1], [], []>} : vector<16x16xf32>, vector<16x32xf32>, vector<16x32xf32> -> vector<16x32xf32>
    %c0_23 = arith.constant 0 : index
    %c0_24 = arith.constant 0 : index
    %24 = vector.load %arg3[%c0_23, %c0_24] : memref<2x32xf32, #tpu.memory_space<vmem>>, vector<2x32xf32>
    %cst_25 = arith.constant dense<0.000000e+00> : vector<16x32xf32>
    %25 = tpu.matmul %21, %24, %cst_25 {dimension_numbers = #tpu.dot_dimension_numbers<[1], [0], [0], [1], [0, 0, 1, 1], [], []>} : vector<16x2xf32>, vector<2x32xf32>, vector<16x32xf32> -> vector<16x32xf32>
    %26 = arith.addf %23, %25 : vector<16x32xf32>
    %c0_26 = arith.constant 0 : index
    %c0_27 = arith.constant 0 : index
    %27 = vector.load %arg11[%c0_26, %c0_27] : memref<16x1xf32, #tpu.memory_space<vmem>>, vector<16x1xf32>
    %28 = vector.broadcast %27 : vector<16x1xf32> to vector<16x32xf32>
    %29 = arith.addf %26, %28 : vector<16x32xf32>
    %cst_28 = arith.constant 0.000000e+00 : f32
    %30 = vector.broadcast %cst_28 : f32 to vector<16x32xf32>
    %31 = arith.maximumf %29, %30 : vector<16x32xf32>
    %c0_29 = arith.constant 0 : index
    %c0_30 = arith.constant 0 : index
    %32 = vector.load %arg4[%c0_29, %c0_30] : memref<32x128xf32, #tpu.memory_space<vmem>>, vector<32x128xf32>
    %cst_31 = arith.constant dense<0.000000e+00> : vector<16x128xf32>
    %33 = tpu.matmul %31, %32, %cst_31 {dimension_numbers = #tpu.dot_dimension_numbers<[1], [0], [0], [1], [0, 0, 1, 1], [], []>} : vector<16x32xf32>, vector<32x128xf32>, vector<16x128xf32> -> vector<16x128xf32>
    %34 = arith.truncf %33 : vector<16x128xf32> to vector<16x128xbf16>
    %c0_32 = arith.constant 0 : index
    %c0_33 = arith.constant 0 : index
    %35 = vector.load %arg14[%c0_32, %c0_33] : memref<16x128xbf16, #tpu.memory_space<vmem>>, vector<16x128xbf16>
    tpu.vector_store %arg14[%c0_32, %c0_33], %34 {strides = array<i32>} : memref<16x128xbf16, #tpu.memory_space<vmem>>, vector<16x128xbf16>,
    %c0_34 = arith.constant 0 : index
    %c0_35 = arith.constant 0 : index
    %36 = vector.load %arg12[%c0_34, %c0_35] : memref<8x16xf32, #tpu.memory_space<vmem>>, vector<8x16xf32>
    %cst_36 = arith.constant dense<0.000000e+00> : vector<8x128xf32>
    %37 = tpu.matmul %36, %3, %cst_36 {dimension_numbers = #tpu.dot_dimension_numbers<[1], [0], [0], [1], [0, 0, 1, 1], [], []>} : vector<8x16xf32>, vector<16x128xf32>, vector<8x128xf32> -> vector<8x128xf32>
    %c0_37 = arith.constant 0 : index
    %c0_38 = arith.constant 0 : index
    %38 = vector.load %arg13[%c0_37, %c0_38] : memref<8x1xf32, #tpu.memory_space<vmem>>, vector<8x1xf32>
    %39 = vector.broadcast %38 : vector<8x1xf32> to vector<8x128xf32>
    %40 = arith.addf %37, %39 : vector<8x128xf32>
    %cst_39 = arith.constant 0.000000e+00 : f32
    %41 = vector.broadcast %cst_39 : f32 to vector<8x128xf32>
    %42 = arith.maximumf %40, %41 : vector<8x128xf32>
    %43 = arith.truncf %42 : vector<8x128xf32> to vector<8x128xbf16>
    %c0_40 = arith.constant 0 : index
    %c0_41 = arith.constant 0 : index
    %44 = vector.load %arg15[%c0_40, %c0_41] : memref<8x128xbf16, #tpu.memory_space<vmem>>, vector<8x128xbf16>
    tpu.vector_store %arg15[%c0_40, %c0_41], %43 {strides = array<i32>} : memref<8x128xbf16, #tpu.memory_space<vmem>>, vector<8x128xbf16>,
    return
  }
}

module attributes {stable_mosaic.version = 11 : i64} {
  func.func @_fused_mm_kernel(%arg0: i32, %arg1: memref<16x144xbf16, #tpu.memory_space<vmem>>, %arg2: memref<144x128xbf16, #tpu.memory_space<vmem>>, %arg3: memref<16x72xbf16, #tpu.memory_space<vmem>>, %arg4: memref<72x128xbf16, #tpu.memory_space<vmem>>, %arg5: memref<16x1xf32, #tpu.memory_space<vmem>>, %arg6: memref<16x128xbf16, #tpu.memory_space<vmem>>) attributes {dimension_semantics = [#tpu.dimension_semantics<parallel>], iteration_bounds = array<i64: 1>, scalar_prefetch = 0 : i64, scratch_operands = 0 : i64, tpu.core_type = #tpu.core_type<tc>, window_params = [{pipeline_mode = #tpu.pipeline_mode<synchronous>, transform_indices = @transform_0, window_bounds = array<i64: 16, 144>}, {transform_indices = @transform_1, window_bounds = array<i64: 144, 128>}, {pipeline_mode = #tpu.pipeline_mode<synchronous>, transform_indices = @transform_2, window_bounds = array<i64: 16, 72>}, {transform_indices = @transform_3, window_bounds = array<i64: 72, 128>}, {pipeline_mode = #tpu.pipeline_mode<synchronous>, transform_indices = @transform_4, window_bounds = array<i64: 16, 1>}, {transform_indices = @transform_5, window_bounds = array<i64: 16, 128>}]} {
    %c0 = arith.constant 0 : index
    %c0_0 = arith.constant 0 : index
    %0 = vector.load %arg1[%c0, %c0_0] : memref<16x144xbf16, #tpu.memory_space<vmem>>, vector<16x144xbf16>
    %c0_1 = arith.constant 0 : index
    %c0_2 = arith.constant 0 : index
    %1 = vector.load %arg2[%c0_1, %c0_2] : memref<144x128xbf16, #tpu.memory_space<vmem>>, vector<144x128xbf16>
    %cst = arith.constant dense<0.000000e+00> : vector<16x128xf32>
    %2 = tpu.matmul %0, %1, %cst {dimension_numbers = #tpu.dot_dimension_numbers<[1], [0], [0], [1], [0, 0, 1, 1], [], []>} : vector<16x144xbf16>, vector<144x128xbf16>, vector<16x128xf32> -> vector<16x128xf32>
    %c0_3 = arith.constant 0 : index
    %c0_4 = arith.constant 0 : index
    %3 = vector.load %arg3[%c0_3, %c0_4] : memref<16x72xbf16, #tpu.memory_space<vmem>>, vector<16x72xbf16>
    %c0_5 = arith.constant 0 : index
    %c0_6 = arith.constant 0 : index
    %4 = vector.load %arg4[%c0_5, %c0_6] : memref<72x128xbf16, #tpu.memory_space<vmem>>, vector<72x128xbf16>
    %cst_7 = arith.constant dense<0.000000e+00> : vector<16x128xf32>
    %5 = tpu.matmul %3, %4, %cst_7 {dimension_numbers = #tpu.dot_dimension_numbers<[1], [0], [0], [1], [0, 0, 1, 1], [], []>} : vector<16x72xbf16>, vector<72x128xbf16>, vector<16x128xf32> -> vector<16x128xf32>
    %6 = arith.addf %2, %5 : vector<16x128xf32>
    %c0_8 = arith.constant 0 : index
    %c0_9 = arith.constant 0 : index
    %7 = vector.load %arg5[%c0_8, %c0_9] : memref<16x1xf32, #tpu.memory_space<vmem>>, vector<16x1xf32>
    %8 = vector.broadcast %7 : vector<16x1xf32> to vector<16x128xf32>
    %9 = arith.addf %6, %8 : vector<16x128xf32>
    %cst_10 = arith.constant 0.000000e+00 : f32
    %10 = vector.broadcast %cst_10 : f32 to vector<16x128xf32>
    %11 = arith.maximumf %9, %10 : vector<16x128xf32>
    %12 = arith.truncf %11 : vector<16x128xf32> to vector<16x128xbf16>
    %c0_11 = arith.constant 0 : index
    %c0_12 = arith.constant 0 : index
    %13 = vector.load %arg6[%c0_11, %c0_12] : memref<16x128xbf16, #tpu.memory_space<vmem>>, vector<16x128xbf16>
    tpu.vector_store %arg6[%c0_11, %c0_12], %12 {strides = array<i32>} : memref<16x128xbf16, #tpu.memory_space<vmem>>, vector<16x128xbf16>,
    return
  }
  func.func @transform_0(%arg0: i32) -> (i32, i32) {
    %c0_i32 = arith.constant 0 : i32
    %c0_i32_0 = arith.constant 0 : i32
    %c0_i32_1 = arith.constant 0 : i32
    return %c0_i32, %c0_i32_0 : i32, i32
  }
  func.func @transform_1(%arg0: i32) -> (i32, i32) {
    %c0_i32 = arith.constant 0 : i32
    %c0_i32_0 = arith.constant 0 : i32
    return %c0_i32, %arg0 : i32, i32
  }
  func.func @transform_2(%arg0: i32) -> (i32, i32) {
    %c0_i32 = arith.constant 0 : i32
    %c0_i32_0 = arith.constant 0 : i32
    %c0_i32_1 = arith.constant 0 : i32
    return %c0_i32, %c0_i32_0 : i32, i32
  }
  func.func @transform_3(%arg0: i32) -> (i32, i32) {
    %c0_i32 = arith.constant 0 : i32
    %c0_i32_0 = arith.constant 0 : i32
    return %c0_i32, %arg0 : i32, i32
  }
  func.func @transform_4(%arg0: i32) -> (i32, i32) {
    %c0_i32 = arith.constant 0 : i32
    %c0_i32_0 = arith.constant 0 : i32
    %c0_i32_1 = arith.constant 0 : i32
    return %c0_i32, %c0_i32_0 : i32, i32
  }
  func.func @transform_5(%arg0: i32) -> (i32, i32) {
    %c0_i32 = arith.constant 0 : i32
    %c0_i32_0 = arith.constant 0 : i32
    return %c0_i32, %arg0 : i32, i32
  }
}

module attributes {stable_mosaic.version = 11 : i64} {
  func.func @_cls_resize_kernel(%arg0: i32, %arg1: memref<2x16xbf16, #tpu.memory_space<vmem>>, %arg2: memref<16x128xbf16, #tpu.memory_space<vmem>>, %arg3: memref<128x1024xbf16, #tpu.memory_space<vmem>>, %arg4: memref<2x1xf32, #tpu.memory_space<vmem>>, %arg5: memref<2x1024xbf16, #tpu.memory_space<vmem>>) attributes {dimension_semantics = [#tpu.dimension_semantics<parallel>], iteration_bounds = array<i64: 2>, scalar_prefetch = 0 : i64, scratch_operands = 0 : i64, tpu.core_type = #tpu.core_type<tc>, window_params = [{pipeline_mode = #tpu.pipeline_mode<synchronous>, transform_indices = @transform_0, window_bounds = array<i64: 2, 16>}, {pipeline_mode = #tpu.pipeline_mode<synchronous>, transform_indices = @transform_1, window_bounds = array<i64: 16, 128>}, {transform_indices = @transform_2, window_bounds = array<i64: 128, 1024>}, {pipeline_mode = #tpu.pipeline_mode<synchronous>, transform_indices = @transform_3, window_bounds = array<i64: 2, 1>}, {transform_indices = @transform_4, window_bounds = array<i64: 2, 1024>}]} {
    %c0 = arith.constant 0 : index
    %c0_0 = arith.constant 0 : index
    %0 = vector.load %arg1[%c0, %c0_0] : memref<2x16xbf16, #tpu.memory_space<vmem>>, vector<2x16xbf16>
    %c0_1 = arith.constant 0 : index
    %c0_2 = arith.constant 0 : index
    %1 = vector.load %arg2[%c0_1, %c0_2] : memref<16x128xbf16, #tpu.memory_space<vmem>>, vector<16x128xbf16>
    %cst = arith.constant dense<0.000000e+00> : vector<2x128xf32>
    %2 = tpu.matmul %0, %1, %cst {dimension_numbers = #tpu.dot_dimension_numbers<[1], [0], [0], [1], [0, 0, 1, 1], [], []>} : vector<2x16xbf16>, vector<16x128xbf16>, vector<2x128xf32> -> vector<2x128xf32>
    %3 = arith.truncf %2 : vector<2x128xf32> to vector<2x128xbf16>
    %c0_3 = arith.constant 0 : index
    %c0_4 = arith.constant 0 : index
    %4 = vector.load %arg3[%c0_3, %c0_4] : memref<128x1024xbf16, #tpu.memory_space<vmem>>, vector<128x1024xbf16>
    %cst_5 = arith.constant dense<0.000000e+00> : vector<2x1024xf32>
    %5 = tpu.matmul %3, %4, %cst_5 {dimension_numbers = #tpu.dot_dimension_numbers<[1], [0], [0], [1], [0, 0, 1, 1], [], []>} : vector<2x128xbf16>, vector<128x1024xbf16>, vector<2x1024xf32> -> vector<2x1024xf32>
    %c0_6 = arith.constant 0 : index
    %c0_7 = arith.constant 0 : index
    %6 = vector.load %arg4[%c0_6, %c0_7] : memref<2x1xf32, #tpu.memory_space<vmem>>, vector<2x1xf32>
    %7 = vector.broadcast %6 : vector<2x1xf32> to vector<2x1024xf32>
    %8 = arith.addf %5, %7 : vector<2x1024xf32>
    %9 = arith.truncf %8 : vector<2x1024xf32> to vector<2x1024xbf16>
    %c0_8 = arith.constant 0 : index
    %c0_9 = arith.constant 0 : index
    %10 = vector.load %arg5[%c0_8, %c0_9] : memref<2x1024xbf16, #tpu.memory_space<vmem>>, vector<2x1024xbf16>
    tpu.vector_store %arg5[%c0_8, %c0_9], %9 {strides = array<i32>} : memref<2x1024xbf16, #tpu.memory_space<vmem>>, vector<2x1024xbf16>,
    return
  }
  func.func @transform_0(%arg0: i32) -> (i32, i32) {
    %c0_i32 = arith.constant 0 : i32
    %c0_i32_0 = arith.constant 0 : i32
    %c0_i32_1 = arith.constant 0 : i32
    return %c0_i32, %c0_i32_0 : i32, i32
  }
  func.func @transform_1(%arg0: i32) -> (i32, i32) {
    %c0_i32 = arith.constant 0 : i32
    %c0_i32_0 = arith.constant 0 : i32
    %c0_i32_1 = arith.constant 0 : i32
    return %c0_i32, %c0_i32_0 : i32, i32
  }
  func.func @transform_2(%arg0: i32) -> (i32, i32) {
    %c0_i32 = arith.constant 0 : i32
    %c0_i32_0 = arith.constant 0 : i32
    return %c0_i32, %arg0 : i32, i32
  }
  func.func @transform_3(%arg0: i32) -> (i32, i32) {
    %c0_i32 = arith.constant 0 : i32
    %c0_i32_0 = arith.constant 0 : i32
    %c0_i32_1 = arith.constant 0 : i32
    return %c0_i32, %c0_i32_0 : i32, i32
  }
  func.func @transform_4(%arg0: i32) -> (i32, i32) {
    %c0_i32 = arith.constant 0 : i32
    %c0_i32_0 = arith.constant 0 : i32
    return %c0_i32, %arg0 : i32, i32
  }
}

module attributes {stable_mosaic.version = 11 : i64} {
  func.func @_convlstm_kernel(%arg0: i32, %arg1: memref<18x1024xbf16, #tpu.memory_space<vmem>>, %arg2: memref<8x18xbf16, #tpu.memory_space<vmem>>, %arg3: memref<18x1024xbf16, #tpu.memory_space<vmem>>, %arg4: memref<8x18xbf16, #tpu.memory_space<vmem>>, %arg5: memref<8x1xf32, #tpu.memory_space<vmem>>, %arg6: memref<2x1024xf32, #tpu.memory_space<vmem>>, %arg7: memref<2x1024xf32, #tpu.memory_space<vmem>>, %arg8: memref<2x1024xf32, #tpu.memory_space<vmem>>) attributes {dimension_semantics = [#tpu.dimension_semantics<parallel>], iteration_bounds = array<i64: 2>, scalar_prefetch = 0 : i64, scratch_operands = 0 : i64, tpu.core_type = #tpu.core_type<tc>, window_params = [{transform_indices = @transform_0, window_bounds = array<i64: 18, 1024>}, {pipeline_mode = #tpu.pipeline_mode<synchronous>, transform_indices = @transform_1, window_bounds = array<i64: 8, 18>}, {transform_indices = @transform_2, window_bounds = array<i64: 18, 1024>}, {pipeline_mode = #tpu.pipeline_mode<synchronous>, transform_indices = @transform_3, window_bounds = array<i64: 8, 18>}, {pipeline_mode = #tpu.pipeline_mode<synchronous>, transform_indices = @transform_4, window_bounds = array<i64: 8, 1>}, {transform_indices = @transform_5, window_bounds = array<i64: 2, 1024>}, {transform_indices = @transform_6, window_bounds = array<i64: 2, 1024>}, {transform_indices = @transform_7, window_bounds = array<i64: 2, 1024>}]} {
    %c0 = arith.constant 0 : index
    %c0_0 = arith.constant 0 : index
    %0 = vector.load %arg2[%c0, %c0_0] : memref<8x18xbf16, #tpu.memory_space<vmem>>, vector<8x18xbf16>
    %c0_1 = arith.constant 0 : index
    %c0_2 = arith.constant 0 : index
    %1 = vector.load %arg1[%c0_1, %c0_2] : memref<18x1024xbf16, #tpu.memory_space<vmem>>, vector<18x1024xbf16>
    %cst = arith.constant dense<0.000000e+00> : vector<8x1024xf32>
    %2 = tpu.matmul %0, %1, %cst {dimension_numbers = #tpu.dot_dimension_numbers<[1], [0], [0], [1], [0, 0, 1, 1], [], []>} : vector<8x18xbf16>, vector<18x1024xbf16>, vector<8x1024xf32> -> vector<8x1024xf32>
    %c0_3 = arith.constant 0 : index
    %c0_4 = arith.constant 0 : index
    %3 = vector.load %arg4[%c0_3, %c0_4] : memref<8x18xbf16, #tpu.memory_space<vmem>>, vector<8x18xbf16>
    %c0_5 = arith.constant 0 : index
    %c0_6 = arith.constant 0 : index
    %4 = vector.load %arg3[%c0_5, %c0_6] : memref<18x1024xbf16, #tpu.memory_space<vmem>>, vector<18x1024xbf16>
    %cst_7 = arith.constant dense<0.000000e+00> : vector<8x1024xf32>
    %5 = tpu.matmul %3, %4, %cst_7 {dimension_numbers = #tpu.dot_dimension_numbers<[1], [0], [0], [1], [0, 0, 1, 1], [], []>} : vector<8x18xbf16>, vector<18x1024xbf16>, vector<8x1024xf32> -> vector<8x1024xf32>
    %6 = arith.addf %2, %5 : vector<8x1024xf32>
    %c0_8 = arith.constant 0 : index
    %c0_9 = arith.constant 0 : index
    %7 = vector.load %arg5[%c0_8, %c0_9] : memref<8x1xf32, #tpu.memory_space<vmem>>, vector<8x1xf32>
    %8 = vector.broadcast %7 : vector<8x1xf32> to vector<8x1024xf32>
    %9 = arith.addf %6, %8 : vector<8x1024xf32>
    %10 = vector.extract_strided_slice %9 {offsets = [0, 0], sizes = [2, 1024], strides = [1, 1]} : vector<8x1024xf32> to vector<2x1024xf32>
    %11 = arith.negf %10 : vector<2x1024xf32>
    %12 = math.exp %11 : vector<2x1024xf32>
    %cst_10 = arith.constant 1.000000e+00 : f32
    %13 = vector.broadcast %cst_10 : f32 to vector<2x1024xf32>
    %14 = arith.addf %13, %12 : vector<2x1024xf32>
    %15 = arith.divf %13, %14 : vector<2x1024xf32>
    %16 = vector.extract_strided_slice %9 {offsets = [2, 0], sizes = [2, 1024], strides = [1, 1]} : vector<8x1024xf32> to vector<2x1024xf32>
    %17 = arith.negf %16 : vector<2x1024xf32>
    %18 = math.exp %17 : vector<2x1024xf32>
    %cst_11 = arith.constant 1.000000e+00 : f32
    %19 = vector.broadcast %cst_11 : f32 to vector<2x1024xf32>
    %20 = arith.addf %19, %18 : vector<2x1024xf32>
    %21 = arith.divf %19, %20 : vector<2x1024xf32>
    %22 = vector.extract_strided_slice %9 {offsets = [4, 0], sizes = [2, 1024], strides = [1, 1]} : vector<8x1024xf32> to vector<2x1024xf32>
    %23 = arith.negf %22 : vector<2x1024xf32>
    %24 = math.exp %23 : vector<2x1024xf32>
    %cst_12 = arith.constant 1.000000e+00 : f32
    %25 = vector.broadcast %cst_12 : f32 to vector<2x1024xf32>
    %26 = arith.addf %25, %24 : vector<2x1024xf32>
    %27 = arith.divf %25, %26 : vector<2x1024xf32>
    %28 = vector.extract_strided_slice %9 {offsets = [6, 0], sizes = [2, 1024], strides = [1, 1]} : vector<8x1024xf32> to vector<2x1024xf32>
    %29 = math.tanh %28 : vector<2x1024xf32>
    %c0_13 = arith.constant 0 : index
    %c0_14 = arith.constant 0 : index
    %30 = vector.load %arg6[%c0_13, %c0_14] : memref<2x1024xf32, #tpu.memory_space<vmem>>, vector<2x1024xf32>
    %31 = arith.mulf %21, %30 : vector<2x1024xf32>
    %32 = arith.mulf %15, %29 : vector<2x1024xf32>
    %33 = arith.addf %31, %32 : vector<2x1024xf32>
    %34 = math.tanh %33 : vector<2x1024xf32>
    %35 = arith.mulf %27, %34 : vector<2x1024xf32>
    %c0_15 = arith.constant 0 : index
    %c0_16 = arith.constant 0 : index
    %36 = vector.load %arg7[%c0_15, %c0_16] : memref<2x1024xf32, #tpu.memory_space<vmem>>, vector<2x1024xf32>
    tpu.vector_store %arg7[%c0_15, %c0_16], %35 {strides = array<i32>} : memref<2x1024xf32, #tpu.memory_space<vmem>>, vector<2x1024xf32>,
    %c0_17 = arith.constant 0 : index
    %c0_18 = arith.constant 0 : index
    %37 = vector.load %arg8[%c0_17, %c0_18] : memref<2x1024xf32, #tpu.memory_space<vmem>>, vector<2x1024xf32>
    tpu.vector_store %arg8[%c0_17, %c0_18], %33 {strides = array<i32>} : memref<2x1024xf32, #tpu.memory_space<vmem>>, vector<2x1024xf32>,
    return
  }
  func.func @transform_0(%arg0: i32) -> (i32, i32) {
    %c0_i32 = arith.constant 0 : i32
    %c0_i32_0 = arith.constant 0 : i32
    return %c0_i32, %arg0 : i32, i32
  }
  func.func @transform_1(%arg0: i32) -> (i32, i32) {
    %c0_i32 = arith.constant 0 : i32
    %c0_i32_0 = arith.constant 0 : i32
    %c0_i32_1 = arith.constant 0 : i32
    return %c0_i32, %c0_i32_0 : i32, i32
  }
  func.func @transform_2(%arg0: i32) -> (i32, i32) {
    %c0_i32 = arith.constant 0 : i32
    %c0_i32_0 = arith.constant 0 : i32
    return %c0_i32, %arg0 : i32, i32
  }
  func.func @transform_3(%arg0: i32) -> (i32, i32) {
    %c0_i32 = arith.constant 0 : i32
    %c0_i32_0 = arith.constant 0 : i32
    %c0_i32_1 = arith.constant 0 : i32
    return %c0_i32, %c0_i32_0 : i32, i32
  }
  func.func @transform_4(%arg0: i32) -> (i32, i32) {
    %c0_i32 = arith.constant 0 : i32
    %c0_i32_0 = arith.constant 0 : i32
    %c0_i32_1 = arith.constant 0 : i32
    return %c0_i32, %c0_i32_0 : i32, i32
  }
  func.func @transform_5(%arg0: i32) -> (i32, i32) {
    %c0_i32 = arith.constant 0 : i32
    %c0_i32_0 = arith.constant 0 : i32
    return %c0_i32, %arg0 : i32, i32
  }
  func.func @transform_6(%arg0: i32) -> (i32, i32) {
    %c0_i32 = arith.constant 0 : i32
    %c0_i32_0 = arith.constant 0 : i32
    return %c0_i32, %arg0 : i32, i32
  }
  func.func @transform_7(%arg0: i32) -> (i32, i32) {
    %c0_i32 = arith.constant 0 : i32
    %c0_i32_0 = arith.constant 0 : i32
    return %c0_i32, %arg0 : i32, i32
  }
}

</mosaic_0001>

<bundles_post_ra>
// kernel: deeplabv3plus_lstm_forward.7
= control target key start
LH: loop header
LB: loop body
LE: loop exit
PB: predicated region body
PF: predicated region fallthrough
CT: control target
= control target key end

     0   :  { %s466_s12 = smov 0   ;;  %s468_s13 = smov 0   ;;  %s524_s0 = inlined_call_operand.vmem [shape: bf16[8,27], index: 0, kind: input, shape index: {}]   ;;  %s525_s1 = inlined_call_operand.vmem [shape: bf16[27,512], index: 1, kind: input, shape index: {}]   ;;  %s526_s2 = inlined_call_operand.vmem [shape: f32[8,1], index: 2, kind: input, shape index: {}]   ;;  %s527_s3 = inlined_call_operand.vmem [shape: bf16[8,512], index: 3, kind: output, shape index: {}]  }
   0x1   :  { %s470_s14 = smov 0  }
   0x2 LB: > { %s357_s15 = sadd.s32 4294967295, %s442_s14   ;;  %s483_s16 = sadd.s32 1, %s442_s14   ;;  %s442_s14 = sphi %s470_s14, %s530_s14   ;;  %s438_s13 = sphi %s468_s13, %s529_s13   ;;  %s434_s12 = sphi %s466_s12, %s528_s12  }
   0x3   : > { %s38_s17 = ssub.s32 %s442_s14, %s483_s16  ;;  %s41_s18 = sadd.s32 1, %s438_s13 }
   0x4   : > { %p39_p0 = scmp.eq.s32.totalorder %s38_s17, 0  ;;  %p48_p1 = scmp.ne.s32.totalorder %s438_s13, %s434_s12 }
   0x5   : > { %p49_p2 = scmp.eq.s32.totalorder %s442_s14, 0  ;;  %p360_p4 = scmp.ge.s32.totalorder %s442_s14, 2 }
   0x6   : > { %s492_s19 = scalar_select %p39_p0, %s438_s13, %s41_s18  }
   0x7   : > { %p50_p3 = por %p49_p2, %p48_p1  ;;  %127 = sbr.rel (%p360_p4) target bundleno = 20 (0x14), region = 24 }
   0xc   : > { %130 = sbr.rel (!%p50_p3) target bundleno = 20 (0x14), region = 28  ;;  %s132_s20 = sand.u32 (%p50_p3), 1, %s438_s13  }
   0xd   : > { %s388_s21 = sshll.u32 (%p50_p3), %s442_s14, 3  ;;  %s361_s22 = sshll.u32 (%p50_p3), %s132_s20, 5 }
   0xe   : > { %s137_s25 = scalar_lea.vmem (%p50_p3), %s525_s1, %s388_s21  ;;  %s134_s26 = scalar_lea.vmem (%p50_p3), [#allocation2], %s361_s22 }
   0xf   : > { %v172_v0 = vld [vmem:[%s137_s25] sm:$0xff] (%p50_p3)  ;;  %v174_v1 = vld [vmem:[%s137_s25 + $0x10] sm:$0xff] (%p50_p3) }
  0x10   : > { %v176_v2 = vld [vmem:[%s137_s25 + $0x20] sm:$0xff] (%p50_p3)  ;;  %173 = vst [vmem:[%s134_s26] sm:$0xff] (%p50_p3), %v172_v0  ;;  %v178_v3 = vld [vmem:[%s137_s25 + $0x30] sm:$0xff] (%p50_p3) }
  0x11   : > { %175 = vst [vmem:[%s134_s26 + $0x8] sm:$0xff] %v174_v1 }
  0x12   : > { %177 = vst [vmem:[%s134_s26 + $0x10] sm:$0xff] %v176_v2 }
  0x13   : > { %179 = vst [vmem:[%s134_s26 + $0x18] sm:$0xff] %v178_v3 }
  0x14 PF: > { %p364_p5 = scmp.ge.s32.totalorder %s442_s14, 1  ;;  %p184_p6 = scmp.lt.s32.totalorder %s442_s14, 3 }
  0x16   : > { %p185_p7 = pnand %p364_p5, %p184_p6 }
  0x17   : > { %s191_s27 = sand.u32 (!%p185_p7), 1, %s434_s12   ;;  %s366_s7 = sshll.u32 (!%p185_p7), %s357_s15, 1 }
  0x18   : > { %188 = sbr.rel (%p185_p7) target bundleno = 177 (0xb1), region = 66  ;;  %s365_s28 = sshll.u32 (!%p185_p7), %s191_s27, 5 }
  0x19   : > { %s193_s4 = scalar_lea.vmem (!%p185_p7), [#allocation2], %s365_s28  ;;  %p216_p8 = scmp.lt.s32.totalorder (!%p185_p7), %s366_s7, 3 }
  0x1d   : > { %vm255_vm0 = vcmask 1044480   ;;  %vm256_vm1 = vcmask 1045504   ;;  %v444_v4 = vmov 65535   ;;  %v227_v6 = vld [vmem:[%s526_s2] sm:$0xff]  ;;  %v445_v8 = vmov 0   ;;  %s532_s7 = smov (!%p216_p8, %s366_s7), 3 }
  0x1e   : > { %v257_v5 = vsel %vm255_vm0, 4294967295, %v444_v4  ;;  %419 = vset.pattern.permute.xlu0 %v445_v8  ;;  %v378_v9 = vld [vmem:[%s193_s4 + $0x10] sm:$0xf]  ;;  %v392_v10 = vld [vmem:[%s193_s4 + $0x14] sm:$0x30]  ;;  %vm251_vm2 = vcmask 220160  }
  0x1f   : > { %v258_v7 = vsel %vm256_vm1, %v257_v5, 0  ;;  %v391_v11 = vld [vmem:[%s193_s4 + $0x14] sm:$0xf]  ;;  %230 = vperm.xlu0 %419, %v227_v6   ;;  %v379_v12 = vor.u32 %v392_v10, %v378_v9  ;;  %v380_v13 = vld [vmem:[%s193_s4 + $0x18] sm:$0x30]  ;;  %s367_s8 = sshll.u32 %s532_s7, 2 }
  0x20   : > { %v383_v14 = vor.u32 %v391_v11, %v380_v13  ;;  %v370_v15 = vld [vmem:[%s193_s4] sm:$0xf]  ;;  %v390_v16 = vld [vmem:[%s193_s4 + $0x4] sm:$0xf0]  ;;  %v389_v18 = vld [vmem:[%s193_s4 + $0x4] sm:$0xf]  ;;  %s219_s11 = scalar_lea.vmem %s527_s3, %s367_s8 }
  0x21   : > { %v260_v17 = vand.u32 %v379_v12, %v258_v7  ;;  %v372_v19 = vld [vmem:[%s193_s4 + $0x8] sm:$0xf0]  ;;  %v371_v21 = vor.u32 %v390_v16, %v370_v15  ;;  %v222_v23 = vld [vmem:[%s524_s0] sm:$0xf] }
  0x22   : > { %v263_v20 = vand.u32 %v383_v14, %v258_v7  ;;  %v375_v22 = vor.u32 %v389_v18, %v372_v19 }
  0x23   : > { %271 = vmatpush.bf16.msra.mxu0 %v260_v17 }
  0x24   : > { %284 = vmatpush.bf16.msra.mxu1 %v263_v20 }
  0x27   : > { %272 = vmatpush.bf16.msra.mxu0 %v371_v21 }
  0x28   : > { %285 = vmatpush.bf16.msra.mxu1 %v375_v22 }
  0x2a   : > { %384 = vmatmul.msk.bf16.vlgmr.msra.gmra.mxu0 %vm251_vm2, %v222_v23 }
  0x2b   : > { %385 = vmatmul.msk.bf16.vlgmr.msra.gmra.mxu1 %vm251_vm2, %v222_v23 }
  0x91   : > { %v231_v24 = vpop.permute.xlu0 %230 }
  0xa7   : > { %v274_v25 = vpop.f32.mrf.mxu0 }
  0xa8   : > { %v275_v26 = vadd.f32 %v274_v25, %v231_v24  ;;  %v287_v27 = vpop.f32.mrf.mxu1 }
  0xa9   : > { %v288_v28 = vadd.f32 %v287_v27, %v231_v24 }
  0xaa   : > { %v291_v29 = vmax.f32 %v275_v26, 0.0 }
  0xab   : > { %v292_v30 = vmax.f32 %v288_v28, 0.0 }
  0xad   : > { %v293_v31 = vpack.c.bf16 %v292_v30, %v291_v29 }
  0xaf   : > { %294 = vst [vmem:[%s219_s11] sm:$0xff] %v293_v31  ;;  %v276_v32 = vpop.f32.mrf.mxu0 }
  0xb0   : > { %v289_v33 = vpop.f32.mrf.mxu1 }
  0xb1 PF: > { %p10_p9 = scmp.ge.s32.totalorder %s483_s16, 4   ;;  %s528_s12 = smov %s438_s13 }
  0xb2   : > { %s529_s13 = smov %s492_s19  ;;  %s530_s14 = smov %s483_s16 }
  0xb3   :  { %12 = sbr.rel (!%p10_p9) target bundleno = 2 (0x2), region = 105 }

// kernel: deeplabv3plus_lstm_forward.8
= control target key start
LH: loop header
LB: loop body
LE: loop exit
PB: predicated region body
PF: predicated region fallthrough
CT: control target
= control target key end

     0   :  { %v135_v1 = vmov 0   ;;  %vm74_vm0 = vcmask 1043456   ;;  %vm70_vm1 = vcmask 588800   ;;  %s183_s1 = inlined_call_operand.vmem [shape: bf16[72,128], index: 1, kind: input, shape index: {}]   ;;  %s184_s2 = inlined_call_operand.vmem [shape: f32[16,1], index: 2, kind: input, shape index: {}]   ;;  %s185_s0 = inlined_call_operand.vmem [shape: bf16[16,72], index: 0, kind: input, shape index: {}]   ;;  %s186_s3 = inlined_call_operand.vmem [shape: bf16[16,128], index: 3, kind: output, shape index: {}]  }
   0x1   :  { %v25_v0 = vld [vmem:[%s183_s1 + $0x20] sm:$0xf]  ;;  %134 = vset.pattern.permute.xlu0 %v135_v1  ;;  %v127_v6 = vld [vmem:[%s183_s1 + $0x18] sm:$0xff]  ;;  %v27_v7 = vld [vmem:[%s184_s2 + $0x8] sm:$0xff] }
   0x2   :  { %v60_v2 = vunpack.c.l.b16 %v25_v0  ;;  %v26_v3 = vld [vmem:[%s184_s2] sm:$0xff]  ;;  %v126_v8 = vld [vmem:[%s183_s1 + $0x10] sm:$0xff]  ;;  %v125_v9 = vld [vmem:[%s183_s1 + $0x8] sm:$0xff] }
   0x3   :  { %30 = vperm.xlu0 %134, %v26_v3   ;;  %v124_v10 = vld [vmem:[%s183_s1] sm:$0xff] }
   0x4   :  { %v65_v4 = vpack.c.b16 %v60_v2, %v60_v2  ;;  %v123_v11 = vld [vmem:[%s185_s0] sm:$0xff] }
   0x6   :  { %v76_v5 = vsel %vm74_vm0, %v65_v4, 0 }
   0x7   :  { %81 = vmatpush.bf16.msra.mxu0 %v76_v5 }
   0xb   :  { %82 = vmatpush.bf16.msra.mxu0 %v127_v6  ;;  %35 = vperm.xlu0 %134, %v27_v7  }
   0xf   :  { %83 = vmatpush.bf16.msra.mxu0 %v126_v8 }
  0x13   :  { %84 = vmatpush.bf16.msra.mxu0 %v125_v9 }
  0x17   :  { %85 = vmatpush.bf16.msra.mxu0 %v124_v10 }
  0x1a   :  { %122 = vmatmul.msk.bf16.vlgmr.msra.gmra.mxu0 %vm70_vm1, %v123_v11 }
  0x75   :  { %v31_v12 = vpop.permute.xlu0 %30 }
  0x7d   :  { %v36_v15 = vpop.permute.xlu0 %35 }
  0x97   :  { %v87_v13 = vpop.f32.mrf.mxu0 }
  0x98   :  { %v88_v14 = vadd.f32 %v87_v13, %v31_v12 }
  0x9a   :  { %v92_v18 = vmax.f32 %v88_v14, 0.0 }
  0x9f   :  { %v89_v16 = vpop.f32.mrf.mxu0 }
  0xa0   :  { %v90_v17 = vadd.f32 %v89_v16, %v36_v15 }
  0xa2   :  { %v93_v19 = vmax.f32 %v90_v17, 0.0 }
  0xa4   :  { %v131_v20 = vpack.c.bf16 %v93_v19, %v92_v18 }
  0xa6   :  { %132 = vst [vmem:[%s186_s3] sm:$0xff] %v131_v20  }

// kernel: deeplabv3plus_lstm_forward.9
= control target key start
LH: loop header
LB: loop body
LE: loop exit
PB: predicated region body
PF: predicated region fallthrough
CT: control target
= control target key end

     0   :  { %v273_v6 = vmov 0   ;;  %vm133_vm0 = vcmask 130048   ;;  %vm186_vm1 = vcmask 257024   ;;  %s375_s1 = inlined_call_operand.vmem [shape: bf16[144,32], index: 1, kind: input, shape index: {}]   ;;  %s376_s0 = inlined_call_operand.vmem [shape: bf16[32,144], index: 0, kind: input, shape index: {}]   ;;  %s377_s2 = inlined_call_operand.vmem [shape: f32[32,1], index: 2, kind: input, shape index: {}]   ;;  %s378_s3 = inlined_call_operand.vmem [shape: bf16[32,32], index: 3, kind: output, shape index: {}]  }
   0x1   :  { %v260_v0 = vld [vmem:[%s375_s1 + $0x38] sm:$0xff]  ;;  %v261_v1 = vld [vmem:[%s375_s1 + $0x40] sm:$0xff]  ;;  %v259_v3 = vld [vmem:[%s375_s1 + $0x30] sm:$0xff]  ;;  %272 = vset.pattern.permute.xlu1 %v273_v6  ;;  %271 = vset.pattern.permute.xlu0 %v273_v6 }
   0x2   :  { %v249_v2 = vld [vmem:[%s376_s0 + $0x4] sm:$0xf]  ;;  %140 = vmatpush.bf16.msra.mxu0 %v260_v0  ;;  %262 = vmatpush.bf16.msra.mxu2 %v260_v0  ;;  %v199_v4 = vld [vmem:[%s376_s0 + $0x8] sm:$0xf0]  ;;  %v39_v7 = vld [vmem:[%s377_s2 + $0x10] sm:$0xff] }
   0x3   :  { %166 = vmatpush.bf16.msra.mxu1 %v261_v1  ;;  %v202_v5 = vor.u32 %v249_v2, %v199_v4  ;;  %v258_v8 = vld [vmem:[%s375_s1 + $0x28] sm:$0xff]  ;;  %v37_v9 = vld [vmem:[%s377_s2] sm:$0xff]  ;;  %53 = vperm.xlu1 %272, %v39_v7   ;;  %v40_v11 = vld [vmem:[%s377_s2 + $0x18] sm:$0xff] }
   0x4   :  { %43 = vperm.xlu0 %271, %v37_v9   ;;  %v257_v10 = vld [vmem:[%s375_s1 + $0x20] sm:$0xff]  ;;  %v38_v12 = vld [vmem:[%s377_s2 + $0x8] sm:$0xff]  ;;  %v256_v13 = vld [vmem:[%s375_s1 + $0x18] sm:$0xff] }
   0x5   :  { %v251_v14 = vld [vmem:[%s376_s0 + $0x14] sm:$0xf]  ;;  %v207_v15 = vld [vmem:[%s376_s0 + $0x18] sm:$0xf0]  ;;  %v254_v18 = vld [vmem:[%s375_s1 + $0x8] sm:$0xff] }
   0x6   :  { %141 = vmatpush.bf16.msra.mxu0 %v259_v3  ;;  %263 = vmatpush.bf16.msra.mxu2 %v259_v3  ;;  %v255_v16 = vld [vmem:[%s375_s1 + $0x10] sm:$0xff]  ;;  %v210_v17 = vor.u32 %v251_v14, %v207_v15  ;;  %v253_v19 = vld [vmem:[%s375_s1] sm:$0xff]  ;;  %v250_v21 = vld [vmem:[%s376_s0 + $0x4] sm:$0xf0] }
   0x7   :  { %247 = vmatmul.msk.bf16.vlgmr.msra.gmra.mxu1 %vm133_vm0, %v202_v5  ;;  %v197_v20 = vld [vmem:[%s376_s0] sm:$0xf]  ;;  %v205_v22 = vld [vmem:[%s376_s0 + $0x10] sm:$0xf]  ;;  %v252_v23 = vld [vmem:[%s376_s0 + $0x14] sm:$0xf0] }
   0x8   :  { %v198_v24 = vor.u32 %v250_v21, %v197_v20  ;;  %v206_v25 = vor.u32 %v252_v23, %v205_v22 }
   0xa   :  { %142 = vmatpush.bf16.msra.mxu0 %v258_v8  ;;  %264 = vmatpush.bf16.msra.mxu2 %v258_v8 }
   0xb   :  { %58 = vperm.xlu1 %272, %v40_v11  }
   0xc   :  { %48 = vperm.xlu0 %271, %v38_v12  }
   0xe   :  { %143 = vmatpush.bf16.msra.mxu0 %v257_v10  ;;  %265 = vmatpush.bf16.msra.mxu2 %v257_v10 }
  0x12   :  { %144 = vmatpush.bf16.msra.mxu0 %v256_v13  ;;  %266 = vmatpush.bf16.msra.mxu2 %v256_v13 }
  0x16   :  { %145 = vmatpush.bf16.msra.mxu0 %v255_v16  ;;  %267 = vmatpush.bf16.msra.mxu2 %v255_v16 }
  0x17   :  { %248 = vmatmul.msk.bf16.gmra.mxu1 %vm133_vm0, %v210_v17 }
  0x1a   :  { %146 = vmatpush.bf16.msra.mxu0 %v254_v18  ;;  %268 = vmatpush.bf16.msra.mxu2 %v254_v18 }
  0x1e   :  { %147 = vmatpush.bf16.msra.mxu0 %v253_v19  ;;  %269 = vmatpush.bf16.msra.mxu2 %v253_v19 }
  0x21   :  { %148 = vmatmul.bf16.vlgmr.msra.gmra.mxu0 %v198_v24  ;;  %153 = vmatmul.bf16.vlgmr.msra.gmra.mxu2 %v206_v25 }
  0x75   :  { %v54_v32 = vpop.permute.xlu1 %53 }
  0x76   :  { %v44_v28 = vpop.permute.xlu0 %43 }
  0x7d   :  { %v59_v46 = vpop.permute.xlu1 %58 }
  0x7e   :  { %v49_v38 = vpop.permute.xlu0 %48 }
  0x84   :  { %v168_v26 = vpop.f32.mrf.mxu1 }
  0x8c   :  { %v170_v27 = vpop.f32.mrf.mxu1 }
  0x94   :  { %v173_v34 = vpop.f32.mrf.mxu1 }
  0x9c   :  { %v175_v50 = vpop.f32.mrf.mxu1 }
  0x9e   :  { %v149_v29 = vpop.f32.mrf.mxu0 }
  0x9f   :  { %v150_v30 = vadd.f32 %v149_v29, %v44_v28 }
  0xa1   :  { %v169_v31 = vadd.f32 %v168_v26, %v150_v30 }
  0xa3   :  { %v178_v33 = vmax.f32 %v169_v31, 0.0 }
  0xa4   :  { %v154_v35 = vpop.f32.mrf.mxu2 }
  0xa5   :  { %v182_v36 = vpack.c.bf16 %v178_v33, %v178_v33  ;;  %v155_v37 = vadd.f32 %v154_v35, %v54_v32 }
  0xa6   :  { %v151_v39 = vpop.f32.mrf.mxu0 }
  0xa7   :  { %187 = vst.msk [vmem:[%s378_s3] sm:$0xf] %vm186_vm1, %v182_v36  ;;  %v174_v40 = vadd.f32 %v173_v34, %v155_v37  ;;  %v152_v41 = vadd.f32 %v151_v39, %v49_v38 }
  0xa9   :  { %v180_v42 = vmax.f32 %v174_v40, 0.0  ;;  %v171_v43 = vadd.f32 %v170_v27, %v152_v41 }
  0xab   :  { %v184_v44 = vpack.c.bf16 %v180_v42, %v180_v42  ;;  %v179_v45 = vmax.f32 %v171_v43, 0.0 }
  0xac   :  { %v156_v47 = vpop.f32.mrf.mxu2 }
  0xad   :  { %189 = vst.msk [vmem:[%s378_s3 + $0x8] sm:$0xf] %vm186_vm1, %v184_v44  ;;  %v183_v48 = vpack.c.bf16 %v179_v45, %v179_v45  ;;  %v157_v49 = vadd.f32 %v156_v47, %v59_v46 }
  0xaf   :  { %188 = vst.msk [vmem:[%s378_s3 + $0x4] sm:$0xf] %vm186_vm1, %v183_v48  ;;  %v176_v51 = vadd.f32 %v175_v50, %v157_v49 }
  0xb1   :  { %v181_v52 = vmax.f32 %v176_v51, 0.0 }
  0xb3   :  { %v185_v53 = vpack.c.bf16 %v181_v52, %v181_v52 }
  0xb5   :  { %190 = vst.msk [vmem:[%s378_s3 + $0xc] sm:$0xf] %vm186_vm1, %v185_v53 }

// kernel: deeplabv3plus_lstm_forward.10
= control target key start
LH: loop header
LB: loop body
LE: loop exit
PB: predicated region body
PF: predicated region fallthrough
CT: control target
= control target key end

     0   :  { %vm75_vm0 = vcmask 261120   ;;  %v429_v12 = vmov 0   ;;  %vm199_vm1 = vcmask 130048   ;;  %vm239_vm2 = vcmask 1041408   ;;  %s615_s2 = inlined_call_operand.vmem [shape: f32[32,2], index: 2, kind: input, shape index: {}]   ;;  %s616_s0 = inlined_call_operand.vmem [shape: bf16[32,32], index: 0, kind: input, shape index: {}]   ;;  %s617_s8 = inlined_call_operand.vmem [shape: f32[16,1], index: 8, kind: input, shape index: {}]   ;;  %s618_s13 = inlined_call_operand.vmem [shape: f32[8,1], index: 13, kind: input, shape index: {}]   ;;  %s619_s7 = inlined_call_operand.vmem [shape: f32[16,32], index: 7, kind: input, shape index: {}]   ;;  %s620_s5 = inlined_call_operand.vmem [shape: f32[16,32], index: 5, kind: input, shape index: {}]   ;;  %s621_s6 = inlined_call_operand.vmem [shape: f32[16,1], index: 6, kind: input, shape index: {}]   ;;  %s622_s10 = inlined_call_operand.vmem [shape: f32[16,16], index: 10, kind: input, shape index: {}]   ;;  %s623_s3 = inlined_call_operand.vmem [shape: f32[2,32], index: 3, kind: input, shape index: {}]   ;;  %s624_s9 = inlined_call_operand.vmem [shape: f32[16,16], index: 9, kind: input, shape index: {}]   ;;  %s625_s1 = inlined_call_operand.vmem [shape: bf16[16,128], index: 1, kind: input, shape index: {}]   ;;  %s626_s11 = inlined_call_operand.vmem [shape: f32[16,1], index: 11, kind: input, shape index: {}]   ;;  %s627_s4 = inlined_call_operand.vmem [shape: f32[32,128], index: 4, kind: input, shape index: {}]   ;;  %s628_s12 = inlined_call_operand.vmem [shape: f32[8,16], index: 12, kind: input, shape index: {}]   ;;  %s629_s15 = inlined_call_operand.vmem [shape: bf16[8,128], index: 15, kind: output, shape index: {1}]   ;;  %s630_s14 = inlined_call_operand.vmem [shape: bf16[16,128], index: 14, kind: output, shape index: {0}]  }
   0x1   :  { %v110_v0 = vld [vmem:[%s615_s2 + $0x18] sm:$0xff]  ;;  %v109_v1 = vld [vmem:[%s615_s2 + $0x10] sm:$0xff]  ;;  %v408_v2 = vld [vmem:[%s616_s0] sm:$0xff]   ;;  %426 = vset.pattern.permute.xlu0 %v429_v12  ;;  %427 = vset.pattern.permute.xlu1 %v429_v12  ;;  %vm232_vm3 = vcmask 15360  }
   0x2   :  { %135 = vmatpush.msra.mxu1 %v110_v0  ;;  %v424_v3 = vld [vmem:[%s616_s0 + $0x8] sm:$0xff]   ;;  %v107_v6 = vld [vmem:[%s615_s2] sm:$0xff]  ;;  %v409_v7 = vunpack.c.l.bf16 %v408_v2  ;;  %v410_v9 = vunpack.c.h.bf16 %v408_v2  ;;  %428 = vset.pattern.permute.xlu2 %v429_v12  ;;  %v314_v49 = vld [vmem:[%s627_s4 + $0x18] sm:$0xff] }
   0x3   :  { %v108_v4 = vld [vmem:[%s615_s2 + $0x8] sm:$0xff]  ;;  %v414_v5 = vunpack.c.h.bf16 %v424_v3  ;;  %v413_v8 = vunpack.c.l.bf16 %v424_v3  ;;  %v154_v14 = vld [vmem:[%s617_s8] sm:$0xff]  ;;  %v313_v54 = vld [vmem:[%s627_s4 + $0x10] sm:$0xff] }
   0x4   :  { %136 = vmatpush.msra.mxu1 %v109_v1  ;;  %v155_v11 = vld [vmem:[%s617_s8 + $0x8] sm:$0xff]  ;;  %v349_v15 = vld [vmem:[%s618_s13] sm:$0xff] }
   0x5   :  { %94 = vmatpush.msra.mxu0 %v414_v5  ;;  %163 = vperm.xlu0 %426, %v155_v11   ;;  %v152_v18 = vld [vmem:[%s619_s7] sm:$0xff]  ;;  %v153_v19 = vld [vmem:[%s619_s7 + $0x8] sm:$0xff] }
   0x6   :  { %137 = vmatpush.msra.mxu1 %v108_v4  ;;  %v61_v20 = vld [vmem:[%s620_s5] sm:$0xff]  ;;  %v62_v21 = vld [vmem:[%s620_s5 + $0x8] sm:$0xff] }
   0x7   :  { %95 = vmatpush.msra.mxu0 %v413_v8  ;;  %v64_v22 = vld [vmem:[%s621_s6 + $0x8] sm:$0xff]  ;;  %v63_v23 = vld [vmem:[%s621_s6] sm:$0xff] }
   0x8   :  { %138 = vmatpush.msra.mxu1 %v107_v6  ;;  %72 = vperm.xlu1 %427, %v64_v22   ;;  %v197_v32 = vld [vmem:[%s622_s10] sm:$0xff]  ;;  %v198_v33 = vld [vmem:[%s622_s10 + $0x8] sm:$0xff] }
   0x9   :  { %391 = vmatmul.msk.f32.vlgmr.msra.gmra.mxu1 %vm75_vm0, %v409_v7  ;;  %96 = vmatpush.msra.mxu0 %v410_v9  ;;  %v231_v34 = vld [vmem:[%s623_s3] sm:$0x3]  ;;  %v230_v45 = vld [vmem:[%s624_s9 + $0x8] sm:$0xff] }
   0xa   :  { %v229_v43 = vld [vmem:[%s624_s9] sm:$0xff]  ;;  %v296_v50 = vld [vmem:[%s626_s11 + $0x8] sm:$0xff] }
   0xb   :  { %97 = vmatpush.msra.mxu0 %v409_v7  ;;  %v416_v44 = vld [vmem:[%s625_s1] sm:$0xff]   ;;  %v312_v55 = vld [vmem:[%s627_s4 + $0x8] sm:$0xff] }
   0xc   :  { %389 = vmatmul.msk.f32.vlgmr.msra.gmra.mxu0 %vm75_vm0, %v61_v20  ;;  %v418_v46 = vunpack.c.h.bf16 %v416_v44  ;;  %v417_v47 = vunpack.c.l.bf16 %v416_v44  ;;  %v295_v48 = vld [vmem:[%s626_s11] sm:$0xff] }
   0xd   :  { %158 = vperm.xlu0 %426, %v154_v14   ;;  %299 = vperm.xlu2 %428, %v295_v48   ;;  %v348_v53 = vld [vmem:[%s628_s12] sm:$0xff] }
   0xe   :  { %v311_v56 = vld [vmem:[%s627_s4] sm:$0xff] }
  0x10   :  { %67 = vperm.xlu1 %427, %v63_v23  }
  0x11   :  { %392 = vmatmul.msk.f32.gmra.mxu1 %vm75_vm0, %v410_v9 }
  0x14   :  { %390 = vmatmul.msk.f32.gmra.mxu0 %vm75_vm0, %v62_v21 }
  0x15   :  { %352 = vperm.xlu0 %426, %v349_v15   ;;  %304 = vperm.xlu2 %428, %v296_v50  }
  0x19   :  { %393 = vmatmul.msk.f32.gmra.mxu1 %vm75_vm0, %v413_v8 }
  0x21   :  { %394 = vmatmul.msk.f32.gmra.mxu1 %vm75_vm0, %v414_v5 }
  0x67   :  { %v300_v58 = vpop.permute.xlu2 %299 }
  0x6f   :  { %v305_v2 = vpop.permute.xlu2 %304 }
  0x77   :  { %v164_v24 = vpop.permute.xlu0 %163 }
  0x7a   :  { %v73_v37 = vpop.permute.xlu1 %72 }
  0x7f   :  { %v159_v26 = vpop.permute.xlu0 %158 }
  0x82   :  { %v68_v40 = vpop.permute.xlu1 %67 }
  0x86   :  { %v140_v10 = vpop.f32.mrf.mxu1 }
  0x87   :  { %v353_v5 = vpop.permute.xlu0 %352 }
  0x89   :  { %v99_v35 = vpop.f32.mrf.mxu0 }
  0x8a   :  { %v100_v41 = vadd.f32 %v99_v35, %v68_v40 }
  0x8c   :  { %v105_v42 = vmax.f32 %v100_v41, 0.0 }
  0x8e   :  { %v143_v13 = vpop.f32.mrf.mxu1 }
  0x91   :  { %v102_v36 = vpop.f32.mrf.mxu0 }
  0x92   :  { %v103_v38 = vadd.f32 %v102_v36, %v73_v37 }
  0x94   :  { %v106_v39 = vmax.f32 %v103_v38, 0.0 }
  0x96   :  { %v146_v16 = vpop.f32.mrf.mxu1  ;;  %286 = vmatpush.msrb.mxu0 %v106_v39 }
  0x98   :  { %287 = vmatpush.msrb.mxu0 %v105_v42 }
  0x99   :  { %402 = vmatmul.msk.f32.vlgmr.msrb.gmra.mxu0 %vm199_vm1, %v229_v43 }
  0x9e   :  { %v149_v17 = vpop.f32.mrf.mxu1 }
  0x9f   :  { %184 = vmatpush.msra.mxu2 %v149_v17 }
  0xa1   :  { %185 = vmatpush.msra.mxu2 %v146_v16  ;;  %403 = vmatmul.msk.f32.gmra.mxu0 %vm199_vm1, %v230_v45 }
  0xa3   :  { %186 = vmatpush.msra.mxu2 %v143_v13 }
  0xa5   :  { %187 = vmatpush.msra.mxu2 %v140_v10 }
  0xa6   :  { %395 = vmatmul.msk.f32.vlgmr.msra.gmra.mxu2 %vm75_vm0, %v152_v18 }
  0xa7   :  { %333 = vmatpush.msrb.mxu2 %v314_v49 }
  0xa9   :  { %334 = vmatpush.msrb.mxu2 %v313_v54 }
  0xab   :  { %335 = vmatpush.msrb.mxu2 %v312_v55 }
  0xad   :  { %336 = vmatpush.msrb.mxu2 %v311_v56 }
  0xae   :  { %396 = vmatmul.msk.f32.gmra.mxu2 %vm75_vm0, %v153_v19 }
 0x116   :  { %v289_v57 = vpop.f32.mrf.mxu0 }
 0x11e   :  { %v292_v63 = vpop.f32.mrf.mxu0 }
 0x129   :  { %v189_v25 = vpop.f32.mrf.mxu2 }
 0x12a   :  { %v190_v28 = vadd.f32 %v189_v25, %v159_v26 }
 0x12c   :  { %v195_v31 = vmax.f32 %v190_v28, 0.0 }
 0x131   :  { %v192_v27 = vpop.f32.mrf.mxu2 }
 0x132   :  { %v193_v29 = vadd.f32 %v192_v27, %v164_v24 }
 0x134   :  { %v196_v30 = vmax.f32 %v193_v29, 0.0 }
 0x136   :  { %220 = vmatpush.msra.mxu3 %v196_v30 }
 0x138   :  { %221 = vmatpush.msra.mxu3 %v195_v31 }
 0x139   :  { %397 = vmatmul.msk.f32.vlgmr.msra.gmra.mxu3 %vm199_vm1, %v197_v32 }
 0x13a   :  { %399 = vmatpush.msk.msrb.mxu3 %vm239_vm2, %v231_v34 }
 0x13c   :  { %372 = vmatpush.msra.mxu3 %v418_v46 }
 0x13e   :  { %373 = vmatpush.msra.mxu3 %v417_v47 }
 0x141   :  { %398 = vmatmul.msk.f32.gmra.mxu3 %vm199_vm1, %v198_v33 }
 0x1bc   :  { %v223_v51 = vpop.f32.mrf.mxu3 }
 0x1bd   :  { %400 = vmatmul.msk.f32.vlgmr.msrb.gmra.mxu3 %vm232_vm3, %v223_v51 }
 0x1c4   :  { %v226_v52 = vpop.f32.mrf.mxu3 }
 0x1c5   :  { %401 = vmatmul.msk.f32.gmra.mxu3 %vm232_vm3, %v226_v52 }
 0x1cd   :  { %406 = vmatmul.msk.f32.vlgmr.msra.gmra.mxu3 %vm199_vm1, %v348_v53 }
 0x240   :  { %v260_v59 = vpop.f32.mrf.mxu3 }
 0x241   :  { %v290_v60 = vadd.f32 %v289_v57, %v260_v59 }
 0x243   :  { %v307_v61 = vadd.f32 %v300_v58, %v290_v60 }
 0x245   :  { %v309_v62 = vmax.f32 %v307_v61, 0.0 }
 0x247   :  { %404 = vmatmul.msk.f32.vlgmr.msrb.gmra.mxu2 %vm75_vm0, %v309_v62 }
 0x248   :  { %v263_v0 = vpop.f32.mrf.mxu3 }
 0x249   :  { %v293_v1 = vadd.f32 %v292_v63, %v263_v0 }
 0x24b   :  { %v308_v3 = vadd.f32 %v305_v2, %v293_v1 }
 0x24d   :  { %v310_v4 = vmax.f32 %v308_v3, 0.0 }
 0x24f   :  { %405 = vmatmul.msk.f32.gmra.mxu2 %vm75_vm0, %v310_v4 }
 0x250   :  { %v375_v6 = vpop.f32.mrf.mxu3 }
 0x251   :  { %v376_v7 = vadd.f32 %v375_v6, %v353_v5 }
 0x253   :  { %v378_v8 = vmax.f32 %v376_v7, 0.0 }
 0x255   :  { %v379_v9 = vpack.c.bf16 %v378_v8, %v378_v8 }
 0x257   :  { %380 = vst [vmem:[%s629_s15] sm:$0xf] %v379_v9 }
 0x2ca   :  { %v338_v10 = vpop.f32.mrf.mxu2 }
 0x2d2   :  { %v341_v11 = vpop.f32.mrf.mxu2 }
 0x2d3   :  { %v422_v12 = vpack.c.bf16 %v341_v11, %v338_v10 }
 0x2d5   :  { %423 = vst [vmem:[%s630_s14] sm:$0xff] %v422_v12  }

// kernel: deeplabv3plus_lstm_forward.11
= control target key start
LH: loop header
LB: loop body
LE: loop exit
PB: predicated region body
PF: predicated region fallthrough
CT: control target
= control target key end

     0   :  { %vm88_vm0 = vcmask 1043456   ;;  %v314_v4 = vmov 0   ;;  %vm169_vm1 = vcmask 130048   ;;  %vm84_vm2 = vcmask 588800   ;;  %s411_s1 = inlined_call_operand.vmem [shape: bf16[144,128], index: 1, kind: input, shape index: {}]   ;;  %s412_s3 = inlined_call_operand.vmem [shape: bf16[72,128], index: 3, kind: input, shape index: {}]   ;;  %s413_s0 = inlined_call_operand.vmem [shape: bf16[16,144], index: 0, kind: input, shape index: {}]   ;;  %s414_s4 = inlined_call_operand.vmem [shape: f32[16,1], index: 4, kind: input, shape index: {}]   ;;  %s415_s2 = inlined_call_operand.vmem [shape: bf16[16,72], index: 2, kind: input, shape index: {}]   ;;  %s416_s5 = inlined_call_operand.vmem [shape: bf16[16,128], index: 5, kind: output, shape index: {}]  }
   0x1   :  { %v300_v0 = vld [vmem:[%s411_s1 + $0x38] sm:$0xff]  ;;  %v51_v1 = vld [vmem:[%s412_s3 + $0x20] sm:$0xf]  ;;  %v299_v3 = vld [vmem:[%s411_s1 + $0x30] sm:$0xff]  ;;  %313 = vset.pattern.permute.xlu0 %v314_v4 }
   0x2   :  { %v74_v2 = vunpack.c.l.b16 %v51_v1  ;;  %173 = vmatpush.bf16.msra.mxu1 %v300_v0  ;;  %v301_v6 = vld [vmem:[%s411_s1 + $0x40] sm:$0xff]  ;;  %v250_v8 = vld [vmem:[%s413_s0 + $0x8] sm:$0xf0]  ;;  %v306_v11 = vld [vmem:[%s412_s3 + $0x18] sm:$0xff] }
   0x3   :  { %v291_v7 = vld [vmem:[%s413_s0 + $0x4] sm:$0xf]  ;;  %194 = vmatpush.bf16.msra.mxu2 %v301_v6  ;;  %v298_v12 = vld [vmem:[%s411_s1 + $0x28] sm:$0xff]  ;;  %v305_v14 = vld [vmem:[%s412_s3 + $0x10] sm:$0xff] }
   0x4   :  { %v79_v5 = vpack.c.b16 %v74_v2, %v74_v2  ;;  %v253_v9 = vor.u32 %v291_v7, %v250_v8  ;;  %v201_v13 = vld [vmem:[%s414_s4] sm:$0xff]  ;;  %v202_v16 = vld [vmem:[%s414_s4 + $0x8] sm:$0xff]  ;;  %v296_v18 = vld [vmem:[%s411_s1 + $0x18] sm:$0xff] }
   0x5   :  { %205 = vperm.xlu0 %313, %v201_v13   ;;  %v297_v15 = vld [vmem:[%s411_s1 + $0x20] sm:$0xff]  ;;  %v304_v17 = vld [vmem:[%s412_s3 + $0x8] sm:$0xff]  ;;  %v295_v20 = vld [vmem:[%s411_s1 + $0x10] sm:$0xff] }
   0x6   :  { %v90_v10 = vsel %vm88_vm0, %v79_v5, 0  ;;  %174 = vmatpush.bf16.msra.mxu1 %v299_v3  ;;  %290 = vmatmul.msk.bf16.vlgmr.msra.gmra.mxu2 %vm169_vm1, %v253_v9  ;;  %v303_v19 = vld [vmem:[%s412_s3] sm:$0xff]  ;;  %v294_v22 = vld [vmem:[%s411_s1 + $0x8] sm:$0xff] }
   0x7   :  { %95 = vmatpush.bf16.msra.mxu0 %v90_v10  ;;  %v302_v21 = vld [vmem:[%s415_s2] sm:$0xff]  ;;  %v292_v25 = vld [vmem:[%s413_s0 + $0x4] sm:$0xf0] }
   0x8   :  { %v293_v23 = vld [vmem:[%s411_s1] sm:$0xff] }
   0x9   :  { %v248_v24 = vld [vmem:[%s413_s0] sm:$0xf] }
   0xa   :  { %175 = vmatpush.bf16.msra.mxu1 %v298_v12  ;;  %v249_v26 = vor.u32 %v292_v25, %v248_v24 }
   0xb   :  { %96 = vmatpush.bf16.msra.mxu0 %v306_v11 }
   0xd   :  { %210 = vperm.xlu0 %313, %v202_v16  }
   0xe   :  { %176 = vmatpush.bf16.msra.mxu1 %v297_v15 }
   0xf   :  { %97 = vmatpush.bf16.msra.mxu0 %v305_v14 }
  0x12   :  { %177 = vmatpush.bf16.msra.mxu1 %v296_v18 }
  0x13   :  { %98 = vmatpush.bf16.msra.mxu0 %v304_v17 }
  0x16   :  { %178 = vmatpush.bf16.msra.mxu1 %v295_v20 }
  0x17   :  { %99 = vmatpush.bf16.msra.mxu0 %v303_v19 }
  0x1a   :  { %245 = vmatmul.msk.bf16.vlgmr.msra.gmra.mxu0 %vm84_vm2, %v302_v21  ;;  %179 = vmatpush.bf16.msra.mxu1 %v294_v22 }
  0x1e   :  { %180 = vmatpush.bf16.msra.mxu1 %v293_v23 }
  0x21   :  { %181 = vmatmul.bf16.vlgmr.msra.gmra.mxu1 %v249_v26 }
  0x77   :  { %v206_v30 = vpop.permute.xlu0 %205 }
  0x7f   :  { %v211_v39 = vpop.permute.xlu0 %210 }
  0x89   :  { %v196_v28 = vpop.f32.mrf.mxu2 }
  0x91   :  { %v198_v36 = vpop.f32.mrf.mxu2 }
  0x97   :  { %v101_v27 = vpop.f32.mrf.mxu0 }
  0x9e   :  { %v182_v29 = vpop.f32.mrf.mxu1 }
  0x9f   :  { %v183_v31 = vadd.f32 %v182_v29, %v101_v27  ;;  %v103_v33 = vpop.f32.mrf.mxu0 }
  0xa1   :  { %v197_v32 = vadd.f32 %v196_v28, %v183_v31 }
  0xa3   :  { %v213_v37 = vadd.f32 %v206_v30, %v197_v32 }
  0xa5   :  { %v215_v41 = vmax.f32 %v213_v37, 0.0 }
  0xa6   :  { %v184_v34 = vpop.f32.mrf.mxu1 }
  0xa7   :  { %v185_v35 = vadd.f32 %v184_v34, %v103_v33 }
  0xa9   :  { %v199_v38 = vadd.f32 %v198_v36, %v185_v35 }
  0xab   :  { %v214_v40 = vadd.f32 %v211_v39, %v199_v38 }
  0xad   :  { %v216_v42 = vmax.f32 %v214_v40, 0.0 }
  0xaf   :  { %v310_v43 = vpack.c.bf16 %v216_v42, %v215_v41 }
  0xb1   :  { %311 = vst [vmem:[%s416_s5] sm:$0xff] %v310_v43  }

// kernel: deeplabv3plus_lstm_forward.12
= control target key start
LH: loop header
LB: loop body
LE: loop exit
PB: predicated region body
PF: predicated region fallthrough
CT: control target
= control target key end

     0   :  { %s1376_s15 = smov 0   ;;  %s1378_s16 = smov 0   ;;  %s1701_s0 = inlined_call_operand.vmem [shape: bf16[2,16], index: 0, kind: input, shape index: {}]   ;;  %s1702_s1 = inlined_call_operand.vmem [shape: bf16[16,128], index: 1, kind: input, shape index: {}]   ;;  %s1703_s2 = inlined_call_operand.vmem [shape: bf16[128,2048], index: 2, kind: input, shape index: {}]   ;;  %s1704_s3 = inlined_call_operand.vmem [shape: f32[2,1], index: 3, kind: input, shape index: {}]   ;;  %s1705_s4 = inlined_call_operand.vmem [shape: bf16[2,2048], index: 4, kind: output, shape index: {}]  }
   0x1   :  { %s1380_s17 = smov 0  }
   0x2 LB: > { %s961_s18 = sadd.s32 4294967295, %s1348_s17   ;;  %s1393_s19 = sadd.s32 1, %s1348_s17   ;;  %s1348_s17 = sphi %s1380_s17, %s1708_s17   ;;  %s1344_s16 = sphi %s1378_s16, %s1707_s16   ;;  %s1340_s15 = sphi %s1376_s15, %s1706_s15  }
   0x3   : > { %s60_s20 = ssub.s32 %s1348_s17, %s1393_s19  ;;  %s63_s21 = sadd.s32 1, %s1344_s16 }
   0x4   : > { %p61_p0 = scmp.eq.s32.totalorder %s60_s20, 0  ;;  %p70_p1 = scmp.ne.s32.totalorder %s1344_s16, %s1340_s15 }
   0x5   : > { %p71_p2 = scmp.eq.s32.totalorder %s1348_s17, 0  ;;  %p964_p4 = scmp.ge.s32.totalorder %s1348_s17, 2 }
   0x6   : > { %s1402_s22 = scalar_select %p61_p0, %s1344_s16, %s63_s21  }
   0x7   : > { %p72_p3 = por %p71_p2, %p70_p1  ;;  %152 = sbr.rel (%p964_p4) target bundleno = 80 (0x50), region = 28 }
   0xc   : > { %155 = sbr.rel (!%p72_p3) target bundleno = 80 (0x50), region = 32  ;;  %s157_s23 = sand.u32 (%p72_p3), 1, %s1344_s16  }
   0xd   : > { %s1234_s24 = sshll.u32 (%p72_p3), %s1348_s17, 5  ;;  %s965_s25 = sshll.u32 (%p72_p3), %s157_s23, 9 }
   0xe   : > { %s1410_s28 = scalar_lea.vmem (%p72_p3), %s1703_s2, %s1234_s24  ;;  %s1415_s29 = scalar_lea.vmem (%p72_p3), [#allocation2], %s965_s25 }
   0xf   : > { %v175_v0 = vld [vmem:[%s1410_s28] sm:$0xff] (%p72_p3)  ;;  %v177_v1 = vld [vmem:[%s1410_s28 + $0x8] sm:$0xff] (%p72_p3)  ;;  %v179_v2 = vld [vmem:[%s1410_s28 + $0x10] sm:$0xff] (%p72_p3) }
  0x10   : > { %176 = vst [vmem:[%s1415_s29] sm:$0xff] (%p72_p3), %v175_v0  ;;  %v181_v3 = vld [vmem:[%s1410_s28 + $0x18] sm:$0xff] (%p72_p3)  ;;  %v183_v4 = vld [vmem:[%s1410_s28 + $0x40] sm:$0xff] (%p72_p3)  ;;  %v185_v5 = vld [vmem:[%s1410_s28 + $0x48] sm:$0xff] (%p72_p3) }
  0x11   : > { %178 = vst [vmem:[%s1415_s29 + $0x8] sm:$0xff] %v177_v1  ;;  %v187_v6 = vld [vmem:[%s1410_s28 + $0x50] sm:$0xff]  ;;  %v189_v7 = vld [vmem:[%s1410_s28 + $0x58] sm:$0xff]  ;;  %v191_v8 = vld [vmem:[%s1410_s28 + $0x80] sm:$0xff] }
  0x12   : > { %180 = vst [vmem:[%s1415_s29 + $0x10] sm:$0xff] %v179_v2  ;;  %v193_v9 = vld [vmem:[%s1410_s28 + $0x88] sm:$0xff]  ;;  %v195_v10 = vld [vmem:[%s1410_s28 + $0x90] sm:$0xff]  ;;  %v197_v11 = vld [vmem:[%s1410_s28 + $0x98] sm:$0xff] }
  0x13   : > { %182 = vst [vmem:[%s1415_s29 + $0x18] sm:$0xff] %v181_v3  ;;  %v199_v12 = vld [vmem:[%s1410_s28 + $0xc0] sm:$0xff]  ;;  %v201_v13 = vld [vmem:[%s1410_s28 + $0xc8] sm:$0xff]  ;;  %v203_v14 = vld [vmem:[%s1410_s28 + $0xd0] sm:$0xff] }
  0x14   : > { %184 = vst [vmem:[%s1415_s29 + $0x20] sm:$0xff] %v183_v4  ;;  %v205_v15 = vld [vmem:[%s1410_s28 + $0xd8] sm:$0xff]  ;;  %v207_v16 = vld [vmem:[%s1410_s28 + $0x100] sm:$0xff]  ;;  %v209_v17 = vld [vmem:[%s1410_s28 + $0x108] sm:$0xff] }
  0x15   : > { %186 = vst [vmem:[%s1415_s29 + $0x28] sm:$0xff] %v185_v5  ;;  %v211_v18 = vld [vmem:[%s1410_s28 + $0x110] sm:$0xff]  ;;  %v213_v19 = vld [vmem:[%s1410_s28 + $0x118] sm:$0xff]  ;;  %v215_v20 = vld [vmem:[%s1410_s28 + $0x140] sm:$0xff] }
  0x16   : > { %188 = vst [vmem:[%s1415_s29 + $0x30] sm:$0xff] %v187_v6  ;;  %v217_v21 = vld [vmem:[%s1410_s28 + $0x148] sm:$0xff]  ;;  %v219_v22 = vld [vmem:[%s1410_s28 + $0x150] sm:$0xff]  ;;  %v221_v23 = vld [vmem:[%s1410_s28 + $0x158] sm:$0xff] }
  0x17   : > { %190 = vst [vmem:[%s1415_s29 + $0x38] sm:$0xff] %v189_v7  ;;  %v223_v24 = vld [vmem:[%s1410_s28 + $0x180] sm:$0xff]  ;;  %v225_v25 = vld [vmem:[%s1410_s28 + $0x188] sm:$0xff]  ;;  %v227_v26 = vld [vmem:[%s1410_s28 + $0x190] sm:$0xff] }
  0x18   : > { %192 = vst [vmem:[%s1415_s29 + $0x40] sm:$0xff] %v191_v8  ;;  %v229_v27 = vld [vmem:[%s1410_s28 + $0x198] sm:$0xff]  ;;  %v231_v28 = vld [vmem:[%s1410_s28 + $0x1c0] sm:$0xff]  ;;  %v233_v29 = vld [vmem:[%s1410_s28 + $0x1c8] sm:$0xff] }
  0x19   : > { %194 = vst [vmem:[%s1415_s29 + $0x48] sm:$0xff] %v193_v9  ;;  %v235_v30 = vld [vmem:[%s1410_s28 + $0x1d0] sm:$0xff]  ;;  %v237_v31 = vld [vmem:[%s1410_s28 + $0x1d8] sm:$0xff]  ;;  %v239_v32 = vld [vmem:[%s1410_s28 + $0x200] sm:$0xff] }
  0x1a   : > { %196 = vst [vmem:[%s1415_s29 + $0x50] sm:$0xff] %v195_v10  ;;  %v241_v33 = vld [vmem:[%s1410_s28 + $0x208] sm:$0xff]  ;;  %v243_v34 = vld [vmem:[%s1410_s28 + $0x210] sm:$0xff]  ;;  %v245_v35 = vld [vmem:[%s1410_s28 + $0x218] sm:$0xff] }
  0x1b   : > { %198 = vst [vmem:[%s1415_s29 + $0x58] sm:$0xff] %v197_v11  ;;  %v247_v36 = vld [vmem:[%s1410_s28 + $0x240] sm:$0xff]  ;;  %v249_v37 = vld [vmem:[%s1410_s28 + $0x248] sm:$0xff]  ;;  %v251_v38 = vld [vmem:[%s1410_s28 + $0x250] sm:$0xff] }
  0x1c   : > { %200 = vst [vmem:[%s1415_s29 + $0x60] sm:$0xff] %v199_v12  ;;  %v253_v39 = vld [vmem:[%s1410_s28 + $0x258] sm:$0xff]  ;;  %v255_v40 = vld [vmem:[%s1410_s28 + $0x280] sm:$0xff]  ;;  %v257_v41 = vld [vmem:[%s1410_s28 + $0x288] sm:$0xff] }
  0x1d   : > { %202 = vst [vmem:[%s1415_s29 + $0x68] sm:$0xff] %v201_v13  ;;  %v259_v42 = vld [vmem:[%s1410_s28 + $0x290] sm:$0xff]  ;;  %v261_v43 = vld [vmem:[%s1410_s28 + $0x298] sm:$0xff]  ;;  %v263_v44 = vld [vmem:[%s1410_s28 + $0x2c0] sm:$0xff] }
  0x1e   : > { %204 = vst [vmem:[%s1415_s29 + $0x70] sm:$0xff] %v203_v14  ;;  %v265_v45 = vld [vmem:[%s1410_s28 + $0x2c8] sm:$0xff]  ;;  %v267_v46 = vld [vmem:[%s1410_s28 + $0x2d0] sm:$0xff]  ;;  %v269_v47 = vld [vmem:[%s1410_s28 + $0x2d8] sm:$0xff] }
  0x1f   : > { %206 = vst [vmem:[%s1415_s29 + $0x78] sm:$0xff] %v205_v15  ;;  %v271_v48 = vld [vmem:[%s1410_s28 + $0x300] sm:$0xff]  ;;  %v273_v49 = vld [vmem:[%s1410_s28 + $0x308] sm:$0xff]  ;;  %v275_v50 = vld [vmem:[%s1410_s28 + $0x310] sm:$0xff] }
  0x20   : > { %208 = vst [vmem:[%s1415_s29 + $0x80] sm:$0xff] %v207_v16  ;;  %v277_v51 = vld [vmem:[%s1410_s28 + $0x318] sm:$0xff]  ;;  %v279_v52 = vld [vmem:[%s1410_s28 + $0x340] sm:$0xff]  ;;  %v281_v53 = vld [vmem:[%s1410_s28 + $0x348] sm:$0xff] }
  0x21   : > { %210 = vst [vmem:[%s1415_s29 + $0x88] sm:$0xff] %v209_v17  ;;  %v283_v54 = vld [vmem:[%s1410_s28 + $0x350] sm:$0xff]  ;;  %v285_v55 = vld [vmem:[%s1410_s28 + $0x358] sm:$0xff]  ;;  %v287_v56 = vld [vmem:[%s1410_s28 + $0x380] sm:$0xff] }
  0x22   : > { %212 = vst [vmem:[%s1415_s29 + $0x90] sm:$0xff] %v211_v18  ;;  %v289_v57 = vld [vmem:[%s1410_s28 + $0x388] sm:$0xff]  ;;  %v291_v58 = vld [vmem:[%s1410_s28 + $0x390] sm:$0xff]  ;;  %v293_v59 = vld [vmem:[%s1410_s28 + $0x398] sm:$0xff] }
  0x23   : > { %214 = vst [vmem:[%s1415_s29 + $0x98] sm:$0xff] %v213_v19  ;;  %v295_v60 = vld [vmem:[%s1410_s28 + $0x3c0] sm:$0xff]  ;;  %v297_v61 = vld [vmem:[%s1410_s28 + $0x3c8] sm:$0xff]  ;;  %v299_v62 = vld [vmem:[%s1410_s28 + $0x3d0] sm:$0xff] }
  0x24   : > { %216 = vst [vmem:[%s1415_s29 + $0xa0] sm:$0xff] %v215_v20  ;;  %v301_v63 = vld [vmem:[%s1410_s28 + $0x3d8] sm:$0xff] }
  0x25   : > { %218 = vst [vmem:[%s1415_s29 + $0xa8] sm:$0xff] %v217_v21 }
  0x26   : > { %220 = vst [vmem:[%s1415_s29 + $0xb0] sm:$0xff] %v219_v22 }
  0x27   : > { %222 = vst [vmem:[%s1415_s29 + $0xb8] sm:$0xff] %v221_v23 }
  0x28   : > { %224 = vst [vmem:[%s1415_s29 + $0xc0] sm:$0xff] %v223_v24 }
  0x29   : > { %226 = vst [vmem:[%s1415_s29 + $0xc8] sm:$0xff] %v225_v25 }
  0x2a   : > { %228 = vst [vmem:[%s1415_s29 + $0xd0] sm:$0xff] %v227_v26 }
  0x2b   : > { %230 = vst [vmem:[%s1415_s29 + $0xd8] sm:$0xff] %v229_v27 }
  0x2c   : > { %232 = vst [vmem:[%s1415_s29 + $0xe0] sm:$0xff] %v231_v28 }
  0x2d   : > { %234 = vst [vmem:[%s1415_s29 + $0xe8] sm:$0xff] %v233_v29 }
  0x2e   : > { %236 = vst [vmem:[%s1415_s29 + $0xf0] sm:$0xff] %v235_v30 }
  0x2f   : > { %238 = vst [vmem:[%s1415_s29 + $0xf8] sm:$0xff] %v237_v31 }
  0x30   : > { %240 = vst [vmem:[%s1415_s29 + $0x100] sm:$0xff] %v239_v32 }
  0x31   : > { %242 = vst [vmem:[%s1415_s29 + $0x108] sm:$0xff] %v241_v33 }
  0x32   : > { %244 = vst [vmem:[%s1415_s29 + $0x110] sm:$0xff] %v243_v34 }
  0x33   : > { %246 = vst [vmem:[%s1415_s29 + $0x118] sm:$0xff] %v245_v35 }
  0x34   : > { %248 = vst [vmem:[%s1415_s29 + $0x120] sm:$0xff] %v247_v36 }
  0x35   : > { %250 = vst [vmem:[%s1415_s29 + $0x128] sm:$0xff] %v249_v37 }
  0x36   : > { %252 = vst [vmem:[%s1415_s29 + $0x130] sm:$0xff] %v251_v38 }
  0x37   : > { %254 = vst [vmem:[%s1415_s29 + $0x138] sm:$0xff] %v253_v39 }
  0x38   : > { %256 = vst [vmem:[%s1415_s29 + $0x140] sm:$0xff] %v255_v40 }
  0x39   : > { %258 = vst [vmem:[%s1415_s29 + $0x148] sm:$0xff] %v257_v41 }
  0x3a   : > { %260 = vst [vmem:[%s1415_s29 + $0x150] sm:$0xff] %v259_v42 }
  0x3b   : > { %262 = vst [vmem:[%s1415_s29 + $0x158] sm:$0xff] %v261_v43 }
  0x3c   : > { %264 = vst [vmem:[%s1415_s29 + $0x160] sm:$0xff] %v263_v44 }
  0x3d   : > { %266 = vst [vmem:[%s1415_s29 + $0x168] sm:$0xff] %v265_v45 }
  0x3e   : > { %268 = vst [vmem:[%s1415_s29 + $0x170] sm:$0xff] %v267_v46 }
  0x3f   : > { %270 = vst [vmem:[%s1415_s29 + $0x178] sm:$0xff] %v269_v47 }
  0x40   : > { %272 = vst [vmem:[%s1415_s29 + $0x180] sm:$0xff] %v271_v48 }
  0x41   : > { %274 = vst [vmem:[%s1415_s29 + $0x188] sm:$0xff] %v273_v49 }
  0x42   : > { %276 = vst [vmem:[%s1415_s29 + $0x190] sm:$0xff] %v275_v50 }
  0x43   : > { %278 = vst [vmem:[%s1415_s29 + $0x198] sm:$0xff] %v277_v51 }
  0x44   : > { %280 = vst [vmem:[%s1415_s29 + $0x1a0] sm:$0xff] %v279_v52 }
  0x45   : > { %282 = vst [vmem:[%s1415_s29 + $0x1a8] sm:$0xff] %v281_v53 }
  0x46   : > { %284 = vst [vmem:[%s1415_s29 + $0x1b0] sm:$0xff] %v283_v54 }
  0x47   : > { %286 = vst [vmem:[%s1415_s29 + $0x1b8] sm:$0xff] %v285_v55 }
  0x48   : > { %288 = vst [vmem:[%s1415_s29 + $0x1c0] sm:$0xff] %v287_v56 }
  0x49   : > { %290 = vst [vmem:[%s1415_s29 + $0x1c8] sm:$0xff] %v289_v57 }
  0x4a   : > { %292 = vst [vmem:[%s1415_s29 + $0x1d0] sm:$0xff] %v291_v58 }
  0x4b   : > { %294 = vst [vmem:[%s1415_s29 + $0x1d8] sm:$0xff] %v293_v59 }
  0x4c   : > { %296 = vst [vmem:[%s1415_s29 + $0x1e0] sm:$0xff] %v295_v60 }
  0x4d   : > { %298 = vst [vmem:[%s1415_s29 + $0x1e8] sm:$0xff] %v297_v61 }
  0x4e   : > { %300 = vst [vmem:[%s1415_s29 + $0x1f0] sm:$0xff] %v299_v62 }
  0x4f   : > { %302 = vst [vmem:[%s1415_s29 + $0x1f8] sm:$0xff] %v301_v63 }
  0x50 PF: > { %p968_p5 = scmp.ge.s32.totalorder %s1348_s17, 1  ;;  %p307_p6 = scmp.lt.s32.totalorder %s1348_s17, 3 }
  0x52   : > { %p308_p7 = pnand %p968_p5, %p307_p6 }
  0x53   : > { %s314_s6 = sand.u32 (!%p308_p7), 1, %s1340_s15   ;;  %s970_s13 = sshll.u32 (!%p308_p7), %s961_s18, 3 }
  0x54   : > { %311 = sbr.rel (%p308_p7) target bundleno = 380 (0x17c), region = 55  ;;  %s969_s7 = sshll.u32 (!%p308_p7), %s314_s6, 9 }
  0x55   : > { %s1551_s10 = scalar_lea.vmem (!%p308_p7), [#allocation2], %s969_s7  ;;  %p340_p8 = scmp.lt.s32.totalorder (!%p308_p7), %s970_s13, 15 }
  0x59   : > { %v1235_v0 = vld [vmem:[%s1702_s1] sm:$0xff]  ;;  %vm354_vm0 = vcmask 130048   ;;  %v1210_v7 = vld [vmem:[%s1551_s10 + $0x1c8] sm:$0xf]  ;;  %v1293_v11 = vld [vmem:[%s1551_s10 + $0x1cc] sm:$0xf] }
  0x5a   : > { %365 = vmatpush.bf16.msra.mxu0 %v1235_v0  ;;  %v345_v1 = vld [vmem:[%s1701_s0] sm:$0x1]  ;;  %v1292_v4 = vld [vmem:[%s1551_s10 + $0x1c4] sm:$0xf]  ;;  %v1297_v8 = vld [vmem:[%s1551_s10 + $0x1e4] sm:$0xf0] }
  0x5b   : > { %v1202_v2 = vld [vmem:[%s1551_s10 + $0x1c0] sm:$0xf]  ;;  %v1204_v6 = vld [vmem:[%s1551_s10 + $0x1e0] sm:$0xf0]  ;;  %v1211_v10 = vor.u32 %v1297_v8, %v1210_v7  ;;  %v1212_v12 = vld [vmem:[%s1551_s10 + $0x1e8] sm:$0xf0] }
  0x5c   : > { %v1296_v3 = vld [vmem:[%s1551_s10 + $0x1dc] sm:$0xf0]  ;;  %v1207_v9 = vor.u32 %v1292_v4, %v1204_v6  ;;  %v1215_v14 = vor.u32 %v1293_v11, %v1212_v12  ;;  %v1284_v16 = vld [vmem:[%s1551_s10 + $0x184] sm:$0xf]  ;;  %v1178_v20 = vld [vmem:[%s1551_s10 + $0x188] sm:$0xf] }
  0x5d   : > { %v1203_v5 = vor.u32 %v1296_v3, %v1202_v2  ;;  %975 = vmatmul.msk.bf16.vlgmr.msra.gmra.mxu0 %vm354_vm0, %v345_v1  ;;  %v1170_v13 = vld [vmem:[%s1551_s10 + $0x180] sm:$0xf]  ;;  %v1172_v17 = vld [vmem:[%s1551_s10 + $0x1a0] sm:$0xf0]  ;;  %788 = vmatpush.bf16.msra.mxu3 %v1211_v10  ;;  %v1289_v21 = vld [vmem:[%s1551_s10 + $0x1a4] sm:$0xf0] }
  0x5e   : > { %v1288_v15 = vld [vmem:[%s1551_s10 + $0x19c] sm:$0xf0]  ;;  %775 = vmatpush.bf16.msra.mxu2 %v1207_v9  ;;  %v1175_v19 = vor.u32 %v1284_v16, %v1172_v17  ;;  %v1285_v22 = vld [vmem:[%s1551_s10 + $0x18c] sm:$0xf]  ;;  %801 = vmatpush.bf16.msrb.mxu0 %v1215_v14  ;;  %v1179_v23 = vor.u32 %v1289_v21, %v1178_v20  ;;  %v1276_v28 = vld [vmem:[%s1551_s10 + $0x144] sm:$0xf] }
  0x5f   : > { %762 = vmatpush.bf16.msra.mxu1 %v1203_v5  ;;  %v1171_v18 = vor.u32 %v1288_v15, %v1170_v13  ;;  %v1180_v24 = vld [vmem:[%s1551_s10 + $0x1a8] sm:$0xf0]  ;;  %v1138_v25 = vld [vmem:[%s1551_s10 + $0x140] sm:$0xf]  ;;  %v1140_v29 = vld [vmem:[%s1551_s10 + $0x160] sm:$0xf0] }
  0x60   : > { %v1280_v26 = vld [vmem:[%s1551_s10 + $0x15c] sm:$0xf0]  ;;  %v1183_v27 = vor.u32 %v1285_v22, %v1180_v24  ;;  %v1146_v30 = vld [vmem:[%s1551_s10 + $0x148] sm:$0xf]  ;;  %v1277_v33 = vld [vmem:[%s1551_s10 + $0x14c] sm:$0xf]  ;;  %v1143_v35 = vor.u32 %v1276_v28, %v1140_v29 }
  0x61   : > { %v1139_v31 = vor.u32 %v1280_v26, %v1138_v25  ;;  %v1281_v32 = vld [vmem:[%s1551_s10 + $0x164] sm:$0xf0]  ;;  %v1148_v34 = vld [vmem:[%s1551_s10 + $0x168] sm:$0xf0]  ;;  %789 = vmatpush.bf16.msra.mxu3 %v1179_v23  ;;  %v1106_v37 = vld [vmem:[%s1551_s10 + $0x100] sm:$0xf] }
  0x62   : > { %776 = vmatpush.bf16.msra.mxu2 %v1175_v19  ;;  %v1147_v36 = vor.u32 %v1281_v32, %v1146_v30  ;;  %v1272_v38 = vld [vmem:[%s1551_s10 + $0x11c] sm:$0xf0]  ;;  %v1268_v39 = vld [vmem:[%s1551_s10 + $0x104] sm:$0xf]  ;;  %802 = vmatpush.bf16.msrb.mxu0 %v1183_v27  ;;  %v1151_v40 = vor.u32 %v1277_v33, %v1148_v34  ;;  %v1114_v42 = vld [vmem:[%s1551_s10 + $0x108] sm:$0xf] }
  0x63   : > { %763 = vmatpush.bf16.msra.mxu1 %v1171_v18  ;;  %v1108_v41 = vld [vmem:[%s1551_s10 + $0x120] sm:$0xf0]  ;;  %v1273_v43 = vld [vmem:[%s1551_s10 + $0x124] sm:$0xf0]  ;;  %v1269_v44 = vld [vmem:[%s1551_s10 + $0x10c] sm:$0xf]  ;;  %v1107_v46 = vor.u32 %v1272_v38, %v1106_v37 }
  0x64   : > { %v1116_v45 = vld [vmem:[%s1551_s10 + $0x128] sm:$0xf0]  ;;  %v1111_v47 = vor.u32 %v1268_v39, %v1108_v41  ;;  %v1115_v48 = vor.u32 %v1273_v43, %v1114_v42  ;;  %v1074_v49 = vld [vmem:[%s1551_s10 + $0xc0] sm:$0xf]  ;;  %v1260_v51 = vld [vmem:[%s1551_s10 + $0xc4] sm:$0xf] }
  0x65   : > { %790 = vmatpush.bf16.msra.mxu3 %v1147_v36  ;;  %v1264_v50 = vld [vmem:[%s1551_s10 + $0xdc] sm:$0xf0]  ;;  %v1119_v52 = vor.u32 %v1269_v44, %v1116_v45  ;;  %v1076_v53 = vld [vmem:[%s1551_s10 + $0xe0] sm:$0xf0]  ;;  %v1082_v54 = vld [vmem:[%s1551_s10 + $0xc8] sm:$0xf] }
  0x66   : > { %777 = vmatpush.bf16.msra.mxu2 %v1143_v35  ;;  %803 = vmatpush.bf16.msrb.mxu0 %v1151_v40  ;;  %v1265_v55 = vld [vmem:[%s1551_s10 + $0xe4] sm:$0xf0]  ;;  %v1261_v56 = vld [vmem:[%s1551_s10 + $0xcc] sm:$0xf]  ;;  %v1075_v58 = vor.u32 %v1264_v50, %v1074_v49  ;;  %v1079_v59 = vor.u32 %v1260_v51, %v1076_v53  ;;  %v1042_v61 = vld [vmem:[%s1551_s10 + $0x80] sm:$0xf] }
  0x67   : > { %764 = vmatpush.bf16.msra.mxu1 %v1139_v31  ;;  %v1084_v57 = vld [vmem:[%s1551_s10 + $0xe8] sm:$0xf0]  ;;  %v1083_v60 = vor.u32 %v1265_v55, %v1082_v54  ;;  %v1256_v62 = vld [vmem:[%s1551_s10 + $0x9c] sm:$0xf0]  ;;  %v1252_v63 = vld [vmem:[%s1551_s10 + $0x84] sm:$0xf] }
  0x68   : > { %v1087_v0 = vor.u32 %v1261_v56, %v1084_v57  ;;  %v1044_v1 = vld [vmem:[%s1551_s10 + $0xa0] sm:$0xf0]  ;;  %v1050_v2 = vld [vmem:[%s1551_s10 + $0x88] sm:$0xf]  ;;  %v1253_v4 = vld [vmem:[%s1551_s10 + $0x8c] sm:$0xf]  ;;  %v1043_v6 = vor.u32 %v1256_v62, %v1042_v61 }
  0x69   : > { %791 = vmatpush.bf16.msra.mxu3 %v1115_v48  ;;  %v1257_v3 = vld [vmem:[%s1551_s10 + $0xa4] sm:$0xf0]  ;;  %v1052_v5 = vld [vmem:[%s1551_s10 + $0xa8] sm:$0xf0]  ;;  %v1047_v7 = vor.u32 %v1252_v63, %v1044_v1  ;;  %v1010_v9 = vld [vmem:[%s1551_s10 + $0x40] sm:$0xf] }
  0x6a   : > { %778 = vmatpush.bf16.msra.mxu2 %v1111_v47  ;;  %804 = vmatpush.bf16.msrb.mxu0 %v1119_v52  ;;  %v1051_v8 = vor.u32 %v1257_v3, %v1050_v2  ;;  %v1248_v10 = vld [vmem:[%s1551_s10 + $0x5c] sm:$0xf0]  ;;  %v1244_v11 = vld [vmem:[%s1551_s10 + $0x44] sm:$0xf]  ;;  %v1055_v12 = vor.u32 %v1253_v4, %v1052_v5  ;;  %v1018_v14 = vld [vmem:[%s1551_s10 + $0x48] sm:$0xf] }
  0x6b   : > { %765 = vmatpush.bf16.msra.mxu1 %v1107_v46  ;;  %v1012_v13 = vld [vmem:[%s1551_s10 + $0x60] sm:$0xf0]  ;;  %v1249_v15 = vld [vmem:[%s1551_s10 + $0x64] sm:$0xf0]  ;;  %v1245_v16 = vld [vmem:[%s1551_s10 + $0x4c] sm:$0xf]  ;;  %v1011_v18 = vor.u32 %v1248_v10, %v1010_v9 }
  0x6c   : > { %v1020_v17 = vld [vmem:[%s1551_s10 + $0x68] sm:$0xf0]  ;;  %v978_v19 = vld [vmem:[%s1551_s10] sm:$0xf]  ;;  %v1015_v21 = vor.u32 %v1244_v11, %v1012_v13  ;;  %v1019_v22 = vor.u32 %v1249_v15, %v1018_v14  ;;  %v1236_v23 = vld [vmem:[%s1551_s10 + $0x4] sm:$0xf] }
  0x6d   : > { %792 = vmatpush.bf16.msra.mxu3 %v1083_v60  ;;  %v1240_v20 = vld [vmem:[%s1551_s10 + $0x1c] sm:$0xf0]  ;;  %v980_v24 = vld [vmem:[%s1551_s10 + $0x20] sm:$0xf0]  ;;  %v986_v25 = vld [vmem:[%s1551_s10 + $0x8] sm:$0xf]  ;;  %v1023_v26 = vor.u32 %v1245_v16, %v1020_v17 }
  0x6e   : > { %779 = vmatpush.bf16.msra.mxu2 %v1079_v59  ;;  %805 = vmatpush.bf16.msrb.mxu0 %v1087_v0  ;;  %v1241_v27 = vld [vmem:[%s1551_s10 + $0x24] sm:$0xf0]  ;;  %v1237_v28 = vld [vmem:[%s1551_s10 + $0xc] sm:$0xf]  ;;  %v1218_v30 = vld [vmem:[%s1551_s10 + $0x1d0] sm:$0xf]  ;;  %v979_v33 = vor.u32 %v1240_v20, %v978_v19  ;;  %v983_v37 = vor.u32 %v1236_v23, %v980_v24 }
  0x6f   : > { %766 = vmatpush.bf16.msra.mxu1 %v1075_v58  ;;  %v988_v29 = vld [vmem:[%s1551_s10 + $0x28] sm:$0xf0]  ;;  %v1298_v31 = vld [vmem:[%s1551_s10 + $0x1ec] sm:$0xf0]  ;;  %v1294_v32 = vld [vmem:[%s1551_s10 + $0x1d4] sm:$0xf]  ;;  %v987_v38 = vor.u32 %v1241_v27, %v986_v25 }
  0x70   : > { %v1220_v34 = vld [vmem:[%s1551_s10 + $0x1f0] sm:$0xf0]  ;;  %v1226_v35 = vld [vmem:[%s1551_s10 + $0x1d8] sm:$0xf]  ;;  %v1295_v39 = vld [vmem:[%s1551_s10 + $0x1dc] sm:$0xf]  ;;  %v991_v41 = vor.u32 %v1237_v28, %v988_v29  ;;  %v1219_v42 = vor.u32 %v1298_v31, %v1218_v30 }
  0x71   : > { %793 = vmatpush.bf16.msra.mxu3 %v1051_v8  ;;  %v1299_v36 = vld [vmem:[%s1551_s10 + $0x1f4] sm:$0xf0]  ;;  %v1228_v40 = vld [vmem:[%s1551_s10 + $0x1f8] sm:$0xf0]  ;;  %v1223_v43 = vor.u32 %v1294_v32, %v1220_v34  ;;  %v1186_v45 = vld [vmem:[%s1551_s10 + $0x190] sm:$0xf] }
  0x72   : > { %780 = vmatpush.bf16.msra.mxu2 %v1047_v7  ;;  %806 = vmatpush.bf16.msrb.mxu0 %v1055_v12  ;;  %v1227_v44 = vor.u32 %v1299_v36, %v1226_v35  ;;  %v1290_v46 = vld [vmem:[%s1551_s10 + $0x1ac] sm:$0xf0]  ;;  %v1286_v47 = vld [vmem:[%s1551_s10 + $0x194] sm:$0xf]  ;;  %v1231_v48 = vor.u32 %v1295_v39, %v1228_v40  ;;  %v1194_v50 = vld [vmem:[%s1551_s10 + $0x198] sm:$0xf] }
  0x73   : > { %767 = vmatpush.bf16.msra.mxu1 %v1043_v6  ;;  %v1188_v49 = vld [vmem:[%s1551_s10 + $0x1b0] sm:$0xf0]  ;;  %v1291_v51 = vld [vmem:[%s1551_s10 + $0x1b4] sm:$0xf0]  ;;  %v1287_v52 = vld [vmem:[%s1551_s10 + $0x19c] sm:$0xf]  ;;  %v1187_v54 = vor.u32 %v1290_v46, %v1186_v45 }
  0x74   : > { %v1196_v53 = vld [vmem:[%s1551_s10 + $0x1b8] sm:$0xf0]  ;;  %v1191_v55 = vor.u32 %v1286_v47, %v1188_v49  ;;  %v1195_v56 = vor.u32 %v1291_v51, %v1194_v50  ;;  %v1154_v57 = vld [vmem:[%s1551_s10 + $0x150] sm:$0xf]  ;;  %v1278_v59 = vld [vmem:[%s1551_s10 + $0x154] sm:$0xf] }
  0x75   : > { %794 = vmatpush.bf16.msra.mxu3 %v1019_v22  ;;  %v1282_v58 = vld [vmem:[%s1551_s10 + $0x16c] sm:$0xf0]  ;;  %v1199_v60 = vor.u32 %v1287_v52, %v1196_v53  ;;  %v1156_v61 = vld [vmem:[%s1551_s10 + $0x170] sm:$0xf0]  ;;  %v1162_v62 = vld [vmem:[%s1551_s10 + $0x158] sm:$0xf] }
  0x76   : > { %781 = vmatpush.bf16.msra.mxu2 %v1015_v21  ;;  %807 = vmatpush.bf16.msrb.mxu0 %v1023_v26  ;;  %v1283_v63 = vld [vmem:[%s1551_s10 + $0x174] sm:$0xf0]  ;;  %v1279_v0 = vld [vmem:[%s1551_s10 + $0x15c] sm:$0xf]  ;;  %v1155_v2 = vor.u32 %v1282_v58, %v1154_v57  ;;  %v1159_v3 = vor.u32 %v1278_v59, %v1156_v61  ;;  %v1122_v6 = vld [vmem:[%s1551_s10 + $0x110] sm:$0xf] }
  0x77   : > { %768 = vmatpush.bf16.msra.mxu1 %v1011_v18  ;;  %v1164_v1 = vld [vmem:[%s1551_s10 + $0x178] sm:$0xf0]  ;;  %v1163_v4 = vor.u32 %v1283_v63, %v1162_v62  ;;  %v1274_v7 = vld [vmem:[%s1551_s10 + $0x12c] sm:$0xf0]  ;;  %v1270_v8 = vld [vmem:[%s1551_s10 + $0x114] sm:$0xf] }
  0x78   : > { %v1167_v5 = vor.u32 %v1279_v0, %v1164_v1  ;;  %v1123_v9 = vor.u32 %v1274_v7, %v1122_v6  ;;  %v1124_v10 = vld [vmem:[%s1551_s10 + $0x130] sm:$0xf0]  ;;  %v1130_v11 = vld [vmem:[%s1551_s10 + $0x118] sm:$0xf]  ;;  %v1271_v15 = vld [vmem:[%s1551_s10 + $0x11c] sm:$0xf] }
  0x79   : > { %795 = vmatpush.bf16.msra.mxu3 %v987_v38  ;;  %v1275_v12 = vld [vmem:[%s1551_s10 + $0x134] sm:$0xf0]  ;;  %v1127_v13 = vor.u32 %v1270_v8, %v1124_v10  ;;  %v1132_v16 = vld [vmem:[%s1551_s10 + $0x138] sm:$0xf0]  ;;  %v1090_v18 = vld [vmem:[%s1551_s10 + $0xd0] sm:$0xf] }
  0x7a   : > { %782 = vmatpush.bf16.msra.mxu2 %v983_v37  ;;  %808 = vmatpush.bf16.msrb.mxu0 %v991_v41  ;;  %v1131_v14 = vor.u32 %v1275_v12, %v1130_v11  ;;  %v1135_v17 = vor.u32 %v1271_v15, %v1132_v16  ;;  %v1266_v19 = vld [vmem:[%s1551_s10 + $0xec] sm:$0xf0]  ;;  %v1262_v20 = vld [vmem:[%s1551_s10 + $0xd4] sm:$0xf]  ;;  %v1098_v23 = vld [vmem:[%s1551_s10 + $0xd8] sm:$0xf] }
  0x7b   : > { %769 = vmatpush.bf16.msra.mxu1 %v979_v33  ;;  %v1091_v21 = vor.u32 %v1266_v19, %v1090_v18  ;;  %v1092_v22 = vld [vmem:[%s1551_s10 + $0xf0] sm:$0xf0]  ;;  %v1267_v24 = vld [vmem:[%s1551_s10 + $0xf4] sm:$0xf0]  ;;  %v1263_v27 = vld [vmem:[%s1551_s10 + $0xdc] sm:$0xf] }
  0x7c   : > { %v1095_v25 = vor.u32 %v1262_v20, %v1092_v22  ;;  %v1099_v26 = vor.u32 %v1267_v24, %v1098_v23  ;;  %v1100_v28 = vld [vmem:[%s1551_s10 + $0xf8] sm:$0xf0]  ;;  %v1058_v30 = vld [vmem:[%s1551_s10 + $0x90] sm:$0xf]  ;;  %v1254_v32 = vld [vmem:[%s1551_s10 + $0x94] sm:$0xf] }
  0x7d   : > { %840 = vmatpush.bf16.msrb.mxu3 %v1227_v44  ;;  %v1103_v29 = vor.u32 %v1263_v27, %v1100_v28  ;;  %v1258_v31 = vld [vmem:[%s1551_s10 + $0xac] sm:$0xf0]  ;;  %v1060_v34 = vld [vmem:[%s1551_s10 + $0xb0] sm:$0xf0]  ;;  %v1066_v35 = vld [vmem:[%s1551_s10 + $0x98] sm:$0xf] }
  0x7e   : > { %827 = vmatpush.bf16.msrb.mxu2 %v1223_v43  ;;  %853 = vmatpush.bf16.msra.mxu0 %v1231_v48  ;;  %v1059_v33 = vor.u32 %v1258_v31, %v1058_v30  ;;  %v1259_v36 = vld [vmem:[%s1551_s10 + $0xb4] sm:$0xf0]  ;;  %v1063_v37 = vor.u32 %v1254_v32, %v1060_v34  ;;  %v1255_v39 = vld [vmem:[%s1551_s10 + $0x9c] sm:$0xf]  ;;  %v1026_v41 = vld [vmem:[%s1551_s10 + $0x50] sm:$0xf] }
  0x7f   : > { %814 = vmatpush.bf16.msrb.mxu1 %v1219_v42  ;;  %v1067_v38 = vor.u32 %v1259_v36, %v1066_v35  ;;  %v1068_v40 = vld [vmem:[%s1551_s10 + $0xb8] sm:$0xf0]  ;;  %v1250_v43 = vld [vmem:[%s1551_s10 + $0x6c] sm:$0xf0]  ;;  %v1246_v44 = vld [vmem:[%s1551_s10 + $0x54] sm:$0xf] }
  0x80   : > { %v1071_v42 = vor.u32 %v1255_v39, %v1068_v40  ;;  %v1028_v45 = vld [vmem:[%s1551_s10 + $0x70] sm:$0xf0]  ;;  %v1027_v46 = vor.u32 %v1250_v43, %v1026_v41  ;;  %v1034_v48 = vld [vmem:[%s1551_s10 + $0x58] sm:$0xf]  ;;  %v1247_v50 = vld [vmem:[%s1551_s10 + $0x5c] sm:$0xf] }
  0x81   : > { %841 = vmatpush.bf16.msrb.mxu3 %v1195_v56  ;;  %v1031_v47 = vor.u32 %v1246_v44, %v1028_v45  ;;  %v1251_v49 = vld [vmem:[%s1551_s10 + $0x74] sm:$0xf0]  ;;  %v1036_v52 = vld [vmem:[%s1551_s10 + $0x78] sm:$0xf0]  ;;  %v436_v53 = vld [vmem:[%s1704_s3] sm:$0x3] }
  0x82   : > { %828 = vmatpush.bf16.msrb.mxu2 %v1191_v55  ;;  %854 = vmatpush.bf16.msra.mxu0 %v1199_v60  ;;  %v1035_v51 = vor.u32 %v1251_v49, %v1034_v48  ;;  %v1350_v55 = vmov 0   ;;  %v994_v56 = vld [vmem:[%s1551_s10 + $0x10] sm:$0xf]  ;;  %v1238_v58 = vld [vmem:[%s1551_s10 + $0x14] sm:$0xf]  ;;  %vm881_vm1 = vcmask 1040384  }
  0x83   : > { %815 = vmatpush.bf16.msrb.mxu1 %v1187_v54  ;;  %v1039_v54 = vor.u32 %v1247_v50, %v1036_v52  ;;  %1325 = vset.pattern.permute.xlu0 %v1350_v55  ;;  %v1242_v57 = vld [vmem:[%s1551_s10 + $0x2c] sm:$0xf0]  ;;  %v996_v60 = vld [vmem:[%s1551_s10 + $0x30] sm:$0xf0]  ;;  %v1002_v61 = vld [vmem:[%s1551_s10 + $0x18] sm:$0xf] }
  0x84   : > { %439 = vperm.xlu0 %1325, %v436_v53   ;;  %v995_v59 = vor.u32 %v1242_v57, %v994_v56  ;;  %v1243_v62 = vld [vmem:[%s1551_s10 + $0x34] sm:$0xf0]  ;;  %v999_v63 = vor.u32 %v1238_v58, %v996_v60  ;;  %v1239_v1 = vld [vmem:[%s1551_s10 + $0x1c] sm:$0xf]  ;;  %vm885_vm2 = vcmask 1042434   ;;  %vm889_vm3 = vcmask 1041408  }
  0x85   : > { %842 = vmatpush.bf16.msrb.mxu3 %v1163_v4  ;;  %v1003_v0 = vor.u32 %v1243_v62, %v1002_v61  ;;  %vm891_vm4 = vcmask 1044484   ;;  %s1710_s13 = smov (!%p340_p8, %s970_s13), 15  ;;  %vm895_vm5 = vcmask 1046534   ;;  %vm899_vm6 = vcmask 1045508  }
  0x86   : > { %829 = vmatpush.bf16.msrb.mxu2 %v1159_v3  ;;  %855 = vmatpush.bf16.msra.mxu0 %v1167_v5  ;;  %vm901_vm7 = vcmask 1043456   ;;  %s342_s17 = scalar_lea.vmem %s1705_s4, %s1710_s13 }
  0x87   : > { %816 = vmatpush.bf16.msrb.mxu1 %v1155_v2  ;;  %v1004_v2 = vld [vmem:[%s1551_s10 + $0x38] sm:$0xf0] }
  0x88   : > { %v1007_v3 = vor.u32 %v1239_v1, %v1004_v2 }
  0x89   : > { %843 = vmatpush.bf16.msrb.mxu3 %v1131_v14 }
  0x8a   : > { %830 = vmatpush.bf16.msrb.mxu2 %v1127_v13  ;;  %856 = vmatpush.bf16.msra.mxu0 %v1135_v17 }
  0x8b   : > { %817 = vmatpush.bf16.msrb.mxu1 %v1123_v9 }
  0x8d   : > { %844 = vmatpush.bf16.msrb.mxu3 %v1099_v26 }
  0x8e   : > { %831 = vmatpush.bf16.msrb.mxu2 %v1095_v25  ;;  %857 = vmatpush.bf16.msra.mxu0 %v1103_v29 }
  0x8f   : > { %818 = vmatpush.bf16.msrb.mxu1 %v1091_v21 }
  0x91   : > { %845 = vmatpush.bf16.msrb.mxu3 %v1067_v38 }
  0x92   : > { %832 = vmatpush.bf16.msrb.mxu2 %v1063_v37  ;;  %858 = vmatpush.bf16.msra.mxu0 %v1071_v42 }
  0x93   : > { %819 = vmatpush.bf16.msrb.mxu1 %v1059_v33 }
  0x95   : > { %846 = vmatpush.bf16.msrb.mxu3 %v1035_v51 }
  0x96   : > { %833 = vmatpush.bf16.msrb.mxu2 %v1031_v47  ;;  %859 = vmatpush.bf16.msra.mxu0 %v1039_v54 }
  0x97   : > { %820 = vmatpush.bf16.msrb.mxu1 %v1027_v46 }
  0x99   : > { %847 = vmatpush.bf16.msrb.mxu3 %v1003_v0 }
  0x9a   : > { %834 = vmatpush.bf16.msrb.mxu2 %v999_v63  ;;  %860 = vmatpush.bf16.msra.mxu0 %v1007_v3 }
  0x9b   : > { %821 = vmatpush.bf16.msrb.mxu1 %v995_v59 }
  0xda   : > { %v367_v4 = vpop.f32.mrf.mxu0 }
  0xdb   : > { %v371_v5 = vpack.c.bf16 %v367_v4, %v367_v4 }
  0xdd   : > { %770 = vmatmul.bf16.vlgmr.msra.gmra.mxu1 %v371_v5  ;;  %783 = vmatmul.bf16.vlgmr.msra.gmra.mxu2 %v371_v5 }
  0xde   : > { %796 = vmatmul.bf16.vlgmr.msra.gmra.mxu3 %v371_v5  ;;  %809 = vmatmul.bf16.vlgmr.msrb.gmra.mxu0 %v371_v5 }
  0xe2   : > { %v369_v6 = vpop.f32.mrf.mxu0 }
  0xed   : > { %822 = vmatmul.bf16.vlgmr.msrb.gmra.mxu1 %v371_v5  ;;  %835 = vmatmul.bf16.vlgmr.msrb.gmra.mxu2 %v371_v5 }
  0xee   : > { %848 = vmatmul.bf16.vlgmr.msrb.gmra.mxu3 %v371_v5  ;;  %861 = vmatmul.bf16.vlgmr.msra.gmra.mxu0 %v371_v5 }
  0xf6   : > { %v440_v13 = vpop.permute.xlu0 %439 }
 0x15a   : > { %v771_v7 = vpop.f32.mrf.mxu1 }
 0x15b   : > { %v810_v8 = vpop.f32.mrf.mxu0  ;;  %v772_v19 = vadd.f32 %v771_v7, %v440_v13 }
 0x15c   : > { %v811_v21 = vadd.f32 %v810_v8, %v440_v13 }
 0x160   : > { %v784_v9 = vpop.f32.mrf.mxu2 }
 0x161   : > { %v797_v10 = vpop.f32.mrf.mxu3  ;;  %v785_v15 = vadd.f32 %v784_v9, %v440_v13 }
 0x162   : > { %v773_v11 = vpop.f32.mrf.mxu1  ;;  %v798_v17 = vadd.f32 %v797_v10, %v440_v13 }
 0x163   : > { %v812_v12 = vpop.f32.mrf.mxu0  ;;  %v866_v22 = vpack.c.bf16 %v785_v15, %v772_v19 }
 0x164   : > { %v867_v23 = vpack.c.bf16 %v811_v21, %v798_v17 }
 0x165   : > { %v874_v25 = vrot.slane %v866_v22, 3 }
 0x166   : > { %v875_v29 = vrot.slane %v867_v23, 6  ;;  %v876_v30 = vrot.slane %v867_v23, 1 }
 0x167   : > { %v884_v39 = vsel %vm881_vm1, %v866_v22, %v874_v25 }
 0x168   : > { %v786_v14 = vpop.f32.mrf.mxu2  ;;  %v888_v40 = vsel %vm885_vm2, %v875_v29, %v876_v30 }
 0x169   : > { %v799_v16 = vpop.f32.mrf.mxu3  ;;  %v890_v46 = vsel %vm889_vm3, %v884_v39, %v888_v40 }
 0x16a   : > { %v823_v18 = vpop.f32.mrf.mxu1 }
 0x16b   : > { %v862_v20 = vpop.f32.mrf.mxu0  ;;  %v824_v26 = vadd.f32 %v823_v18, %v440_v13 }
 0x16c   : > { %v863_v31 = vadd.f32 %v862_v20, %v440_v13 }
 0x170   : > { %v836_v24 = vpop.f32.mrf.mxu2 }
 0x171   : > { %v837_v27 = vadd.f32 %v836_v24, %v440_v13  ;;  %v849_v28 = vpop.f32.mrf.mxu3 }
 0x172   : > { %v850_v32 = vadd.f32 %v849_v28, %v440_v13  ;;  %v825_v33 = vpop.f32.mrf.mxu1 }
 0x173   : > { %v868_v34 = vpack.c.bf16 %v837_v27, %v824_v26  ;;  %v864_v35 = vpop.f32.mrf.mxu0 }
 0x174   : > { %v869_v36 = vpack.c.bf16 %v863_v31, %v850_v32 }
 0x175   : > { %v877_v37 = vrot.slane %v868_v34, 4  ;;  %v878_v38 = vrot.slane %v868_v34, 7 }
 0x176   : > { %v879_v41 = vrot.slane %v869_v36, 2  ;;  %v880_v42 = vrot.slane %v869_v36, 5 }
 0x177   : > { %v894_v43 = vsel %vm891_vm4, %v877_v37, %v878_v38 }
 0x178   : > { %v898_v44 = vsel %vm895_vm5, %v879_v41, %v880_v42  ;;  %v838_v45 = vpop.f32.mrf.mxu2 }
 0x179   : > { %v900_v47 = vsel %vm899_vm6, %v894_v43, %v898_v44  ;;  %v851_v48 = vpop.f32.mrf.mxu3 }
 0x17a   : > { %v902_v49 = vsel %vm901_vm7, %v890_v46, %v900_v47 }
 0x17b   : > { %904 = vst [vmem:[%s342_s17] sm:$0xff] %v902_v49 }
 0x17c PF: > { %p11_p9 = scmp.ge.s32.totalorder %s1393_s19, 4   ;;  %s1706_s15 = smov %s1344_s16 }
 0x17d   : > { %s1707_s16 = smov %s1402_s22  ;;  %s1708_s17 = smov %s1393_s19 }
 0x17e   :  { %13 = sbr.rel (!%p11_p9) target bundleno = 2 (0x2), region = 94 }

// kernel: deeplabv3plus_lstm_forward.13
= control target key start
LH: loop header
LB: loop body
LE: loop exit
PB: predicated region body
PF: predicated region fallthrough
CT: control target
= control target key end

     0   :  { %s1598_s24 = smov 0   ;;  %s1600_s25 = smov 0   ;;  %s1969_s0 = inlined_call_operand.vmem [shape: bf16[18,2048], index: 0, kind: input, shape index: {}]   ;;  %s1970_s1 = inlined_call_operand.vmem [shape: bf16[8,18], index: 1, kind: input, shape index: {}]   ;;  %s1971_s2 = inlined_call_operand.vmem [shape: bf16[18,2048], index: 2, kind: input, shape index: {}]   ;;  %s1972_s3 = inlined_call_operand.vmem [shape: bf16[8,18], index: 3, kind: input, shape index: {}]   ;;  %s1973_s4 = inlined_call_operand.vmem [shape: f32[8,1], index: 4, kind: input, shape index: {}]   ;;  %s1974_s5 = inlined_call_operand.vmem [shape: f32[2,2048], index: 5, kind: input, shape index: {}]   ;;  %s1975_s6 = inlined_call_operand.vmem [shape: f32[2,2048], index: 6, kind: output, shape index: {0}]   ;;  %s1976_s7 = inlined_call_operand.vmem [shape: f32[2,2048], index: 7, kind: output, shape index: {1}]  }
   0x1   :  { %s1602_s26 = smov 0  }
   0x2 LB: > { %s1317_s27 = sadd.s32 4294967295, %s1555_s26   ;;  %s1615_s28 = sadd.s32 1, %s1555_s26   ;;  %s1555_s26 = sphi %s1602_s26, %s1990_s26   ;;  %s1551_s25 = sphi %s1600_s25, %s1989_s25   ;;  %s1547_s24 = sphi %s1598_s24, %s1988_s24  }
   0x3   : > { %s22_s29 = ssub.s32 %s1555_s26, %s1615_s28  ;;  %s25_s30 = sadd.s32 1, %s1551_s25 }
   0x4   : > { %p23_p0 = scmp.eq.s32.totalorder %s22_s29, 0  ;;  %p32_p1 = scmp.ne.s32.totalorder %s1551_s25, %s1547_s24 }
   0x5   : > { %p33_p2 = scmp.eq.s32.totalorder %s1555_s26, 0  ;;  %p1320_p4 = scmp.ge.s32.totalorder %s1555_s26, 2 }
   0x6   : > { %s1624_s8 = scalar_select %p23_p0, %s1551_s25, %s25_s30  }
   0x7   : > { %p1626_p3 = por %p33_p2, %p32_p1  ;;  %234 = sbr.rel (%p1320_p4) target bundleno = 44 (0x2c), region = 28 }
   0xc   : > { %237 = sbr.rel (!%p1626_p3) target bundleno = 28 (0x1c), region = 32  ;;  %s239_s10 = sand.u32 (%p1626_p3), 1, %s1551_s25  }
   0xd   : > { %s1422_s11 = sshll.u32 (%p1626_p3), %s1555_s26, 5  ;;  %s1440_s12 = smul.u32 (%p1626_p3), 96, %s239_s10 }
   0xe   : > { %s244_s15 = scalar_lea.vmem (%p1626_p3), %s1969_s0, %s1422_s11 }
   0xf   : > { %v257_v0 = vld [vmem:[%s244_s15] sm:$0xff] (%p1626_p3)  ;;  %v259_v1 = vld [vmem:[%s244_s15 + $0x8] sm:$0xff] (%p1626_p3)  ;;  %v261_v2 = vld [vmem:[%s244_s15 + $0x10] sm:$0xff] (%p1626_p3)  ;;  %s241_s16 = scalar_lea.vmem (%p1626_p3), [#allocation2], %s1440_s12 }
  0x10   : > { %258 = vst [vmem:[%s241_s16] sm:$0xff] (%p1626_p3), %v257_v0  ;;  %v263_v3 = vld [vmem:[%s244_s15 + $0x18] sm:$0xff] (%p1626_p3)  ;;  %v265_v4 = vld [vmem:[%s244_s15 + $0x40] sm:$0xff] (%p1626_p3)  ;;  %v267_v5 = vld [vmem:[%s244_s15 + $0x48] sm:$0xff] (%p1626_p3) }
  0x11   : > { %260 = vst [vmem:[%s241_s16 + $0x8] sm:$0xff] %v259_v1  ;;  %v269_v6 = vld [vmem:[%s244_s15 + $0x50] sm:$0xff]  ;;  %v271_v7 = vld [vmem:[%s244_s15 + $0x58] sm:$0xff]  ;;  %v273_v8 = vld [vmem:[%s244_s15 + $0x80] sm:$0xff] }
  0x12   : > { %262 = vst [vmem:[%s241_s16 + $0x10] sm:$0xff] %v261_v2  ;;  %v275_v9 = vld [vmem:[%s244_s15 + $0x88] sm:$0xff]  ;;  %v277_v10 = vld [vmem:[%s244_s15 + $0x90] sm:$0xff]  ;;  %v279_v11 = vld [vmem:[%s244_s15 + $0x98] sm:$0xff] }
  0x13   : > { %264 = vst [vmem:[%s241_s16 + $0x18] sm:$0xff] %v263_v3 }
  0x14   : > { %266 = vst [vmem:[%s241_s16 + $0x20] sm:$0xff] %v265_v4 }
  0x15   : > { %268 = vst [vmem:[%s241_s16 + $0x28] sm:$0xff] %v267_v5 }
  0x16   : > { %270 = vst [vmem:[%s241_s16 + $0x30] sm:$0xff] %v269_v6 }
  0x17   : > { %272 = vst [vmem:[%s241_s16 + $0x38] sm:$0xff] %v271_v7 }
  0x18   : > { %274 = vst [vmem:[%s241_s16 + $0x40] sm:$0xff] %v273_v8 }
  0x19   : > { %276 = vst [vmem:[%s241_s16 + $0x48] sm:$0xff] %v275_v9 }
  0x1a   : > { %278 = vst [vmem:[%s241_s16 + $0x50] sm:$0xff] %v277_v10 }
  0x1b   : > { %280 = vst [vmem:[%s241_s16 + $0x58] sm:$0xff] %v279_v11 }
  0x1c PF: > { %286 = sbr.rel (!%p1626_p3) target bundleno = 44 (0x2c), region = 55  ;;  %s288_s17 = sand.u32 (%p1626_p3), 1, %s1551_s25  }
  0x1d   : > { %s1423_s18 = sshll.u32 (%p1626_p3), %s1555_s26, 5  ;;  %s1441_s19 = smul.u32 (%p1626_p3), 96, %s288_s17 }
  0x1e   : > { %s293_s22 = scalar_lea.vmem (%p1626_p3), %s1971_s2, %s1423_s18 }
  0x1f   : > { %v306_v12 = vld [vmem:[%s293_s22] sm:$0xff] (%p1626_p3)  ;;  %v308_v13 = vld [vmem:[%s293_s22 + $0x8] sm:$0xff] (%p1626_p3)  ;;  %v310_v14 = vld [vmem:[%s293_s22 + $0x10] sm:$0xff] (%p1626_p3)  ;;  %s290_s23 = scalar_lea.vmem (%p1626_p3), [#allocation3], %s1441_s19 }
  0x20   : > { %307 = vst [vmem:[%s290_s23] sm:$0xff] (%p1626_p3), %v306_v12  ;;  %v312_v15 = vld [vmem:[%s293_s22 + $0x18] sm:$0xff] (%p1626_p3)  ;;  %v314_v16 = vld [vmem:[%s293_s22 + $0x40] sm:$0xff] (%p1626_p3)  ;;  %v316_v17 = vld [vmem:[%s293_s22 + $0x48] sm:$0xff] (%p1626_p3) }
  0x21   : > { %309 = vst [vmem:[%s290_s23 + $0x8] sm:$0xff] %v308_v13  ;;  %v318_v18 = vld [vmem:[%s293_s22 + $0x50] sm:$0xff]  ;;  %v320_v19 = vld [vmem:[%s293_s22 + $0x58] sm:$0xff]  ;;  %v322_v20 = vld [vmem:[%s293_s22 + $0x80] sm:$0xff] }
  0x22   : > { %311 = vst [vmem:[%s290_s23 + $0x10] sm:$0xff] %v310_v14  ;;  %v324_v21 = vld [vmem:[%s293_s22 + $0x88] sm:$0xff]  ;;  %v326_v22 = vld [vmem:[%s293_s22 + $0x90] sm:$0xff]  ;;  %v328_v23 = vld [vmem:[%s293_s22 + $0x98] sm:$0xff] }
  0x23   : > { %313 = vst [vmem:[%s290_s23 + $0x18] sm:$0xff] %v312_v15 }
  0x24   : > { %315 = vst [vmem:[%s290_s23 + $0x20] sm:$0xff] %v314_v16 }
  0x25   : > { %317 = vst [vmem:[%s290_s23 + $0x28] sm:$0xff] %v316_v17 }
  0x26   : > { %319 = vst [vmem:[%s290_s23 + $0x30] sm:$0xff] %v318_v18 }
  0x27   : > { %321 = vst [vmem:[%s290_s23 + $0x38] sm:$0xff] %v320_v19 }
  0x28   : > { %323 = vst [vmem:[%s290_s23 + $0x40] sm:$0xff] %v322_v20 }
  0x29   : > { %325 = vst [vmem:[%s290_s23 + $0x48] sm:$0xff] %v324_v21 }
  0x2a   : > { %327 = vst [vmem:[%s290_s23 + $0x50] sm:$0xff] %v326_v22 }
  0x2b   : > { %329 = vst [vmem:[%s290_s23 + $0x58] sm:$0xff] %v328_v23 }
  0x2c PF: > { %p1325_p5 = scmp.ge.s32.totalorder %s1555_s26, 1  ;;  %p343_p6 = scmp.lt.s32.totalorder %s1555_s26, 3 }
  0x2e   : > { %p344_p7 = pnand %p1325_p5, %p343_p6 }
  0x2f   : > { %s350_s29 = sand.u32 (!%p344_p7), 1, %s1547_s24   ;;  %s1326_s16 = sshll.u32 (!%p344_p7), %s1317_s27, 3 }
  0x30   : > { %347 = sbr.rel (%p344_p7) target bundleno = 334 (0x14e), region = 82  ;;  %p405_p8 = scmp.lt.s32.totalorder (!%p344_p7), %s1326_s16, 15 }
  0x31   : > { %s1648_s30 = smul.u32 (!%p344_p7), 96, %s350_s29 }
  0x33   : > { %s1651_s9 = scalar_lea.vmem (!%p344_p7), [#allocation3], %s1648_s30  ;;  %s1670_s24 = scalar_lea.vmem (!%p344_p7), [#allocation2], %s1648_s30 }
  0x35   : > { %v445_v24 = vld [vmem:[%s1651_s9 + $0x40] sm:$0x11]  ;;  %v446_v25 = vld [vmem:[%s1651_s9 + $0x48] sm:$0x11]  ;;  %vm513_vm0 = vcmask 1040384   ;;  %vm509_vm1 = vcmask 146432  }
  0x36   : > { %v1334_v26 = vld [vmem:[%s1651_s9] sm:$0xf]  ;;  %v477_v27 = vunpack.c.l.b16 %v445_v24  ;;  %v478_v28 = vunpack.c.h.b16 %v445_v24  ;;  %v479_v29 = vunpack.c.l.b16 %v446_v25  ;;  %v480_v30 = vunpack.c.h.b16 %v446_v25  ;;  %v1432_v32 = vld [vmem:[%s1651_s9 + $0x4] sm:$0xf]  ;;  %v1342_v38 = vld [vmem:[%s1651_s9 + $0x8] sm:$0xf] }
  0x37   : > { %v1436_v31 = vld [vmem:[%s1651_s9 + $0x1c] sm:$0xf0]  ;;  %v1336_v33 = vld [vmem:[%s1651_s9 + $0x20] sm:$0xf0]  ;;  %v448_v39 = vld [vmem:[%s1651_s9 + $0x58] sm:$0x11] }
  0x38   : > { %v493_v34 = vpack.c.b16 %v477_v27, %v477_v27  ;;  %v494_v35 = vpack.c.b16 %v478_v28, %v478_v28  ;;  %v495_v36 = vpack.c.b16 %v479_v29, %v479_v29  ;;  %v496_v37 = vpack.c.b16 %v480_v30, %v480_v30  ;;  %v447_v40 = vld [vmem:[%s1651_s9 + $0x50] sm:$0x11]  ;;  %v1437_v43 = vld [vmem:[%s1651_s9 + $0x24] sm:$0xf0]  ;;  %v1433_v44 = vld [vmem:[%s1651_s9 + $0xc] sm:$0xf] }
  0x39   : > { %v1335_v41 = vor.u32 %v1436_v31, %v1334_v26  ;;  %v1339_v42 = vor.u32 %v1432_v32, %v1336_v33  ;;  %v1344_v45 = vld [vmem:[%s1651_s9 + $0x28] sm:$0xf0]  ;;  %v483_v46 = vunpack.c.l.b16 %v448_v39  ;;  %v484_v47 = vunpack.c.h.b16 %v448_v39  ;;  %v432_v59 = vld [vmem:[%s1670_s24 + $0x40] sm:$0x11]  ;;  %v1358_v63 = vld [vmem:[%s1651_s9 + $0x18] sm:$0xf] }
  0x3a   : > { %v515_v48 = vsel %vm513_vm0, %v493_v34, 0  ;;  %v518_v49 = vsel %vm513_vm0, %v494_v35, 0  ;;  %v521_v50 = vsel %vm513_vm0, %v495_v36, 0  ;;  %v524_v51 = vsel %vm513_vm0, %v496_v37, 0  ;;  %v433_v58 = vld [vmem:[%s1670_s24 + $0x48] sm:$0x11] }
  0x3b   : > { %544 = vmatpush.bf16.msra.mxu0 %v515_v48  ;;  %557 = vmatpush.bf16.msra.mxu1 %v518_v49  ;;  %v499_v52 = vpack.c.b16 %v483_v46, %v483_v46  ;;  %v500_v53 = vpack.c.b16 %v484_v47, %v484_v47  ;;  %v481_v54 = vunpack.c.l.b16 %v447_v40  ;;  %v482_v55 = vunpack.c.h.b16 %v447_v40  ;;  %v1439_v0 = vld [vmem:[%s1651_s9 + $0x34] sm:$0xf0]  ;;  %v1435_v2 = vld [vmem:[%s1651_s9 + $0x1c] sm:$0xf]  ;;  %v1350_v9 = vld [vmem:[%s1651_s9 + $0x10] sm:$0xf] }
  0x3c   : > { %570 = vmatpush.bf16.msra.mxu2 %v521_v50  ;;  %583 = vmatpush.bf16.msra.mxu3 %v524_v51  ;;  %v1343_v56 = vor.u32 %v1437_v43, %v1342_v38  ;;  %v1347_v57 = vor.u32 %v1433_v44, %v1344_v45  ;;  %v1360_v3 = vld [vmem:[%s1651_s9 + $0x38] sm:$0xf0]  ;;  %v672_v4 = vunpack.c.l.b16 %v433_v58  ;;  %v673_v5 = vunpack.c.h.b16 %v433_v58  ;;  %v1683_v7 = vld [vmem:[%s1972_s3] sm:$0xf]  ;;  %v1438_v10 = vld [vmem:[%s1651_s9 + $0x2c] sm:$0xf0] }
  0x3d   : > { %v533_v60 = vsel %vm513_vm0, %v499_v52, 0  ;;  %v497_v61 = vpack.c.b16 %v481_v54, %v481_v54  ;;  %v498_v62 = vpack.c.b16 %v482_v55, %v482_v55  ;;  %v536_v1 = vsel %vm513_vm0, %v500_v53, 0  ;;  %v1434_v17 = vld [vmem:[%s1651_s9 + $0x14] sm:$0xf]  ;;  %v1382_v21 = vld [vmem:[%s1670_s24 + $0x8] sm:$0xf] }
  0x3e   : > { %v670_v6 = vunpack.c.l.b16 %v432_v59  ;;  %v671_v8 = vunpack.c.h.b16 %v432_v59  ;;  %v688_v11 = vpack.c.b16 %v672_v4, %v672_v4  ;;  %v689_v12 = vpack.c.b16 %v673_v5, %v673_v5  ;;  %v1352_v18 = vld [vmem:[%s1651_s9 + $0x30] sm:$0xf0]  ;;  %v1429_v22 = vld [vmem:[%s1670_s24 + $0x24] sm:$0xf0]  ;;  %v1425_v25 = vld [vmem:[%s1670_s24 + $0xc] sm:$0xf] }
  0x3f   : > { %545 = vmatpush.bf16.msra.mxu0 %v1335_v41  ;;  %558 = vmatpush.bf16.msra.mxu1 %v1339_v42  ;;  %v527_v13 = vsel %vm513_vm0, %v497_v61, 0  ;;  %v530_v14 = vsel %vm513_vm0, %v498_v62, 0  ;;  %v1359_v15 = vor.u32 %v1439_v0, %v1358_v63  ;;  %v1363_v16 = vor.u32 %v1435_v2, %v1360_v3  ;;  %v1384_v26 = vld [vmem:[%s1670_s24 + $0x28] sm:$0xf0]  ;;  %v1374_v29 = vld [vmem:[%s1670_s24] sm:$0xf] }
  0x40   : > { %571 = vmatpush.bf16.msra.mxu2 %v1343_v56  ;;  %584 = vmatpush.bf16.msra.mxu3 %v1347_v57  ;;  %v686_v19 = vpack.c.b16 %v670_v6, %v670_v6  ;;  %v687_v20 = vpack.c.b16 %v671_v8, %v671_v8  ;;  %v712_v23 = vsel %vm513_vm0, %v688_v11, 0  ;;  %v715_v24 = vsel %vm513_vm0, %v689_v12, 0  ;;  %v1428_v30 = vld [vmem:[%s1670_s24 + $0x1c] sm:$0xf0]  ;;  %v1424_v31 = vld [vmem:[%s1670_s24 + $0x4] sm:$0xf] }
  0x41   : > { %v1351_v27 = vor.u32 %v1438_v10, %v1350_v9  ;;  %v1355_v28 = vor.u32 %v1434_v17, %v1352_v18  ;;  %v1383_v34 = vor.u32 %v1429_v22, %v1382_v21  ;;  %v1387_v35 = vor.u32 %v1425_v25, %v1384_v26  ;;  %v1376_v36 = vld [vmem:[%s1670_s24 + $0x20] sm:$0xf0]  ;;  %v435_v37 = vld [vmem:[%s1670_s24 + $0x58] sm:$0x11]  ;;  %v434_v38 = vld [vmem:[%s1670_s24 + $0x50] sm:$0x11] }
  0x42   : > { %1364 = vmatmul.msk.bf16.vlgmr.msra.gmra.mxu0 %vm509_vm1, %v1683_v7  ;;  %1365 = vmatmul.msk.bf16.vlgmr.msra.gmra.mxu1 %vm509_vm1, %v1683_v7  ;;  %v706_v32 = vsel %vm513_vm0, %v686_v19, 0  ;;  %v709_v33 = vsel %vm513_vm0, %v687_v20, 0  ;;  %v1557_v39 = vmov 0   ;;  %v833_v40 = vld [vmem:[%s1973_s4] sm:$0xff]  ;;  %v1375_v41 = vor.u32 %v1428_v30, %v1374_v29  ;;  %v1390_v57 = vld [vmem:[%s1670_s24 + $0x10] sm:$0xf] }
  0x43   : > { %1366 = vmatmul.msk.bf16.vlgmr.msra.gmra.mxu2 %vm509_vm1, %v1683_v7  ;;  %1367 = vmatmul.msk.bf16.vlgmr.msra.gmra.mxu3 %vm509_vm1, %v1683_v7  ;;  %v1379_v42 = vor.u32 %v1424_v31, %v1376_v36  ;;  %v676_v43 = vunpack.c.l.b16 %v435_v37  ;;  %v677_v44 = vunpack.c.h.b16 %v435_v37  ;;  %v674_v45 = vunpack.c.l.b16 %v434_v38  ;;  %v1398_v51 = vld [vmem:[%s1670_s24 + $0x18] sm:$0xf]  ;;  %v1427_v53 = vld [vmem:[%s1670_s24 + $0x1c] sm:$0xf]  ;;  %v1430_v58 = vld [vmem:[%s1670_s24 + $0x2c] sm:$0xf0] }
  0x44   : > { %622 = vmatpush.bf16.msrb.mxu2 %v533_v60  ;;  %635 = vmatpush.bf16.msrb.mxu3 %v536_v1  ;;  %v675_v46 = vunpack.c.h.b16 %v434_v38  ;;  %v1431_v52 = vld [vmem:[%s1670_s24 + $0x34] sm:$0xf0]  ;;  %v1400_v54 = vld [vmem:[%s1670_s24 + $0x38] sm:$0xf0]  ;;  %v1426_v61 = vld [vmem:[%s1670_s24 + $0x14] sm:$0xf]  ;;  %v1391_v1 = vor.u32 %v1430_v58, %v1390_v57 }
  0x45   : > { %596 = vmatpush.bf16.msrb.mxu0 %v527_v13  ;;  %609 = vmatpush.bf16.msrb.mxu1 %v530_v14  ;;  %v692_v47 = vpack.c.b16 %v676_v43, %v676_v43  ;;  %v693_v48 = vpack.c.b16 %v677_v44, %v677_v44  ;;  %v690_v49 = vpack.c.b16 %v674_v45, %v674_v45  ;;  %v1392_v62 = vld [vmem:[%s1670_s24 + $0x30] sm:$0xf0]  ;;  %v423_v3 = vld [vmem:[%s1970_s1] sm:$0xf]  ;;  %s1992_s16 = smov (!%p405_p8, %s1326_s16), 15 }
  0x46   : > { %1468 = vset.pattern.permute.xlu0 %v1557_v39  ;;  %v691_v50 = vpack.c.b16 %v675_v46, %v675_v46  ;;  %v1399_v63 = vor.u32 %v1431_v52, %v1398_v51  ;;  %v1403_v0 = vor.u32 %v1427_v53, %v1400_v54  ;;  %v1395_v2 = vor.u32 %v1426_v61, %v1392_v62  ;;  %s1749_s17 = sshll.u32 %s1992_s16, 1 }
  0x47   : > { %836 = vperm.xlu0 %1468, %v833_v40   ;;  %v724_v55 = vsel %vm513_vm0, %v692_v47, 0  ;;  %v727_v56 = vsel %vm513_vm0, %v693_v48, 0  ;;  %v718_v59 = vsel %vm513_vm0, %v690_v49, 0  ;;  %s1755_s20 = scalar_lea.vmem %s1974_s5, %s1749_s17  ;;  %s1946_s21 = scalar_lea.vmem %s1975_s6, %s1749_s17 }
  0x48   : > { %623 = vmatpush.bf16.msrb.mxu2 %v1359_v15  ;;  %636 = vmatpush.bf16.msrb.mxu3 %v1363_v16  ;;  %v721_v60 = vsel %vm513_vm0, %v691_v50, 0  ;;  %v1007_v18 = vld [vmem:[%s1755_s20] sm:$0xff]  ;;  %v1008_v46 = vld [vmem:[%s1755_s20 + $0x8] sm:$0xff]  ;;  %s420_s29 = scalar_lea.vmem %s1976_s7, %s1749_s17 }
  0x49   : > { %597 = vmatpush.bf16.msrb.mxu0 %v1351_v27  ;;  %610 = vmatpush.bf16.msrb.mxu1 %v1355_v28  ;;  %1012 = vst [vmem:[#allocation1 + $0x1] ss:$4 sm:$0xff] %v1007_v18 }
  0x4a   : > { %1014 = vst [vmem:[#allocation1 + $0x21] ss:$4 sm:$0xff] %v1008_v46 }
  0x4c   : > { %761 = vmatpush.bf16.msra.mxu2 %v712_v23  ;;  %774 = vmatpush.bf16.msra.mxu3 %v715_v24 }
  0x4d   : > { %735 = vmatpush.bf16.msra.mxu0 %v706_v32  ;;  %748 = vmatpush.bf16.msra.mxu1 %v709_v33 }
  0x50   : > { %762 = vmatpush.bf16.msra.mxu2 %v1383_v34  ;;  %775 = vmatpush.bf16.msra.mxu3 %v1387_v35  ;;  %v1018_v18 = vld.sshfl [vmem:[#allocation1 + $0x18] sm:$0xff pattern:$0x73625140] }
  0x51   : > { %736 = vmatpush.bf16.msra.mxu0 %v1375_v41  ;;  %749 = vmatpush.bf16.msra.mxu1 %v1379_v42 }
  0x52   : > { %1368 = vmatmul.msk.bf16.vlgmr.msrb.gmra.mxu0 %vm509_vm1, %v1683_v7  ;;  %1369 = vmatmul.msk.bf16.vlgmr.msrb.gmra.mxu1 %vm509_vm1, %v1683_v7 }
  0x53   : > { %1370 = vmatmul.msk.bf16.vlgmr.msrb.gmra.mxu2 %vm509_vm1, %v1683_v7  ;;  %1371 = vmatmul.msk.bf16.vlgmr.msrb.gmra.mxu3 %vm509_vm1, %v1683_v7 }
  0x54   : > { %813 = vmatpush.bf16.msrb.mxu2 %v724_v55  ;;  %826 = vmatpush.bf16.msrb.mxu3 %v727_v56 }
  0x55   : > { %787 = vmatpush.bf16.msrb.mxu0 %v718_v59  ;;  %800 = vmatpush.bf16.msrb.mxu1 %v721_v60 }
  0x58   : > { %814 = vmatpush.bf16.msrb.mxu2 %v1399_v63  ;;  %827 = vmatpush.bf16.msrb.mxu3 %v1403_v0 }
  0x59   : > { %788 = vmatpush.bf16.msrb.mxu0 %v1391_v1  ;;  %801 = vmatpush.bf16.msrb.mxu1 %v1395_v2 }
  0x62   : > { %1404 = vmatmul.msk.bf16.vlgmr.msra.gmra.mxu0 %vm509_vm1, %v423_v3  ;;  %1405 = vmatmul.msk.bf16.vlgmr.msra.gmra.mxu1 %vm509_vm1, %v423_v3 }
  0x63   : > { %1406 = vmatmul.msk.bf16.vlgmr.msra.gmra.mxu2 %vm509_vm1, %v423_v3  ;;  %1407 = vmatmul.msk.bf16.vlgmr.msra.gmra.mxu3 %vm509_vm1, %v423_v3 }
  0x72   : > { %1408 = vmatmul.msk.bf16.vlgmr.msrb.gmra.mxu0 %vm509_vm1, %v423_v3  ;;  %1409 = vmatmul.msk.bf16.vlgmr.msrb.gmra.mxu1 %vm509_vm1, %v423_v3 }
  0x73   : > { %1410 = vmatmul.msk.bf16.vlgmr.msrb.gmra.mxu2 %vm509_vm1, %v423_v3  ;;  %1411 = vmatmul.msk.bf16.vlgmr.msrb.gmra.mxu3 %vm509_vm1, %v423_v3 }
  0xb9   : > { %v1762_v19 = vpop.permute.xlu0 %836 }
  0xbf   : > { %v547_v4 = vpop.f32.mrf.mxu0  ;;  %v560_v5 = vpop.f32.mrf.mxu1 }
  0xc6   : > { %v573_v6 = vpop.f32.mrf.mxu2  ;;  %v586_v7 = vpop.f32.mrf.mxu3 }
  0xc7   : > { %v549_v8 = vpop.f32.mrf.mxu0  ;;  %v562_v9 = vpop.f32.mrf.mxu1 }
  0xce   : > { %v575_v10 = vpop.f32.mrf.mxu2  ;;  %v588_v11 = vpop.f32.mrf.mxu3 }
  0xcf   : > { %v599_v12 = vpop.f32.mrf.mxu0  ;;  %v612_v13 = vpop.f32.mrf.mxu1 }
  0xd6   : > { %v1757_v14 = vpop.f32.mrf.mxu2  ;;  %v1759_v15 = vpop.f32.mrf.mxu3 }
  0xd7   : > { %v601_v16 = vpop.f32.mrf.mxu0  ;;  %v614_v17 = vpop.f32.mrf.mxu1 }
  0xde   : > { %v627_v20 = vpop.f32.mrf.mxu2  ;;  %v640_v21 = vpop.f32.mrf.mxu3 }
  0xdf   : > { %v738_v22 = vpop.f32.mrf.mxu0  ;;  %v751_v23 = vpop.f32.mrf.mxu1 }
  0xe0   : > { %v739_v24 = vadd.f32 %v738_v22, %v547_v4  ;;  %v752_v25 = vadd.f32 %v751_v23, %v560_v5 }
  0xe2   : > { %v839_v26 = vadd.f32 %v1762_v19, %v739_v24  ;;  %v840_v27 = vadd.f32 %v1762_v19, %v752_v25 }
  0xe4   : > { %v1412_v28 = vmul.f32 -1.442695, %v839_v26  ;;  %v1413_v29 = vmul.f32 -1.442695, %v840_v27 }
  0xe6   : > { %1469 = vpow2.f32 %v1412_v28  ;;  %v764_v30 = vpop.f32.mrf.mxu2  ;;  %v777_v31 = vpop.f32.mrf.mxu3 }
  0xe7   : > { %1471 = vpow2.f32 %v1413_v29  ;;  %v765_v32 = vadd.f32 %v764_v30, %v573_v6  ;;  %v778_v33 = vadd.f32 %v777_v31, %v586_v7  ;;  %v740_v34 = vpop.f32.mrf.mxu0  ;;  %v753_v35 = vpop.f32.mrf.mxu1 }
  0xe8   : > { %1473 = vtanh.f32 %v839_v26 }
  0xe9   : > { %v841_v36 = vadd.f32 %v1762_v19, %v765_v32  ;;  %v842_v37 = vadd.f32 %v1762_v19, %v778_v33  ;;  %1475 = vtanh.f32 %v840_v27  ;;  %v1015_v33 = vld.sshfl [vmem:[#allocation1] sm:$0xff pattern:$0x73625140] }
  0xeb   : > { %v1414_v38 = vmul.f32 -1.442695, %v841_v36  ;;  %v1415_v39 = vmul.f32 -1.442695, %v842_v37  ;;  %1477 = vtanh.f32 %v841_v36 }
  0xec   : > { %v1470_v40 = vpop.eup %1469 }
  0xed   : > { %v1472_v41 = vpop.eup %1471  ;;  %v1768_v42 = vadd.f32 1.0, %v1470_v40  ;;  %1479 = vpow2.f32 %v1414_v38 }
  0xee   : > { %v1770_v43 = vadd.f32 1.0, %v1472_v41  ;;  %1481 = vpow2.f32 %v1415_v39  ;;  %v766_v44 = vpop.f32.mrf.mxu2  ;;  %v779_v45 = vpop.f32.mrf.mxu3 }
  0xef   : > { %1483 = vrcp.f32 %v1768_v42  ;;  %v790_v47 = vpop.f32.mrf.mxu0  ;;  %v803_v48 = vpop.f32.mrf.mxu1  ;;  %v888_v55 = vand.u32 2147483647, %v1768_v42  ;;  %v890_v56 = vand.u32 2147483648, %v1768_v42  ;;  %vm884_vm2 = vweird.f32 %v1768_v42 }
  0xf0   : > { %v1774_v49 = vpop.eup %1473  ;;  %1485 = vrcp.f32 %v1770_v43  ;;  %v791_v51 = vadd.f32 %v790_v47, %v599_v12  ;;  %v804_v52 = vadd.f32 %v803_v48, %v612_v13  ;;  %v903_v60 = vand.u32 2147483647, %v1770_v43 }
  0xf1   : > { %v1777_v50 = vpop.eup %1475  ;;  %1487 = vtanh.f32 %v842_v37  ;;  %v905_v61 = vand.u32 2147483648, %v1770_v43  ;;  %v1047_v0 = vrot.slane %v1774_v49, 6  ;;  %vm899_vm3 = vweird.f32 %v1770_v43 }
  0xf2   : > { %v1779_v53 = vpop.eup %1477  ;;  %v843_v57 = vadd.f32 %v1762_v19, %v791_v51  ;;  %v1785_v58 = vadd.f32 %v1762_v19, %v804_v52  ;;  %v1048_v1 = vrot.slane %v1777_v50, 6  ;;  %vm1799_vm4 = vcmp.eq.f32.partialorder %v888_v55, 8.507059e+37  ;;  %v1016_v51 = vld.sshfl [vmem:[#allocation1 + $0x8] sm:$0xff pattern:$0x73625140] }
  0xf3   : > { %v1480_v54 = vpop.eup %1479  ;;  %v891_v9 = vor.u32 1.1754944e-38, %v890_v56  ;;  %vm1807_vm5 = vcmp.eq.f32.partialorder %v903_v60, 8.507059e+37  ;;  %v906_v20 = vor.u32 1.1754944e-38, %v905_v61  ;;  %v1049_v22 = vrot.slane %v1779_v53, 6 }
  0xf4   : > { %v1482_v59 = vpop.eup %1481  ;;  %v1789_v62 = vadd.f32 1.0, %v1480_v54  ;;  %v1416_v5 = vmul.f32 -1.442695, %v843_v57  ;;  %v1417_v11 = vmul.f32 -1.442695, %v1785_v58 }
  0xf5   : > { %v1484_v63 = vpop.eup %1483  ;;  %v1794_v2 = vadd.f32 1.0, %v1482_v59 }
  0xf6   : > { %v1486_v3 = vpop.eup %1485  ;;  %v880_v4 = vmul.f32 %v1484_v63, %v1768_v42  ;;  %1489 = vrcp.f32 %v1789_v62  ;;  %v816_v6 = vpop.f32.mrf.mxu2  ;;  %vm885_vm6 = vweird.f32 %v1484_v63  ;;  %v918_v24 = vand.u32 2147483647, %v1789_v62 }
  0xf7   : > { %v829_v7 = vpop.f32.mrf.mxu3  ;;  %v895_v10 = vmul.f32 %v1486_v3, %v1770_v43  ;;  %v792_v12 = vpop.f32.mrf.mxu0  ;;  %1491 = vrcp.f32 %v1794_v2  ;;  %v817_v25 = vadd.f32 %v816_v6, %v1757_v14  ;;  %vm900_vm7 = vweird.f32 %v1486_v3  ;;  %vm1824_vm9 = vmor %vm884_vm2, %vm885_vm6 }
  0xf8   : > { %v805_v13 = vpop.f32.mrf.mxu1  ;;  %v1805_v16 = vpop.eup %1487  ;;  %v881_v17 = vsub.f32 1.0, %v880_v4  ;;  %1493 = vtanh.f32 %v843_v57  ;;  %vm914_vm8 = vweird.f32 %v1789_v62  ;;  %v920_v30 = vand.u32 2147483648, %v1789_v62  ;;  %vm901_vm11 = vmor %vm899_vm3, %vm900_vm7 }
  0xf9   : > { %v896_v21 = vsub.f32 1.0, %v895_v10  ;;  %1495 = vpow2.f32 %v1416_v5  ;;  %v1050_v27 = vrot.slane %v1805_v16, 6  ;;  %v1819_v31 = vadd.f32 %v1762_v19, %v817_v25  ;;  %v1017_v10 = vld.sshfl [vmem:[#allocation1 + $0x10] sm:$0xff pattern:$0x73625140] }
  0xfa   : > { %v882_v23 = vmul.f32 %v1484_v63, %v881_v17  ;;  %1497 = vpow2.f32 %v1417_v11  ;;  %vm929_vm10 = vweird.f32 %v1794_v2  ;;  %v933_v35 = vand.u32 2147483647, %v1794_v2 }
  0xfb   : > { %v897_v26 = vmul.f32 %v1486_v3, %v896_v21  ;;  %vm1836_vm12 = vcmp.eq.f32.partialorder %v918_v24, 8.507059e+37  ;;  %v935_v39 = vand.u32 2147483648, %v1794_v2  ;;  %v1418_v40 = vmul.f32 -1.442695, %v1819_v31 }
  0xfc   : > { %v1490_v28 = vpop.eup %1489  ;;  %v883_v29 = vadd.f32 %v1484_v63, %v882_v23  ;;  %v830_v54 = vadd.f32 %v829_v7, %v1759_v15  ;;  %v921_v50 = vor.u32 1.1754944e-38, %v920_v30  ;;  %vm934_vm1 = vcmp.eq.f32.partialorder %v933_v35, 8.507059e+37 }
  0xfd   : > { %v898_v14 = vadd.f32 %v1486_v3, %v897_v26  ;;  %v910_v34 = vmul.f32 %v1490_v28, %v1789_v62  ;;  %v1492_v36 = vpop.eup %1491  ;;  %vm915_vm13 = vweird.f32 %v1490_v28  ;;  %1499 = vpow2.f32 %v1418_v40 }
  0xfe   : > { %v887_v37 = vsel %vm1824_vm9, %v1484_v63, %v883_v29  ;;  %v818_v41 = vpop.f32.mrf.mxu2  ;;  %v1842_v44 = vpop.eup %1493  ;;  %v925_v43 = vmul.f32 %v1492_v36, %v1794_v2  ;;  %vm930_vm14 = vweird.f32 %v1492_v36  ;;  %vm916_vm15 = vmor %vm914_vm8, %vm915_vm13  ;;  %v936_v62 = vor.u32 1.1754944e-38, %v935_v39 }
  0xff   : > { %v831_v42 = vpop.f32.mrf.mxu3  ;;  %v1846_v45 = vsel %vm1799_vm4, %v891_v9, %v887_v37  ;;  %v902_v46 = vsel %vm901_vm11, %v1486_v3, %v898_v14  ;;  %v911_v47 = vsub.f32 1.0, %v910_v34  ;;  %v1496_v48 = vpop.eup %1495  ;;  %vm931_vm0 = vmor %vm929_vm10, %vm930_vm14  ;;  %v1882_v11 = vadd.f32 %v1762_v19, %v830_v54 }
 0x100   : > { %v1851_v49 = vsel %vm1807_vm5, %v906_v20, %v902_v46  ;;  %v1063_v52 = vmul.f32 %v1047_v0, %v1846_v45  ;;  %v1498_v55 = vpop.eup %1497  ;;  %v1031_v56 = vmul.f32 %v1015_v33, %v1846_v45  ;;  %v926_v60 = vsub.f32 1.0, %v925_v43 }
 0x101   : > { %v1064_v57 = vmul.f32 %v1048_v1, %v1851_v49  ;;  %v912_v59 = vmul.f32 %v1490_v28, %v911_v47  ;;  %v1859_v63 = vadd.f32 1.0, %v1496_v48  ;;  %v1032_v3 = vmul.f32 %v1016_v51, %v1851_v49  ;;  %v1019_v51 = vld.sshfl [vmem:[#allocation1 + $0x20] sm:$0xff pattern:$0x73625140] }
 0x102   : > { %v1079_v61 = vrot.slane %v1063_v52, 6  ;;  %v927_v5 = vmul.f32 %v1492_v36, %v926_v60  ;;  %v1868_v1 = vadd.f32 1.0, %v1498_v55  ;;  %v1419_v53 = vmul.f32 -1.442695, %v1882_v11 }
 0x103   : > { %v1080_v0 = vrot.slane %v1064_v57, 6  ;;  %v913_v4 = vadd.f32 %v1490_v28, %v912_v59  ;;  %1501 = vrcp.f32 %v1859_v63  ;;  %v1500_v13 = vpop.eup %1499  ;;  %v948_v30 = vand.u32 2147483647, %v1859_v63 }
 0x104   : > { %v1862_v15 = vadd.f32 %v1079_v61, %v1031_v56  ;;  %v928_v8 = vadd.f32 %v1492_v36, %v927_v5  ;;  %1503 = vtanh.f32 %v1785_v58  ;;  %v1895_v23 = vadd.f32 1.0, %v1500_v13 }
 0x105   : > { %v1870_v6 = vadd.f32 %v1080_v0, %v1032_v3  ;;  %v917_v7 = vsel %vm916_vm15, %v1490_v28, %v913_v4  ;;  %v950_v16 = vand.u32 2147483648, %v1859_v63  ;;  %v1051_v41 = vrot.slane %v1842_v44, 6  ;;  %v1022_v44 = vld.sshfl [vmem:[#allocation1 + $0x38] sm:$0xff pattern:$0x73625140] }
 0x106   : > { %1505 = vtanh.f32 %v1862_v15  ;;  %v1876_v9 = vsel %vm1836_vm12, %v921_v50, %v917_v7  ;;  %v932_v12 = vsel %vm931_vm0, %v1492_v36, %v928_v8  ;;  %v963_v36 = vand.u32 2147483647, %v1868_v1 }
 0x107   : > { %1507 = vtanh.f32 %v1870_v6  ;;  %v1065_v58 = vmul.f32 %v1049_v22, %v1876_v9  ;;  %v1888_v17 = vsel %vm934_vm1, %v936_v62, %v932_v12  ;;  %v1033_v2 = vmul.f32 %v1017_v10, %v1876_v9 }
 0x108   : > { %1509 = vrcp.f32 %v1868_v1  ;;  %v1066_v19 = vmul.f32 %v1050_v27, %v1888_v17  ;;  %v1034_v25 = vmul.f32 %v1018_v18, %v1888_v17  ;;  %v965_v42 = vand.u32 2147483648, %v1868_v1 }
 0x109   : > { %v1081_v20 = vrot.slane %v1065_v58, 6  ;;  %v1502_v21 = vpop.eup %1501  ;;  %1511 = vrcp.f32 %v1895_v23  ;;  %vm944_vm3 = vweird.f32 %v1859_v63  ;;  %vm949_vm5 = vcmp.eq.f32.partialorder %v948_v30, 8.507059e+37 }
 0x10a   : > { %v1898_v22 = vpop.eup %1503  ;;  %v1082_v26 = vrot.slane %v1066_v19, 6  ;;  %v940_v28 = vmul.f32 %v1502_v21, %v1859_v63  ;;  %vm945_vm2 = vweird.f32 %v1502_v21  ;;  %v951_v48 = vor.u32 1.1754944e-38, %v950_v16 }
 0x10b   : > { %v1900_v24 = vadd.f32 %v1081_v20, %v1033_v2  ;;  %vm946_vm4 = vmor %vm944_vm3, %vm945_vm2  ;;  %vm959_vm6 = vweird.f32 %v1868_v1  ;;  %vm1922_vm7 = vcmp.eq.f32.partialorder %v963_v36, 8.507059e+37  ;;  %v966_v59 = vor.u32 1.1754944e-38, %v965_v42  ;;  %v1020_v2 = vld.sshfl [vmem:[#allocation1 + $0x28] sm:$0xff pattern:$0x73625140] }
 0x10c   : > { %v1506_v29 = vpop.eup %1505  ;;  %v1908_v14 = vadd.f32 %v1082_v26, %v1034_v25  ;;  %v941_v33 = vsub.f32 1.0, %v940_v28  ;;  %v978_v60 = vand.u32 2147483647, %v1895_v23  ;;  %v980_v4 = vand.u32 2147483648, %v1895_v23 }
 0x10d   : > { %v1508_v27 = vpop.eup %1507  ;;  %v1119_v32 = vrot.slane %v1506_v29, 6  ;;  %1513 = vtanh.f32 %v1900_v24  ;;  %vm974_vm11 = vweird.f32 %v1895_v23  ;;  %v1021_v26 = vld.sshfl [vmem:[#allocation1 + $0x30] sm:$0xff pattern:$0x73625140] }
 0x10e   : > { %v1510_v34 = vpop.eup %1509  ;;  %v1120_v35 = vrot.slane %v1508_v27, 6  ;;  %1515 = vpow2.f32 %v1419_v53  ;;  %v942_v38 = vmul.f32 %v1502_v21, %v941_v33  ;;  %vm979_vm13 = vcmp.eq.f32.partialorder %v978_v60, 8.507059e+37 }
 0x10f   : > { %v1135_v37 = vmul.f32 %v1119_v32, %v1846_v45  ;;  %1517 = vtanh.f32 %v1908_v14  ;;  %v955_v39 = vmul.f32 %v1510_v34, %v1868_v1  ;;  %v1052_v45 = vrot.slane %v1898_v22, 6  ;;  %v1512_v43 = vpop.eup %1511 }
 0x110   : > { %v1136_v40 = vmul.f32 %v1120_v35, %v1851_v49  ;;  %1519 = vtanh.f32 %v1819_v31  ;;  %v943_v46 = vadd.f32 %v1502_v21, %v942_v38  ;;  %vm960_vm8 = vweird.f32 %v1510_v34 }
 0x111   : > { %1151 = vst.sshfl [vmem:[#allocation1] sm:$0xff pattern:$0x73625140] %v1135_v37  ;;  %v956_v47 = vsub.f32 1.0, %v955_v39  ;;  %v970_v54 = vmul.f32 %v1512_v43, %v1895_v23  ;;  %vm961_vm9 = vmor %vm959_vm6, %vm960_vm8  ;;  %vm975_vm10 = vweird.f32 %v1512_v43  ;;  %v981_v1 = vor.u32 1.1754944e-38, %v980_v4 }
 0x112   : > { %1152 = vst.sshfl [vmem:[#allocation1 + $0x8] sm:$0xff pattern:$0x73625140] %v1136_v40  ;;  %v947_v49 = vsel %vm946_vm4, %v1502_v21, %v943_v46  ;;  %vm976_vm12 = vmor %vm974_vm11, %vm975_vm10 }
 0x113   : > { %v1514_v31 = vpop.eup %1513  ;;  %v957_v52 = vmul.f32 %v1510_v34, %v956_v47  ;;  %v952_v57 = vsel %vm949_vm5, %v951_v48, %v947_v49  ;;  %v971_v0 = vsub.f32 1.0, %v970_v54 }
 0x114   : > { %v1516_v55 = vpop.eup %1515  ;;  %v1121_v56 = vrot.slane %v1514_v31, 6  ;;  %v1067_v63 = vmul.f32 %v1051_v41, %v952_v57  ;;  %v1035_v10 = vmul.f32 %v1019_v51, %v952_v57 }
 0x115   : > { %v1518_v61 = vpop.eup %1517  ;;  %v958_v3 = vadd.f32 %v1510_v34, %v957_v52  ;;  %v878_v8 = vadd.f32 1.0, %v1516_v55  ;;  %v972_v12 = vmul.f32 %v1512_v43, %v971_v0 }
 0x116   : > { %v1520_v5 = vpop.eup %1519  ;;  %v1137_v50 = vmul.f32 %v1121_v56, %v1876_v9  ;;  %v1122_v7 = vrot.slane %v1518_v61, 6  ;;  %v1083_v62 = vrot.slane %v1067_v63, 6 }
 0x117   : > { %v962_v58 = vsel %vm961_vm9, %v1510_v34, %v958_v3  ;;  %1521 = vrcp.f32 %v878_v8  ;;  %v973_v19 = vadd.f32 %v1512_v43, %v972_v12  ;;  %v1053_v21 = vrot.slane %v1520_v5, 6 }
 0x118   : > { %1153 = vst.sshfl [vmem:[#allocation1 + $0x10] sm:$0xff pattern:$0x73625140] %v1137_v50  ;;  %v1138_v13 = vmul.f32 %v1122_v7, %v1888_v17  ;;  %v967_v18 = vsel %vm1922_vm7, %v966_v59, %v962_v58  ;;  %v1936_v9 = vadd.f32 %v1083_v62, %v1035_v10  ;;  %v995_v37 = vand.u32 2147483648, %v878_v8 }
 0x119   : > { %v1068_v20 = vmul.f32 %v1052_v45, %v967_v18  ;;  %v1036_v17 = vmul.f32 %v1020_v2, %v967_v18  ;;  %v977_v22 = vsel %vm976_vm12, %v1512_v43, %v973_v19  ;;  %v993_v38 = vand.u32 2147483647, %v878_v8 }
 0x11a   : > { %1154 = vst.sshfl [vmem:[#allocation1 + $0x18] sm:$0xff pattern:$0x73625140] %v1138_v13  ;;  %1523 = vtanh.f32 %v1936_v9  ;;  %v982_v25 = vsel %vm979_vm13, %v981_v1, %v977_v22  ;;  %vm989_vm15 = vweird.f32 %v878_v8  ;;  %v996_v47 = vor.u32 1.1754944e-38, %v995_v37 }
 0x11b   : > { %v1084_v53 = vrot.slane %v1068_v20, 6  ;;  %v1069_v29 = vmul.f32 %v1053_v21, %v982_v25  ;;  %1525 = vtanh.f32 %v1882_v11  ;;  %v1037_v23 = vmul.f32 %v1021_v26, %v982_v25 }
 0x11c   : > { %vm994_vm1 = vcmp.eq.f32.partialorder %v993_v38, 8.507059e+37 }
 0x11d   : > { %v1100_v28 = vadd.f32 %v1084_v53, %v1036_v17  ;;  %v1522_v30 = vpop.eup %1521  ;;  %v1085_v16 = vrot.slane %v1069_v29, 6 }
 0x11e   : > { %v985_v27 = vmul.f32 %v1522_v30, %v878_v8  ;;  %vm990_vm14 = vweird.f32 %v1522_v30 }
 0x11f   : > { %1527 = vtanh.f32 %v1100_v28  ;;  %v1101_v34 = vadd.f32 %v1085_v16, %v1037_v23  ;;  %vm991_vm0 = vmor %vm989_vm15, %vm990_vm14 }
 0x120   : > { %v1524_v32 = vpop.eup %1523  ;;  %v986_v35 = vsub.f32 1.0, %v985_v27 }
 0x121   : > { %v1160_v33 = vld [vmem:[#allocation1 + $0x2] ss:$4 sm:$0xff]  ;;  %v1123_v36 = vrot.slane %v1524_v32, 6  ;;  %1529 = vtanh.f32 %v1101_v34  ;;  %v1526_v39 = vpop.eup %1525 }
 0x122   : > { %1165 = vst [vmem:[%s1946_s21] sm:$0xff] %v1160_v33  ;;  %v987_v11 = vmul.f32 %v1522_v30, %v986_v35  ;;  %v1054_v45 = vrot.slane %v1526_v39, 6 }
 0x123   : > { %1175 = vst.sshfl [vmem:[#allocation1] sm:$0xff pattern:$0x73625140] %v1862_v15  ;;  %v1139_v40 = vmul.f32 %v1123_v36, %v952_v57 }
 0x124   : > { %1176 = vst.sshfl [vmem:[#allocation1 + $0x8] sm:$0xff pattern:$0x73625140] %v1870_v6  ;;  %v988_v42 = vadd.f32 %v1522_v30, %v987_v11 }
 0x125   : > { %v1528_v41 = vpop.eup %1527  ;;  %1177 = vst.sshfl [vmem:[#allocation1 + $0x10] sm:$0xff pattern:$0x73625140] %v1900_v24 }
 0x126   : > { %1178 = vst.sshfl [vmem:[#allocation1 + $0x18] sm:$0xff pattern:$0x73625140] %v1908_v14  ;;  %v1124_v46 = vrot.slane %v1528_v41, 6  ;;  %v992_v15 = vsel %vm991_vm0, %v1522_v30, %v988_v42 }
 0x127   : > { %1155 = vst.sshfl [vmem:[#allocation1 + $0x20] sm:$0xff pattern:$0x73625140] %v1139_v40  ;;  %v997_v48 = vsel %vm994_vm1, %v996_v47, %v992_v15  ;;  %v1530_v6 = vpop.eup %1529 }
 0x128   : > { %v1140_v43 = vmul.f32 %v1124_v46, %v967_v18  ;;  %v1070_v31 = vmul.f32 %v1054_v45, %v997_v48  ;;  %v1125_v24 = vrot.slane %v1530_v6, 6  ;;  %v1038_v14 = vmul.f32 %v1022_v44, %v997_v48 }
 0x12a   : > { %1156 = vst.sshfl [vmem:[#allocation1 + $0x28] sm:$0xff pattern:$0x73625140] %v1140_v43  ;;  %v1086_v49 = vrot.slane %v1070_v31, 6  ;;  %v1141_v51 = vmul.f32 %v1125_v24, %v982_v25 }
 0x12c   : > { %v1102_v54 = vadd.f32 %v1086_v49, %v1038_v14  ;;  %1157 = vst.sshfl [vmem:[#allocation1 + $0x30] sm:$0xff pattern:$0x73625140] %v1141_v51 }
 0x12d   : > { %v1184_v52 = vld [vmem:[#allocation1 + $0x1] ss:$4 sm:$0xff] }
 0x12e   : > { %1189 = vst [vmem:[%s420_s29] sm:$0xff] %v1184_v52  ;;  %1531 = vtanh.f32 %v1102_v54 }
 0x134   : > { %v1532_v55 = vpop.eup %1531 }
 0x135   : > { %v1126_v56 = vrot.slane %v1532_v55, 6 }
 0x137   : > { %v1142_v57 = vmul.f32 %v1126_v56, %v997_v48 }
 0x139   : > { %1158 = vst.sshfl [vmem:[#allocation1 + $0x38] sm:$0xff pattern:$0x73625140] %v1142_v57 }
 0x140   : > { %v1162_v59 = vld [vmem:[#allocation1 + $0x22] ss:$4 sm:$0xff] }
 0x141   : > { %1166 = vst [vmem:[%s1946_s21 + $0x8] sm:$0xff] %v1162_v59 }
 0x142   : > { %1179 = vst.sshfl [vmem:[#allocation1 + $0x20] sm:$0xff pattern:$0x73625140] %v1936_v9 }
 0x143   : > { %1180 = vst.sshfl [vmem:[#allocation1 + $0x28] sm:$0xff pattern:$0x73625140] %v1100_v28 }
 0x144   : > { %1181 = vst.sshfl [vmem:[#allocation1 + $0x30] sm:$0xff pattern:$0x73625140] %v1101_v34 }
 0x145   : > { %1182 = vst.sshfl [vmem:[#allocation1 + $0x38] sm:$0xff pattern:$0x73625140] %v1102_v54 }
 0x14c   : > { %v1186_v60 = vld [vmem:[#allocation1 + $0x21] ss:$4 sm:$0xff] }
 0x14d   : > { %1190 = vst [vmem:[%s420_s29 + $0x8] sm:$0xff] %v1186_v60 }
 0x14e PF: > { %p15_p9 = scmp.ge.s32.totalorder %s1615_s28, 4   ;;  %s1988_s24 = smov %s1551_s25 }
 0x14f   : > { %s1989_s25 = smov %s1624_s8  ;;  %s1990_s26 = smov %s1615_s28 }
 0x150   :  { %17 = sbr.rel (!%p15_p9) target bundleno = 2 (0x2), region = 154 }

</bundles_post_ra>
